<compile_context>
chip_gen: v6e
topology: v6e:2x2x1
jax: 0.10.0
libtpu: 0.0.40
codegen_flags: <defaults>
</compile_context>

<pallas_src>
import jax
import jax.numpy as jnp
from jax.experimental import pallas as pl
from jax.experimental.pallas import tpu as pltpu

IN_DIM = 28 * 28      # 784
HID_DIM = 128
LATENT_DIM = 32

F_PAD = 896           # 7 * 128  (padded feature dim)
L_PAD = 128           # padded latent dim


def _ae_kernel(x_ref,
               w1_ref, b1_ref,     # encoder: 896 -> 128   (bf16 W, f32 b)
               w2_ref, b2_ref,     # encoder: 128 -> 128 (latent padded)
               w3_ref, b3_ref,     # decoder: 128 -> 128
               w4_ref, b4_ref,     # decoder: 128 -> 896
               recon_ref, z_ref):
    """Full forward pass (4 matmuls + ReLU/Sigmoid) on one batch tile."""
    x = x_ref[...]                                                    # (TB, 896) bf16

    # ---- encoder ----
    h1 = jnp.dot(x, w1_ref[...], preferred_element_type=jnp.float32) + b1_ref[...]
    h1 = jnp.maximum(h1, 0.0)                                         # ReLU (f32 VPU)
    z = jnp.dot(h1.astype(jnp.bfloat16), w2_ref[...],
                preferred_element_type=jnp.float32) + b2_ref[...]     # (TB, 128) f32
    # padded latent lanes (32:128) are exactly 0 (zero weight cols + zero bias).

    # ---- decoder ----
    h2 = jnp.dot(z.astype(jnp.bfloat16), w3_ref[...],
                 preferred_element_type=jnp.float32) + b3_ref[...]
    h2 = jnp.maximum(h2, 0.0)                                         # ReLU
    logits = jnp.dot(h2.astype(jnp.bfloat16), w4_ref[...],
                     preferred_element_type=jnp.float32) + b4_ref[...]
    # Sigmoid: exp on EUP, approx reciprocal on EUP (frees VALU slots).
    e = jnp.exp(-logits)
    recon = pl.reciprocal(1.0 + e, approx=True)

    recon_ref[...] = recon.astype(recon_ref.dtype)
    z_ref[...] = z.astype(z_ref.dtype)


def _pad2(a, rows, cols):
    """Zero-pad a 2-D array up to (rows, cols)."""
    return jnp.pad(a, ((0, rows - a.shape[0]), (0, cols - a.shape[1])))


def autoencoder_forward(x_nchw, params, *, batch_tile=256):
    """x_nchw: (B, 1, 28, 28) float32.  Returns (x_recon (B,1,28,28), z (B,latent))."""
    B = x_nchw.shape[0]
    (w1, b1), (w2, b2), (w3, b3), (w4, b4) = params
    latent = w2.shape[1]

    # bf16 sublane packing wants a multiple of 16 rows per tile.
    assert batch_tile % 16 == 0, "batch_tile must be a multiple of 16"

    # --- pad batch to a multiple of batch_tile, features to lane-dense sizes ---
    n_tiles = pl.cdiv(B, batch_tile)
    B_pad = n_tiles * batch_tile

    x_flat = x_nchw.reshape(B, IN_DIM).astype(jnp.float32)            # nn.Flatten
    x_pad = _pad2(x_flat, B_pad, F_PAD).astype(jnp.bfloat16)          # (B_pad, 896) bf16

    # Weights stored as (in, out); zero-pad so padded lanes contribute nothing.
    w1p = _pad2(w1, F_PAD, HID_DIM).astype(jnp.bfloat16)              # (896, 128)
    b1p = b1.astype(jnp.float32)                                      # (1, 128)
    w2p = _pad2(w2, HID_DIM, L_PAD).astype(jnp.bfloat16)              # (128, 128)
    b2p = _pad2(b2, 1, L_PAD).astype(jnp.float32)                     # (1, 128)
    w3p = _pad2(w3, L_PAD, HID_DIM).astype(jnp.bfloat16)              # (128, 128)
    b3p = b3.astype(jnp.float32)                                      # (1, 128)
    w4p = _pad2(w4, HID_DIM, F_PAD).astype(jnp.bfloat16)              # (128, 896)
    b4p = _pad2(b4, 1, F_PAD).astype(jnp.float32)                     # (1, 896)

    # Constant index_map -> Pallas keeps the (small) weights resident in VMEM
    # across the whole batch grid; only activation tiles stream from HBM.
    weight_spec = lambda shape: pl.BlockSpec(shape, lambda i: (0, 0))
    x_spec = pl.BlockSpec((batch_tile, F_PAD), lambda i: (i, 0))

    recon_pad, z_pad = pl.pallas_call(
        _ae_kernel,
        out_shape=(
            jax.ShapeDtypeStruct((B_pad, F_PAD), jnp.float32),
            jax.ShapeDtypeStruct((B_pad, L_PAD), jnp.float32),
        ),
        grid_spec=pltpu.PrefetchScalarGridSpec(
            num_scalar_prefetch=0,
            grid=(n_tiles,),
            in_specs=[
                x_spec,
                weight_spec(w1p.shape), weight_spec(b1p.shape),
                weight_spec(w2p.shape), weight_spec(b2p.shape),
                weight_spec(w3p.shape), weight_spec(b3p.shape),
                weight_spec(w4p.shape), weight_spec(b4p.shape),
            ],
            out_specs=[
                pl.BlockSpec((batch_tile, F_PAD), lambda i: (i, 0)),
                pl.BlockSpec((batch_tile, L_PAD), lambda i: (i, 0)),
            ],
        ),
        compiler_params=pltpu.CompilerParams(
            dimension_semantics=("parallel",)),
    )(x_pad, w1p, b1p, w2p, b2p, w3p, b3p, w4p, b4p)

    # Slice off batch/feature/latent padding (padded sigmoid lanes are 0.5).
    x_recon = recon_pad[:B, :IN_DIM].reshape(B, 1, 28, 28)            # nn.Unflatten
    z = z_pad[:B, :latent]
    return x_recon, z


def init_params(key, latent_dim=LATENT_DIM):
    """Deterministic init mimicking nn.Linear (uniform +-1/sqrt(fan_in)).
    Weights are stored transposed: (in_features, out_features)."""
    dims = [(IN_DIM, HID_DIM), (HID_DIM, latent_dim),
            (latent_dim, HID_DIM), (HID_DIM, IN_DIM)]
    params = []
    for (fan_in, fan_out) in dims:
        key, kw, kb = jax.random.split(key, 3)
        bound = 1.0 / jnp.sqrt(fan_in)
        w = jax.random.uniform(kw, (fan_in, fan_out), jnp.float32, -bound, bound)
        b = jax.random.uniform(kb, (1, fan_out), jnp.float32, -bound, bound)
        params.append((w, b))
    return params


def reference_forward(x_nchw, params):
    """Pure-JAX (f32) reference of the PyTorch forward pass."""
    B = x_nchw.shape[0]
    x = x_nchw.reshape(B, IN_DIM)
    (w1, b1), (w2, b2), (w3, b3), (w4, b4) = params
    h1 = jnp.maximum(x @ w1 + b1, 0.0)
    z = h1 @ w2 + b2
    h2 = jnp.maximum(z @ w3 + b3, 0.0)
    recon = jax.nn.sigmoid(h2 @ w4 + b4)
    return recon.reshape(B, 1, 28, 28), z


if __name__ == "__main__":
    key = jax.random.PRNGKey(0)
    k_params, k_x, k_x2 = jax.random.split(key, 3)

    params = init_params(k_params, latent_dim=LATENT_DIM)

    # Small MNIST-like batch (batch padded internally to one 256-row tile).
    x = jax.random.uniform(k_x, (8, 1, 28, 28), jnp.float32)
    x_recon, z = autoencoder_forward(x, params)
    x_recon, z = jax.block_until_ready((x_recon, z))

    ref_recon, ref_z = reference_forward(x, params)
    assert x_recon.shape == (8, 1, 28, 28) and z.shape == (8, LATENT_DIM)
    # bf16 MXU operands vs f32 reference -> relaxed tolerance.
    assert jnp.allclose(x_recon, ref_recon, atol=2e-2, rtol=2e-2)
    assert jnp.allclose(z, ref_z, atol=2e-2, rtol=2e-2)

    # Exercise the batch-padding path + a multi-step grid (200 -> 2 tiles of 128).
    x2 = jax.random.uniform(k_x2, (200, 1, 28, 28), jnp.float32)
    r2, z2 = autoencoder_forward(x2, params, batch_tile=128)
    r2, z2 = jax.block_until_ready((r2, z2))
    rr2, rz2 = reference_forward(x2, params)
    assert r2.shape == (200, 1, 28, 28) and z2.shape == (200, LATENT_DIM)
    assert jnp.allclose(r2, rr2, atol=2e-2, rtol=2e-2)
    assert jnp.allclose(z2, rz2, atol=2e-2, rtol=2e-2)

    print("KERNEL_OK")
</pallas_src>

<mosaic_0001>
module attributes {stable_mosaic.version = 11 : i64} {
  func.func @_ae_kernel(%arg0: i32, %arg1: memref<256x896xbf16, #tpu.memory_space<vmem>>, %arg2: memref<896x128xbf16, #tpu.memory_space<vmem>>, %arg3: memref<1x128xf32, #tpu.memory_space<vmem>>, %arg4: memref<128x128xbf16, #tpu.memory_space<vmem>>, %arg5: memref<1x128xf32, #tpu.memory_space<vmem>>, %arg6: memref<128x128xbf16, #tpu.memory_space<vmem>>, %arg7: memref<1x128xf32, #tpu.memory_space<vmem>>, %arg8: memref<128x896xbf16, #tpu.memory_space<vmem>>, %arg9: memref<1x896xf32, #tpu.memory_space<vmem>>, %arg10: memref<256x896xf32, #tpu.memory_space<vmem>>, %arg11: memref<256x128xf32, #tpu.memory_space<vmem>>) attributes {dimension_semantics = [#tpu.dimension_semantics<parallel>], iteration_bounds = array<i64: 1>, scalar_prefetch = 0 : i64, scratch_operands = 0 : i64, tpu.core_type = #tpu.core_type<tc>, window_params = [{transform_indices = @transform_0, window_bounds = array<i64: 256, 896>}, {pipeline_mode = #tpu.pipeline_mode<synchronous>, transform_indices = @transform_1, window_bounds = array<i64: 896, 128>}, {pipeline_mode = #tpu.pipeline_mode<synchronous>, transform_indices = @transform_2, window_bounds = array<i64: 1, 128>}, {pipeline_mode = #tpu.pipeline_mode<synchronous>, transform_indices = @transform_3, window_bounds = array<i64: 128, 128>}, {pipeline_mode = #tpu.pipeline_mode<synchronous>, transform_indices = @transform_4, window_bounds = array<i64: 1, 128>}, {pipeline_mode = #tpu.pipeline_mode<synchronous>, transform_indices = @transform_5, window_bounds = array<i64: 128, 128>}, {pipeline_mode = #tpu.pipeline_mode<synchronous>, transform_indices = @transform_6, window_bounds = array<i64: 1, 128>}, {pipeline_mode = #tpu.pipeline_mode<synchronous>, transform_indices = @transform_7, window_bounds = array<i64: 128, 896>}, {pipeline_mode = #tpu.pipeline_mode<synchronous>, transform_indices = @transform_8, window_bounds = array<i64: 1, 896>}, {transform_indices = @transform_9, window_bounds = array<i64: 256, 896>}, {transform_indices = @transform_10, window_bounds = array<i64: 256, 128>}]} {
    %c0 = arith.constant 0 : index
    %c0_0 = arith.constant 0 : index
    %0 = vector.load %arg1[%c0, %c0_0] : memref<256x896xbf16, #tpu.memory_space<vmem>>, vector<256x896xbf16>
    %c0_1 = arith.constant 0 : index
    %c0_2 = arith.constant 0 : index
    %1 = vector.load %arg2[%c0_1, %c0_2] : memref<896x128xbf16, #tpu.memory_space<vmem>>, vector<896x128xbf16>
    %cst = arith.constant dense<0.000000e+00> : vector<256x128xf32>
    %2 = tpu.matmul %0, %1, %cst {dimension_numbers = #tpu.dot_dimension_numbers<[1], [0], [0], [1], [0, 0, 1, 1], [], []>} : vector<256x896xbf16>, vector<896x128xbf16>, vector<256x128xf32> -> vector<256x128xf32>
    %c0_3 = arith.constant 0 : index
    %c0_4 = arith.constant 0 : index
    %3 = vector.load %arg3[%c0_3, %c0_4] : memref<1x128xf32, #tpu.memory_space<vmem>>, vector<1x128xf32>
    %4 = vector.broadcast %3 : vector<1x128xf32> to vector<256x128xf32>
    %5 = arith.addf %2, %4 : vector<256x128xf32>
    %cst_5 = arith.constant 0.000000e+00 : f32
    %6 = vector.broadcast %cst_5 : f32 to vector<256x128xf32>
    %7 = arith.maximumf %5, %6 : vector<256x128xf32>
    %8 = arith.truncf %7 : vector<256x128xf32> to vector<256x128xbf16>
    %c0_6 = arith.constant 0 : index
    %c0_7 = arith.constant 0 : index
    %9 = vector.load %arg4[%c0_6, %c0_7] : memref<128x128xbf16, #tpu.memory_space<vmem>>, vector<128x128xbf16>
    %cst_8 = arith.constant dense<0.000000e+00> : vector<256x128xf32>
    %10 = tpu.matmul %8, %9, %cst_8 {dimension_numbers = #tpu.dot_dimension_numbers<[1], [0], [0], [1], [0, 0, 1, 1], [], []>} : vector<256x128xbf16>, vector<128x128xbf16>, vector<256x128xf32> -> vector<256x128xf32>
    %c0_9 = arith.constant 0 : index
    %c0_10 = arith.constant 0 : index
    %11 = vector.load %arg5[%c0_9, %c0_10] : memref<1x128xf32, #tpu.memory_space<vmem>>, vector<1x128xf32>
    %12 = vector.broadcast %11 : vector<1x128xf32> to vector<256x128xf32>
    %13 = arith.addf %10, %12 : vector<256x128xf32>
    %14 = arith.truncf %13 : vector<256x128xf32> to vector<256x128xbf16>
    %c0_11 = arith.constant 0 : index
    %c0_12 = arith.constant 0 : index
    %15 = vector.load %arg6[%c0_11, %c0_12] : memref<128x128xbf16, #tpu.memory_space<vmem>>, vector<128x128xbf16>
    %cst_13 = arith.constant dense<0.000000e+00> : vector<256x128xf32>
    %16 = tpu.matmul %14, %15, %cst_13 {dimension_numbers = #tpu.dot_dimension_numbers<[1], [0], [0], [1], [0, 0, 1, 1], [], []>} : vector<256x128xbf16>, vector<128x128xbf16>, vector<256x128xf32> -> vector<256x128xf32>
    %c0_14 = arith.constant 0 : index
    %c0_15 = arith.constant 0 : index
    %17 = vector.load %arg7[%c0_14, %c0_15] : memref<1x128xf32, #tpu.memory_space<vmem>>, vector<1x128xf32>
    %18 = vector.broadcast %17 : vector<1x128xf32> to vector<256x128xf32>
    %19 = arith.addf %16, %18 : vector<256x128xf32>
    %cst_16 = arith.constant 0.000000e+00 : f32
    %20 = vector.broadcast %cst_16 : f32 to vector<256x128xf32>
    %21 = arith.maximumf %19, %20 : vector<256x128xf32>
    %22 = arith.truncf %21 : vector<256x128xf32> to vector<256x128xbf16>
    %c0_17 = arith.constant 0 : index
    %c0_18 = arith.constant 0 : index
    %23 = vector.load %arg8[%c0_17, %c0_18] : memref<128x896xbf16, #tpu.memory_space<vmem>>, vector<128x896xbf16>
    %cst_19 = arith.constant dense<0.000000e+00> : vector<256x896xf32>
    %24 = tpu.matmul %22, %23, %cst_19 {dimension_numbers = #tpu.dot_dimension_numbers<[1], [0], [0], [1], [0, 0, 1, 1], [], []>} : vector<256x128xbf16>, vector<128x896xbf16>, vector<256x896xf32> -> vector<256x896xf32>
    %c0_20 = arith.constant 0 : index
    %c0_21 = arith.constant 0 : index
    %25 = vector.load %arg9[%c0_20, %c0_21] : memref<1x896xf32, #tpu.memory_space<vmem>>, vector<1x896xf32>
    %26 = vector.broadcast %25 : vector<1x896xf32> to vector<256x896xf32>
    %27 = arith.addf %24, %26 : vector<256x896xf32>
    %cst_22 = arith.constant 0.000000e+00 : f32
    %28 = vector.broadcast %cst_22 : f32 to vector<256x896xf32>
    %29 = arith.subf %28, %27 : vector<256x896xf32>
    %30 = math.exp %29 : vector<256x896xf32>
    %cst_23 = arith.constant 1.000000e+00 : f32
    %31 = vector.broadcast %cst_23 : f32 to vector<256x896xf32>
    %32 = arith.addf %31, %30 : vector<256x896xf32>
    %33 = tpu.reciprocal %32 {approx = true} : vector<256x896xf32> -> vector<256x896xf32>
    %c0_24 = arith.constant 0 : index
    %c0_25 = arith.constant 0 : index
    %34 = vector.load %arg10[%c0_24, %c0_25] : memref<256x896xf32, #tpu.memory_space<vmem>>, vector<256x896xf32>
    tpu.vector_store %arg10[%c0_24, %c0_25], %33 {strides = array<i32>} : memref<256x896xf32, #tpu.memory_space<vmem>>, vector<256x896xf32>,
    %c0_26 = arith.constant 0 : index
    %c0_27 = arith.constant 0 : index
    %35 = vector.load %arg11[%c0_26, %c0_27] : memref<256x128xf32, #tpu.memory_space<vmem>>, vector<256x128xf32>
    tpu.vector_store %arg11[%c0_26, %c0_27], %13 {strides = array<i32>} : memref<256x128xf32, #tpu.memory_space<vmem>>, vector<256x128xf32>,
    return
  }
  func.func @transform_0(%arg0: i32) -> (i32, i32) {
    %c0_i32 = arith.constant 0 : i32
    %c0_i32_0 = arith.constant 0 : i32
    return %arg0, %c0_i32 : i32, i32
  }
  func.func @transform_1(%arg0: i32) -> (i32, i32) {
    %c0_i32 = arith.constant 0 : i32
    %c0_i32_0 = arith.constant 0 : i32
    %c0_i32_1 = arith.constant 0 : i32
    return %c0_i32, %c0_i32_0 : i32, i32
  }
  func.func @transform_2(%arg0: i32) -> (i32, i32) {
    %c0_i32 = arith.constant 0 : i32
    %c0_i32_0 = arith.constant 0 : i32
    %c0_i32_1 = arith.constant 0 : i32
    return %c0_i32, %c0_i32_0 : i32, i32
  }
  func.func @transform_3(%arg0: i32) -> (i32, i32) {
    %c0_i32 = arith.constant 0 : i32
    %c0_i32_0 = arith.constant 0 : i32
    %c0_i32_1 = arith.constant 0 : i32
    return %c0_i32, %c0_i32_0 : i32, i32
  }
  func.func @transform_4(%arg0: i32) -> (i32, i32) {
    %c0_i32 = arith.constant 0 : i32
    %c0_i32_0 = arith.constant 0 : i32
    %c0_i32_1 = arith.constant 0 : i32
    return %c0_i32, %c0_i32_0 : i32, i32
  }
  func.func @transform_5(%arg0: i32) -> (i32, i32) {
    %c0_i32 = arith.constant 0 : i32
    %c0_i32_0 = arith.constant 0 : i32
    %c0_i32_1 = arith.constant 0 : i32
    return %c0_i32, %c0_i32_0 : i32, i32
  }
  func.func @transform_6(%arg0: i32) -> (i32, i32) {
    %c0_i32 = arith.constant 0 : i32
    %c0_i32_0 = arith.constant 0 : i32
    %c0_i32_1 = arith.constant 0 : i32
    return %c0_i32, %c0_i32_0 : i32, i32
  }
  func.func @transform_7(%arg0: i32) -> (i32, i32) {
    %c0_i32 = arith.constant 0 : i32
    %c0_i32_0 = arith.constant 0 : i32
    %c0_i32_1 = arith.constant 0 : i32
    return %c0_i32, %c0_i32_0 : i32, i32
  }
  func.func @transform_8(%arg0: i32) -> (i32, i32) {
    %c0_i32 = arith.constant 0 : i32
    %c0_i32_0 = arith.constant 0 : i32
    %c0_i32_1 = arith.constant 0 : i32
    return %c0_i32, %c0_i32_0 : i32, i32
  }
  func.func @transform_9(%arg0: i32) -> (i32, i32) {
    %c0_i32 = arith.constant 0 : i32
    %c0_i32_0 = arith.constant 0 : i32
    return %arg0, %c0_i32 : i32, i32
  }
  func.func @transform_10(%arg0: i32) -> (i32, i32) {
    %c0_i32 = arith.constant 0 : i32
    %c0_i32_0 = arith.constant 0 : i32
    return %arg0, %c0_i32 : i32, i32
  }
}

</mosaic_0001>

<bundles_post_ra>
// kernel: tpu_custom_call.1
= control target key start
LH: loop header
LB: loop body
LE: loop exit
PB: predicated region body
PF: predicated region fallthrough
CT: control target
= control target key end

     0   :  { %16 = vsyncpa [#allocation3], 0  ;;  %s8304_s0 = inlined_call_operand.hbm [shape: bf16[256,896], index: 0, kind: input, shape index: {}]   ;;  %s8305_s1 = inlined_call_operand.hbm [shape: bf16[896,128], index: 1, kind: input, shape index: {}]   ;;  %s8306_s2 = inlined_call_operand.vmem [shape: f32[1,128], index: 2, kind: input, shape index: {}]   ;;  %s8307_s3 = inlined_call_operand.hbm [shape: bf16[128,128], index: 3, kind: input, shape index: {}]   ;;  %s8308_s4 = inlined_call_operand.vmem [shape: f32[1,128], index: 4, kind: input, shape index: {}]   ;;  %s8309_s5 = inlined_call_operand.hbm [shape: bf16[128,128], index: 5, kind: input, shape index: {}]   ;;  %s8310_s6 = inlined_call_operand.vmem [shape: f32[1,128], index: 6, kind: input, shape index: {}]   ;;  %s8311_s7 = inlined_call_operand.hbm [shape: bf16[128,896], index: 7, kind: input, shape index: {}]   ;;  %s8312_s8 = inlined_call_operand.vmem [shape: f32[1,896], index: 8, kind: input, shape index: {}]   ;;  %s8313_s9 = inlined_call_operand.hbm [shape: f32[256,896], index: 9, kind: output, shape index: {0}]   ;;  %s8314_s10 = inlined_call_operand.hbm [shape: f32[256,128], index: 10, kind: output, shape index: {1}]  }
   0x1   :  { %17 = vsyncpa [#allocation6], 0 }
   0x2   :  { %18 = vsyncpa [#allocation9], 0 }
   0x3   :  { %19 = vsyncpa [#allocation4], 0 }
   0x4   :  { %20 = vsyncpa [#allocation13], 0  ;;  %s7266_s13 = smov [#allocation5]  }
   0x5   :  { %s38_s14 = sshll.u32 %s7266_s13, 4  ;;  %s39_s14 = int_to_ptr.vmem [resolvable:$true] %s38_s14 }
   0x6   :  { %s7124_s15 = scalar_lea.vmem %s39_s14, 7168  ;;  %p7129_p1 = scmp.lt.s32.totalorder %s39_s14, %s39_s14 }
   0x7   :  { %p7125_p0 = scmp.ne.s32.totalorder %s39_s14, %s7124_s15  ;;  %p7130_p2 = scmp.lt.s32.totalorder %s7124_s15, %s7124_s15 }
   0x9   :  { %p7131_p3 = por %p7130_p2, %p7129_p1 }
   0xb   :  { %p7132_p4 = pnand %p7131_p3, %p7125_p0 }
   0xd   :  { %7135 = shalt.err (!%p7132_p4)
}
   0xe   :  { %s7267_s16 = smov 64   ;;  %s7268_s17 = smov 4  }
   0xf   :  { %44 = dma.hbm_to_vmem [thread:$0]  %s8305_s1, 7168, %s39_s14, [#allocation6], %s7267_s16, %s7267_s16, %s7268_s17  }
  0x10   :  { %s7269_s20 = smov [#allocation8]   ;;  %s7270_s22 = smov [#allocation2]  }
  0x11   :  { %s66_s21 = sshll.u32 %s7269_s20, 4  ;;  %s26_s23 = sshll.u32 %s7270_s22, 4  ;;  %s67_s21 = int_to_ptr.vmem [resolvable:$true] %s66_s21  ;;  %s27_s23 = int_to_ptr.vmem [resolvable:$true] %s26_s23 }
  0x12   :  { %s7144_s24 = scalar_lea.vmem %s67_s21, 1024  ;;  %p7149_p6 = scmp.lt.s32.totalorder %s67_s21, %s67_s21 }
  0x13   :  { %p7145_p5 = scmp.ne.s32.totalorder %s67_s21, %s7144_s24  ;;  %p7150_p7 = scmp.lt.s32.totalorder %s7144_s24, %s7144_s24 }
  0x15   :  { %p7151_p8 = por %p7150_p7, %p7149_p6 }
  0x17   :  { %p7152_p9 = pnand %p7151_p8, %p7145_p5 }
  0x19   :  { %7155 = shalt.err (!%p7152_p9)
}
  0x1a   :  { %72 = dma.hbm_to_vmem [thread:$0]  %s8309_s5, 1024, %s67_s21, [#allocation9], %s7267_s16, %s7267_s16, %s7268_s17  }
  0x1b   :  { %s7164_s1 = scalar_lea.vmem %s27_s23, 14336  ;;  %p7169_p11 = scmp.lt.s32.totalorder %s27_s23, %s27_s23 }
  0x1c   :  { %p7165_p10 = scmp.ne.s32.totalorder %s27_s23, %s7164_s1  ;;  %p7170_p12 = scmp.lt.s32.totalorder %s7164_s1, %s7164_s1 }
  0x1e   :  { %p7171_p13 = por %p7170_p12, %p7169_p11 }
  0x20   :  { %p7172_p0 = pnand %p7171_p13, %p7165_p10 }
  0x22   :  { %7175 = shalt.err (!%p7172_p0)
}
  0x23   :  { %s7271_s27 = smov 448   ;;  %s7272_s28 = smov 28  }
  0x24   :  { %32 = dma.hbm_to_vmem [thread:$0]  %s8304_s0, 14336, %s27_s23, [#allocation3], %s7271_s27, %s7271_s27, %s7272_s28  }
  0x25   :  { %s7273_s11 = smov [#allocation7]   ;;  %s7274_s13 = smov [#allocation10]  }
  0x26   :  { %s52_s12 = sshll.u32 %s7273_s11, 4  ;;  %s80_s14 = sshll.u32 %s7274_s13, 4  ;;  %s53_s12 = int_to_ptr.vmem [resolvable:$true] %s52_s12  ;;  %s81_s14 = int_to_ptr.vmem [resolvable:$true] %s80_s14 }
  0x27   :  { %s7184_s5 = scalar_lea.vmem %s53_s12, 1024  ;;  %p7189_p2 = scmp.lt.s32.totalorder %s53_s12, %s53_s12 }
  0x28   :  { %p7185_p1 = scmp.ne.s32.totalorder %s53_s12, %s7184_s5  ;;  %p7190_p3 = scmp.lt.s32.totalorder %s7184_s5, %s7184_s5 }
  0x2a   :  { %p7191_p4 = por %p7190_p3, %p7189_p2 }
  0x2c   :  { %p7192_p5 = pnand %p7191_p4, %p7185_p1 }
  0x2e   :  { %7195 = shalt.err (!%p7192_p5)
}
  0x2f   :  { %58 = dma.hbm_to_vmem [thread:$0]  %s8307_s3, 1024, %s53_s12, [#allocation6], %s7267_s16, %s7267_s16, %s7268_s17  }
  0x30   :  { %s7204_s0 = scalar_lea.vmem %s81_s14, 7168  ;;  %p7209_p7 = scmp.lt.s32.totalorder %s81_s14, %s81_s14 }
  0x31   :  { %p7205_p6 = scmp.ne.s32.totalorder %s81_s14, %s7204_s0  ;;  %p7210_p8 = scmp.lt.s32.totalorder %s7204_s0, %s7204_s0 }
  0x33   :  { %p7211_p9 = por %p7210_p8, %p7209_p7 }
  0x35   :  { %p7212_p10 = pnand %p7211_p9, %p7205_p6 }
  0x37   :  { %7215 = shalt.err (!%p7212_p10)
}
  0x38   :  { %86 = dma.hbm_to_vmem [thread:$0]  %s8311_s7, 7168, %s81_s14, [#allocation9], %s7271_s27, %s7271_s27, %s7272_s28  }
  0x39   :  { %7256 = dma.done.wait [#allocation3], 14336  }
  0x3a   :  { %7257 = vsyncadd [#allocation3], 4294952960 }
  0x3b   :  { %7258 = dma.done.wait [#allocation6], 8192  }
  0x3c   :  { %7259 = vsyncadd [#allocation6], 4294959104 }
  0x3d   :  { %7260 = dma.done.wait [#allocation9], 8192  }
  0x3e   :  { %7261 = vsyncadd [#allocation9], 4294959104  ;;  %v5907_v0 = vld [vmem:[#allocation5 + $0x78] sm:$0xff]   ;;  %v5911_v4 = vld [vmem:[#allocation5 + $0x70] sm:$0xff]  }
  0x3f   :  { %v5908_v1 = vld [vmem:[#allocation5 + $0x38] sm:$0xff]   ;;  %5267 = vmatprep.subr.bf16.mxu0 %v5907_v0  ;;  %v5912_v5 = vld [vmem:[#allocation5 + $0x30] sm:$0xff]   ;;  %v5915_v8 = vld [vmem:[#allocation5 + $0x68] sm:$0xff]  }
  0x40   :  { %v5909_v2 = vld [vmem:[#allocation5 + $0xf8] sm:$0xff]   ;;  %5268 = vmatpush3.bf16.msra.mxu0 %v5908_v1  ;;  %v5913_v6 = vld [vmem:[#allocation5 + $0xf0] sm:$0xff]   ;;  %v5916_v9 = vld [vmem:[#allocation5 + $0x28] sm:$0xff]  }
  0x41   :  { %v5910_v3 = vld [vmem:[#allocation5 + $0xb8] sm:$0xff]   ;;  %5379 = vmatprep.subr.bf16.mxu1 %v5909_v2  ;;  %5269 = vmatprep.subr.bf16.mxu0 %v5911_v4  ;;  %v5914_v7 = vld [vmem:[#allocation5 + $0xb0] sm:$0xff]   ;;  %v5917_v10 = vld [vmem:[#allocation5 + $0xe8] sm:$0xff]  }
  0x42   :  { %5380 = vmatpush3.bf16.msra.mxu1 %v5910_v3  ;;  %v5918_v11 = vld [vmem:[#allocation5 + $0xa8] sm:$0xff]   ;;  %v5919_v12 = vld [vmem:[#allocation5 + $0x60] sm:$0xff]   ;;  %v5923_v16 = vld [vmem:[#allocation5 + $0x58] sm:$0xff]  }
  0x43   :  { %5381 = vmatprep.subr.bf16.mxu1 %v5913_v6  ;;  %v5920_v13 = vld [vmem:[#allocation5 + $0x20] sm:$0xff]   ;;  %v5924_v17 = vld [vmem:[#allocation5 + $0x18] sm:$0xff]   ;;  %v5927_v20 = vld [vmem:[#allocation5 + $0x50] sm:$0xff]  }
  0x44   :  { %5270 = vmatpush3.bf16.msra.mxu0 %v5912_v5  ;;  %v5921_v14 = vld [vmem:[#allocation5 + $0xe0] sm:$0xff]   ;;  %v5925_v18 = vld [vmem:[#allocation5 + $0xd8] sm:$0xff]   ;;  %v5928_v21 = vld [vmem:[#allocation5 + $0x10] sm:$0xff]  }
  0x45   :  { %5271 = vmatprep.subr.bf16.mxu0 %v5915_v8  ;;  %v5922_v15 = vld [vmem:[#allocation5 + $0xa0] sm:$0xff]   ;;  %v5926_v19 = vld [vmem:[#allocation5 + $0x98] sm:$0xff]   ;;  %v5929_v22 = vld [vmem:[#allocation5 + $0xd0] sm:$0xff]  }
  0x46   :  { %5382 = vmatpush3.bf16.msra.mxu1 %v5914_v7  ;;  %v5930_v23 = vld [vmem:[#allocation5 + $0x90] sm:$0xff]   ;;  %v5931_v24 = vld [vmem:[#allocation5 + $0x48] sm:$0xff]   ;;  %v5935_v28 = vld [vmem:[#allocation5 + $0x40] sm:$0xff]  }
  0x47   :  { %5383 = vmatprep.subr.bf16.mxu1 %v5917_v10  ;;  %v5932_v25 = vld [vmem:[#allocation5 + $0x8] sm:$0xff]   ;;  %v5936_v29 = vld [vmem:[#allocation5] sm:$0xff]   ;;  %v5942_v34 = vld [vmem:[#allocation5 + $0x178] sm:$0xff]  }
  0x48   :  { %5272 = vmatpush3.bf16.msra.mxu0 %v5916_v9  ;;  %v5933_v26 = vld [vmem:[#allocation5 + $0xc8] sm:$0xff]   ;;  %v5937_v30 = vld [vmem:[#allocation5 + $0xc0] sm:$0xff]   ;;  %v5946_v37 = vld [vmem:[#allocation5 + $0x138] sm:$0xff]  }
  0x49   :  { %5273 = vmatprep.subr.bf16.mxu0 %v5919_v12  ;;  %v5934_v27 = vld [vmem:[#allocation5 + $0x88] sm:$0xff]   ;;  %v5938_v31 = vld [vmem:[#allocation2] ss:$28 sps:$4 sm:$0xff]   ;;  %v5949_v40 = vld [vmem:[#allocation2 + $0x38] ss:$28 sps:$4 sm:$0xff]  }
  0x4a   :  { %5384 = vmatpush3.bf16.msra.mxu1 %v5918_v11  ;;  %v5940_v32 = vld [vmem:[#allocation2 + $0x4] ss:$28 sps:$4 sm:$0xff]   ;;  %v5945_v36 = vld [vmem:[#allocation2 + $0xc] ss:$28 sps:$4 sm:$0xff]   ;;  %v5947_v38 = vld [vmem:[#allocation2 + $0x3c] ss:$28 sps:$4 sm:$0xff]  }
  0x4b   :  { %5385 = vmatprep.subr.bf16.mxu1 %v5921_v14  ;;  %v5941_v33 = vld [vmem:[#allocation5 + $0x80] sm:$0xff]   ;;  %1296 = vmatprep.mubr.bf16.mxu0 %v5940_v32  ;;  %v5953_v41 = vld [vmem:[#allocation5 + $0x1b8] sm:$0xff]   ;;  %v5954_v43 = vld [vmem:[#allocation2 + $0x74] ss:$28 sps:$4 sm:$0xff]  }
  0x4c   :  { %5274 = vmatpush3.bf16.msra.mxu0 %v5920_v13  ;;  %v5943_v35 = vld [vmem:[#allocation2 + $0x8] ss:$28 sps:$4 sm:$0xff]   ;;  %1457 = vmatprep.mubr.bf16.mxu1 %v5945_v36  ;;  %v5952_v42 = vld [vmem:[#allocation2 + $0x40] ss:$28 sps:$4 sm:$0xff]   ;;  %v5957_v44 = vld [vmem:[#allocation5 + $0x170] sm:$0xff]  }
  0x4d   :  { %5275 = vmatprep.subr.bf16.mxu0 %v5923_v16  ;;  %v5950_v39 = vld [vmem:[#allocation2 + $0x44] ss:$28 sps:$4 sm:$0xff]   ;;  %v5958_v45 = vld [vmem:[#allocation2 + $0x7c] ss:$28 sps:$4 sm:$0xff]   ;;  %v5960_v46 = vld [vmem:[#allocation5 + $0x130] sm:$0xff]  }
  0x4e   :  { %5386 = vmatpush3.bf16.msra.mxu1 %v5922_v15  ;;  %v5956_v47 = vld [vmem:[#allocation2 + $0x70] ss:$28 sps:$4 sm:$0xff]   ;;  %v5961_v50 = vld [vmem:[#allocation2 + $0x78] ss:$28 sps:$4 sm:$0xff]   ;;  %v5964_v54 = vld [vmem:[#allocation2 + $0xa8] ss:$28 sps:$4 sm:$0xff]  }
  0x4f   :  { %5387 = vmatprep.subr.bf16.mxu1 %v5925_v18  ;;  %v5962_v48 = vld [vmem:[#allocation2 + $0xac] ss:$28 sps:$4 sm:$0xff]   ;;  %v5968_v49 = vld [vmem:[#allocation5 + $0x1b0] sm:$0xff]   ;;  %v5969_v55 = vld [vmem:[#allocation2 + $0xe4] ss:$28 sps:$4 sm:$0xff]  }
  0x50   :  { %5276 = vmatpush3.bf16.msra.mxu0 %v5924_v17  ;;  %v5972_v51 = vld [vmem:[#allocation5 + $0x168] sm:$0xff]   ;;  %v5965_v52 = vld [vmem:[#allocation2 + $0xb4] ss:$28 sps:$4 sm:$0xff]   ;;  %v5987_v59 = vld [vmem:[#allocation5 + $0x160] sm:$0xff]  }
  0x51   :  { %5277 = vmatprep.subr.bf16.mxu0 %v5927_v20  ;;  %v5975_v53 = vld [vmem:[#allocation5 + $0x128] sm:$0xff]   ;;  %v5990_v60 = vld [vmem:[#allocation5 + $0x120] sm:$0xff]   ;;  %v5977_v62 = vld [vmem:[#allocation2 + $0x11c] ss:$28 sps:$4 sm:$0xff]  }
  0x52   :  { %5388 = vmatpush3.bf16.msra.mxu1 %v5926_v19  ;;  %v5983_v56 = vld [vmem:[#allocation5 + $0x1a8] sm:$0xff]   ;;  %v5971_v61 = vld [vmem:[#allocation2 + $0xe0] ss:$28 sps:$4 sm:$0xff]   ;;  %v5979_v4 = vld [vmem:[#allocation2 + $0x118] ss:$28 sps:$4 sm:$0xff]  }
  0x53   :  { %5389 = vmatprep.subr.bf16.mxu1 %v5929_v22  ;;  %v5967_v57 = vld [vmem:[#allocation2 + $0xb0] ss:$28 sps:$4 sm:$0xff]   ;;  %v5998_v63 = vld [vmem:[#allocation5 + $0x1a0] sm:$0xff]   ;;  %v6002_v2 = vld [vmem:[#allocation5 + $0x158] sm:$0xff]  }
  0x54   :  { %5278 = vmatpush3.bf16.msra.mxu0 %v5928_v21  ;;  %v5973_v58 = vld [vmem:[#allocation2 + $0xec] ss:$28 sps:$4 sm:$0xff]   ;;  %v5980_v1 = vld [vmem:[#allocation2 + $0x124] ss:$28 sps:$4 sm:$0xff]   ;;  %v6005_v3 = vld [vmem:[#allocation5 + $0x118] sm:$0xff]  }
  0x55   :  { %5279 = vmatprep.subr.bf16.mxu0 %v5931_v24  ;;  %v5976_v0 = vld [vmem:[#allocation2 + $0xe8] ss:$28 sps:$4 sm:$0xff]   ;;  %v5984_v5 = vld [vmem:[#allocation2 + $0x154] ss:$28 sps:$4 sm:$0xff]   ;;  %v6013_v6 = vld [vmem:[#allocation5 + $0x198] sm:$0xff]  }
  0x56   :  { %5390 = vmatpush3.bf16.msra.mxu1 %v5930_v23  ;;  %v5982_v7 = vld [vmem:[#allocation2 + $0x120] ss:$28 sps:$4 sm:$0xff]   ;;  %v6017_v9 = vld [vmem:[#allocation5 + $0x150] sm:$0xff]   ;;  %v5992_v12 = vld [vmem:[#allocation2 + $0x18c] ss:$28 sps:$4 sm:$0xff]  }
  0x57   :  { %5391 = vmatprep.subr.bf16.mxu1 %v5933_v26  ;;  %v5988_v8 = vld [vmem:[#allocation2 + $0x15c] ss:$28 sps:$4 sm:$0xff]   ;;  %v6020_v10 = vld [vmem:[#allocation5 + $0x110] sm:$0xff]   ;;  %v6032_v16 = vld [vmem:[#allocation5 + $0x148] sm:$0xff]  }
  0x58   :  { %5280 = vmatpush3.bf16.msra.mxu0 %v5932_v25  ;;  %v5986_v11 = vld [vmem:[#allocation2 + $0x150] ss:$28 sps:$4 sm:$0xff]   ;;  %v5991_v14 = vld [vmem:[#allocation2 + $0x158] ss:$28 sps:$4 sm:$0xff]   ;;  %v5994_v18 = vld [vmem:[#allocation2 + $0x188] ss:$28 sps:$4 sm:$0xff]  }
  0x59   :  { %5281 = vmatprep.subr.bf16.mxu0 %v5935_v28  ;;  %v6028_v13 = vld [vmem:[#allocation5 + $0x190] sm:$0xff]   ;;  %v6035_v17 = vld [vmem:[#allocation5 + $0x108] sm:$0xff]   ;;  %v5999_v19 = vld [vmem:[#allocation2 + $0x1c4] ss:$28 sps:$4 sm:$0xff]  }
  0x5a   :  { %5392 = vmatpush3.bf16.msra.mxu1 %v5934_v27  ;;  %v5995_v15 = vld [vmem:[#allocation2 + $0x194] ss:$28 sps:$4 sm:$0xff]   ;;  %v6043_v21 = vld [vmem:[#allocation5 + $0x188] sm:$0xff]   ;;  %v6047_v23 = vld [vmem:[#allocation5 + $0x140] sm:$0xff]  }
  0x5b   :  { %5393 = vmatprep.subr.bf16.mxu1 %v5937_v30  ;;  %v5997_v20 = vld [vmem:[#allocation2 + $0x190] ss:$28 sps:$4 sm:$0xff]   ;;  %v6050_v24 = vld [vmem:[#allocation5 + $0x100] sm:$0xff]   ;;  %v6007_v26 = vld [vmem:[#allocation2 + $0x1fc] ss:$28 sps:$4 sm:$0xff]  }
  0x5c   :  { %5282 = vmatpush3.bf16.msra.mxu0 %v5936_v29  ;;  %v6003_v22 = vld [vmem:[#allocation2 + $0x1cc] ss:$28 sps:$4 sm:$0xff]   ;;  %v6001_v25 = vld [vmem:[#allocation2 + $0x1c0] ss:$28 sps:$4 sm:$0xff]   ;;  %v6009_v30 = vld [vmem:[#allocation2 + $0x1f8] ss:$28 sps:$4 sm:$0xff]  }
  0x5d   :  { %5491 = vmatprep.subr.bf16.mxu0 %v5942_v34  ;;  %v6006_v27 = vld [vmem:[#allocation2 + $0x1c8] ss:$28 sps:$4 sm:$0xff]   ;;  %v6012_v32 = vld [vmem:[#allocation2 + $0x200] ss:$28 sps:$4 sm:$0xff]   ;;  %v6016_v34 = vld [vmem:[#allocation2 + $0x230] ss:$28 sps:$4 sm:$0xff]  }
  0x5e   :  { %5394 = vmatpush3.bf16.msra.mxu1 %v5941_v33  ;;  %v6058_v28 = vld [vmem:[#allocation5 + $0x180] sm:$0xff]   ;;  %v6018_v33 = vld [vmem:[#allocation2 + $0x23c] ss:$28 sps:$4 sm:$0xff]  }
  0x5f   :  { %1297 = vmatmul.mubr.bf16.vlgmr.msra.gmra.mxu0 %v5938_v31  ;;  %5699 = vmatprep.subr.bf16.mxu1 %v5953_v41  ;;  %v6010_v29 = vld [vmem:[#allocation2 + $0x204] ss:$28 sps:$4 sm:$0xff]   ;;  %v6014_v31 = vld [vmem:[#allocation2 + $0x234] ss:$28 sps:$4 sm:$0xff]  }
  0x60   :  { %5492 = vmatpush3.bf16.msra.mxu0 %v5946_v37  ;;  %1304 = vmatprep.mubr.bf16.mxu0 %v5947_v38  ;;  %v6021_v36 = vld [vmem:[#allocation2 + $0x238] ss:$28 sps:$4 sm:$0xff]   ;;  %v6024_v38 = vld [vmem:[#allocation2 + $0x268] ss:$28 sps:$4 sm:$0xff]  }
  0x61   :  { %1458 = vmatmul.mubr.bf16.vlgmr.msra.gmra.mxu1 %v5943_v35  ;;  %5493 = vmatprep.subr.bf16.mxu0 %v5957_v44  ;;  %v6022_v35 = vld [vmem:[#allocation2 + $0x26c] ss:$28 sps:$4 sm:$0xff]   ;;  %v6025_v37 = vld [vmem:[#allocation2 + $0x274] ss:$28 sps:$4 sm:$0xff]  }
  0x62   :  { %1465 = vmatprep.mubr.bf16.mxu1 %v5950_v39  ;;  %5700 = vmatpush3.bf16.msra.mxu1 %v5953_v41  ;;  %v6029_v39 = vld [vmem:[#allocation2 + $0x2a4] ss:$28 sps:$4 sm:$0xff]   ;;  %v6033_v41 = vld [vmem:[#allocation2 + $0x2ac] ss:$28 sps:$4 sm:$0xff]  }
  0x63   :  { %5701 = vmatprep.subr.bf16.mxu1 %v5968_v49  ;;  %v6036_v44 = vld [vmem:[#allocation2 + $0x2a8] ss:$28 sps:$4 sm:$0xff]  }
  0x64   :  { %5494 = vmatpush3.bf16.msra.mxu0 %v5960_v46  ;;  %v6039_v46 = vld [vmem:[#allocation2 + $0x2d8] ss:$28 sps:$4 sm:$0xff]  }
  0x65   :  { %5495 = vmatprep.subr.bf16.mxu0 %v5972_v51  ;;  %v6052_v51 = vld [vmem:[#allocation2 + $0x34c] ss:$28 sps:$4 sm:$0xff]  }
  0x66   :  { %5702 = vmatpush3.bf16.msra.mxu1 %v5968_v49  ;;  %v6048_v49 = vld [vmem:[#allocation2 + $0x31c] ss:$28 sps:$4 sm:$0xff]  }
  0x67   :  { %1305 = vmatmul.mubr.bf16.gmra.mxu0 %v5949_v40  ;;  %5703 = vmatprep.subr.bf16.mxu1 %v5983_v56  ;;  %v6027_v40 = vld [vmem:[#allocation2 + $0x270] ss:$28 sps:$4 sm:$0xff]  }
  0x68   :  { %1312 = vmatprep.mubr.bf16.mxu0 %v5954_v43  ;;  %5496 = vmatpush3.bf16.msra.mxu0 %v5975_v53  ;;  %v6037_v43 = vld [vmem:[#allocation2 + $0x2dc] ss:$28 sps:$4 sm:$0xff]   ;;  %v6055_v53 = vld [vmem:[#allocation2 + $0x354] ss:$28 sps:$4 sm:$0xff]  }
  0x69   :  { %1466 = vmatmul.mubr.bf16.gmra.mxu1 %v5952_v42  ;;  %5497 = vmatprep.subr.bf16.mxu0 %v5987_v59  ;;  %v6031_v42 = vld [vmem:[#allocation2 + $0x2a0] ss:$28 sps:$4 sm:$0xff]   ;;  %v6064_v59 = vld [vmem:[#allocation2 + $0x4c] ss:$28 sps:$4 sm:$0xff]  }
  0x6a   :  { %1473 = vmatprep.mubr.bf16.mxu1 %v5958_v45  ;;  %5704 = vmatpush3.bf16.msra.mxu1 %v5983_v56  ;;  %v6040_v45 = vld [vmem:[#allocation2 + $0x2e4] ss:$28 sps:$4 sm:$0xff]   ;;  %v6057_v56 = vld [vmem:[#allocation2 + $0x350] ss:$28 sps:$4 sm:$0xff]  }
  0x6b   :  { %5705 = vmatprep.subr.bf16.mxu1 %v5998_v63 }
  0x6c   :  { %5498 = vmatpush3.bf16.msra.mxu0 %v5990_v60  ;;  %v6063_v60 = vld [vmem:[#allocation2 + $0x50] ss:$28 sps:$4 sm:$0xff]  }
  0x6d   :  { %5499 = vmatprep.subr.bf16.mxu0 %v6002_v2  ;;  %v6069_v2 = vld [vmem:[#allocation2 + $0x80] ss:$28 sps:$4 sm:$0xff]  }
  0x6e   :  { %5706 = vmatpush3.bf16.msra.mxu1 %v5998_v63  ;;  %v6067_v63 = vld [vmem:[#allocation2 + $0x84] ss:$28 sps:$4 sm:$0xff]  }
  0x6f   :  { %1313 = vmatmul.mubr.bf16.gmra.mxu0 %v5956_v47  ;;  %5707 = vmatprep.subr.bf16.mxu1 %v6013_v6  ;;  %v6044_v47 = vld [vmem:[#allocation2 + $0x314] ss:$28 sps:$4 sm:$0xff]  }
  0x70   :  { %1320 = vmatprep.mubr.bf16.mxu0 %v5962_v48  ;;  %5500 = vmatpush3.bf16.msra.mxu0 %v6005_v3  ;;  %v6042_v48 = vld [vmem:[#allocation2 + $0x2e0] ss:$28 sps:$4 sm:$0xff]  }
  0x71   :  { %1474 = vmatmul.mubr.bf16.gmra.mxu1 %v5961_v50  ;;  %5501 = vmatprep.subr.bf16.mxu0 %v6017_v9  ;;  %v6046_v50 = vld [vmem:[#allocation2 + $0x310] ss:$28 sps:$4 sm:$0xff]   ;;  %v6072_v3 = vld [vmem:[#allocation2 + $0xbc] ss:$28 sps:$4 sm:$0xff]  }
  0x72   :  { %1481 = vmatprep.mubr.bf16.mxu1 %v5965_v52  ;;  %5708 = vmatpush3.bf16.msra.mxu1 %v6013_v6  ;;  %v6051_v52 = vld [vmem:[#allocation2 + $0x318] ss:$28 sps:$4 sm:$0xff]  }
  0x73   :  { %5709 = vmatprep.subr.bf16.mxu1 %v6028_v13  ;;  %v6074_v6 = vld [vmem:[#allocation2 + $0xb8] ss:$28 sps:$4 sm:$0xff]  }
  0x74   :  { %5502 = vmatpush3.bf16.msra.mxu0 %v6020_v10  ;;  %v6094_v9 = vld [vmem:[#allocation2 + $0x1d8] ss:$28 sps:$4 sm:$0xff]   ;;  %v6077_v10 = vld [vmem:[#allocation2 + $0xf0] ss:$28 sps:$4 sm:$0xff]  }
  0x75   :  { %5503 = vmatprep.subr.bf16.mxu0 %v6032_v16  ;;  %v6124_v16 = vld [vmem:[#allocation7 + $0x30] sm:$0xff]  }
  0x76   :  { %5710 = vmatpush3.bf16.msra.mxu1 %v6028_v13  ;;  %v6095_v13 = vld [vmem:[#allocation2 + $0x210] ss:$28 sps:$4 sm:$0xff]  }
  0x77   :  { %1321 = vmatmul.mubr.bf16.gmra.mxu0 %v5964_v54  ;;  %5711 = vmatprep.subr.bf16.mxu1 %v6043_v21  ;;  %v6054_v54 = vld [vmem:[#allocation2 + $0x348] ss:$28 sps:$4 sm:$0xff]  }
  0x78   :  { %1328 = vmatprep.mubr.bf16.mxu0 %v5969_v55  ;;  %5504 = vmatpush3.bf16.msra.mxu0 %v6035_v17  ;;  %v6061_v55 = vld [vmem:[#allocation2 + $0x14] ss:$28 sps:$4 sm:$0xff]   ;;  %v6083_v17 = vld [vmem:[#allocation2 + $0x164] ss:$28 sps:$4 sm:$0xff]  }
  0x79   :  { %1482 = vmatmul.mubr.bf16.gmra.mxu1 %v5967_v57  ;;  %5505 = vmatprep.subr.bf16.mxu0 %v6047_v23  ;;  %v6062_v57 = vld [vmem:[#allocation2 + $0x18] ss:$28 sps:$4 sm:$0xff]   ;;  %v6111_v23 = vld [vmem:[#allocation2 + $0x2f0] ss:$28 sps:$4 sm:$0xff]  }
  0x7a   :  { %1489 = vmatprep.mubr.bf16.mxu1 %v5973_v58  ;;  %5712 = vmatpush3.bf16.msra.mxu1 %v6043_v21  ;;  %v6059_v58 = vld [vmem:[#allocation2 + $0x10] ss:$28 sps:$4 sm:$0xff]  }
  0x7b   :  { %5713 = vmatprep.subr.bf16.mxu1 %v6058_v28  ;;  %v6125_v21 = vld [vmem:[#allocation7 + $0x28] sm:$0xff]  }
  0x7c   :  { %5506 = vmatpush3.bf16.msra.mxu0 %v6050_v24  ;;  %v6118_v24 = vld [vmem:[#allocation2 + $0x328] ss:$28 sps:$4 sm:$0xff]  }
  0x7e   :  { %5714 = vmatpush3.bf16.msra.mxu1 %v6058_v28  ;;  %v6119_v28 = vld [vmem:[#allocation2 + $0x360] ss:$28 sps:$4 sm:$0xff]  }
  0x7f   :  { %1329 = vmatmul.mubr.bf16.gmra.mxu0 %v5971_v61  ;;  %v6070_v61 = vld [vmem:[#allocation2 + $0x88] ss:$28 sps:$4 sm:$0xff]  }
  0x80   :  { %1336 = vmatprep.mubr.bf16.mxu0 %v5977_v62  ;;  %v6066_v62 = vld [vmem:[#allocation2 + $0x48] ss:$28 sps:$4 sm:$0xff]  }
  0x81   :  { %1490 = vmatmul.mubr.bf16.gmra.mxu1 %v5976_v0  ;;  %v6071_v0 = vld [vmem:[#allocation2 + $0xc0] ss:$28 sps:$4 sm:$0xff]  }
  0x82   :  { %1497 = vmatprep.mubr.bf16.mxu1 %v5980_v1  ;;  %v6078_v1 = vld [vmem:[#allocation2 + $0xf8] ss:$28 sps:$4 sm:$0xff]  }
  0x87   :  { %1337 = vmatmul.mubr.bf16.gmra.mxu0 %v5979_v4  ;;  %v6079_v4 = vld [vmem:[#allocation2 + $0x130] ss:$28 sps:$4 sm:$0xff]  }
  0x88   :  { %1344 = vmatprep.mubr.bf16.mxu0 %v5984_v5  ;;  %v6086_v5 = vld [vmem:[#allocation2 + $0x168] ss:$28 sps:$4 sm:$0xff]  }
  0x89   :  { %1498 = vmatmul.mubr.bf16.gmra.mxu1 %v5982_v7  ;;  %v6075_v7 = vld [vmem:[#allocation2 + $0xf4] ss:$28 sps:$4 sm:$0xff]  }
  0x8a   :  { %1505 = vmatprep.mubr.bf16.mxu1 %v5988_v8  ;;  %v6087_v8 = vld [vmem:[#allocation2 + $0x1a0] ss:$28 sps:$4 sm:$0xff]  }
  0x8f   :  { %1345 = vmatmul.mubr.bf16.gmra.mxu0 %v5986_v11  ;;  %v6123_v11 = vld [vmem:[#allocation7 + $0x38] sm:$0xff]  }
  0x90   :  { %1352 = vmatprep.mubr.bf16.mxu0 %v5992_v12  ;;  %v6080_v12 = vld [vmem:[#allocation2 + $0x12c] ss:$28 sps:$4 sm:$0xff]   ;;  %5747 = vmatprep.subr.bf16.mxu1 %v6123_v11 }
  0x91   :  { %1506 = vmatmul.mubr.bf16.gmra.mxu1 %v5991_v14  ;;  %v6102_v14 = vld [vmem:[#allocation2 + $0x248] ss:$28 sps:$4 sm:$0xff]  }
  0x92   :  { %1513 = vmatprep.mubr.bf16.mxu1 %v5995_v15  ;;  %v6082_v15 = vld [vmem:[#allocation2 + $0x128] ss:$28 sps:$4 sm:$0xff]  }
  0x97   :  { %1353 = vmatmul.mubr.bf16.gmra.mxu0 %v5994_v18  ;;  %v6103_v18 = vld [vmem:[#allocation2 + $0x280] ss:$28 sps:$4 sm:$0xff]  }
  0x98   :  { %1360 = vmatprep.mubr.bf16.mxu0 %v5999_v19  ;;  %v6110_v19 = vld [vmem:[#allocation2 + $0x2b8] ss:$28 sps:$4 sm:$0xff]  }
  0x99   :  { %1514 = vmatmul.mubr.bf16.gmra.mxu1 %v5997_v20  ;;  %v6085_v20 = vld [vmem:[#allocation2 + $0x160] ss:$28 sps:$4 sm:$0xff]  }
  0x9a   :  { %1521 = vmatprep.mubr.bf16.mxu1 %v6003_v22  ;;  %v6088_v22 = vld [vmem:[#allocation2 + $0x19c] ss:$28 sps:$4 sm:$0xff]  }
  0x9f   :  { %1361 = vmatmul.mubr.bf16.gmra.mxu0 %v6001_v25  ;;  %v6090_v25 = vld [vmem:[#allocation2 + $0x198] ss:$28 sps:$4 sm:$0xff]  }
  0xa0   :  { %1368 = vmatprep.mubr.bf16.mxu0 %v6007_v26  ;;  %v6126_v26 = vld [vmem:[#allocation7 + $0x20] sm:$0xff]  }
  0xa1   :  { %1522 = vmatmul.mubr.bf16.gmra.mxu1 %v6006_v27  ;;  %v6091_v27 = vld [vmem:[#allocation2 + $0x1d4] ss:$28 sps:$4 sm:$0xff]  }
  0xa2   :  { %1529 = vmatprep.mubr.bf16.mxu1 %v6010_v29  ;;  %v6093_v29 = vld [vmem:[#allocation2 + $0x1d0] ss:$28 sps:$4 sm:$0xff]  }
  0xa7   :  { %1369 = vmatmul.mubr.bf16.gmra.mxu0 %v6009_v30  ;;  %v6127_v30 = vld [vmem:[#allocation7 + $0x18] sm:$0xff]  }
  0xa8   :  { %1376 = vmatprep.mubr.bf16.mxu0 %v6014_v31  ;;  %v6096_v31 = vld [vmem:[#allocation2 + $0x20c] ss:$28 sps:$4 sm:$0xff]  }
  0xa9   :  { %1530 = vmatmul.mubr.bf16.gmra.mxu1 %v6012_v32 }
  0xaa   :  { %1537 = vmatprep.mubr.bf16.mxu1 %v6018_v33  ;;  %v7364_v33 = vld [vmem:[%s8306_s2] ss:$0 sm:$0xff] }
  0xaf   :  { %1377 = vmatmul.mubr.bf16.gmra.mxu0 %v6016_v34 }
  0xb0   :  { %1384 = vmatprep.mubr.bf16.mxu0 %v6022_v35 }
  0xb1   :  { %1538 = vmatmul.mubr.bf16.gmra.mxu1 %v6021_v36 }
  0xb2   :  { %1545 = vmatprep.mubr.bf16.mxu1 %v6025_v37 }
  0xb7   :  { %1385 = vmatmul.mubr.bf16.gmra.mxu0 %v6024_v38  ;;  %v6098_v38 = vld [vmem:[#allocation2 + $0x208] ss:$28 sps:$4 sm:$0xff]  }
  0xb8   :  { %1392 = vmatprep.mubr.bf16.mxu0 %v6029_v39  ;;  %v6128_v39 = vld [vmem:[#allocation7 + $0x10] sm:$0xff]  }
  0xb9   :  { %1546 = vmatmul.mubr.bf16.gmra.mxu1 %v6027_v40 }
  0xba   :  { %1553 = vmatprep.mubr.bf16.mxu1 %v6033_v41 }
  0xbf   :  { %1393 = vmatmul.mubr.bf16.gmra.mxu0 %v6031_v42  ;;  %v6099_v42 = vld [vmem:[#allocation2 + $0x244] ss:$28 sps:$4 sm:$0xff]  }
  0xc0   :  { %1400 = vmatprep.mubr.bf16.mxu0 %v6037_v43 }
  0xc1   :  { %1554 = vmatmul.mubr.bf16.gmra.mxu1 %v6036_v44 }
  0xc2   :  { %1561 = vmatprep.mubr.bf16.mxu1 %v6040_v45 }
  0xc7   :  { %1401 = vmatmul.mubr.bf16.gmra.mxu0 %v6039_v46 }
  0xc8   :  { %1408 = vmatprep.mubr.bf16.mxu0 %v6044_v47 }
  0xc9   :  { %1562 = vmatmul.mubr.bf16.gmra.mxu1 %v6042_v48 }
  0xca   :  { %1569 = vmatprep.mubr.bf16.mxu1 %v6048_v49 }
  0xcf   :  { %1409 = vmatmul.mubr.bf16.gmra.mxu0 %v6046_v50 }
  0xd0   :  { %1416 = vmatprep.mubr.bf16.mxu0 %v6052_v51  ;;  %v6129_v51 = vld [vmem:[#allocation7 + $0x8] sm:$0xff]  }
  0xd1   :  { %1570 = vmatmul.mubr.bf16.gmra.mxu1 %v6051_v52 }
  0xd2   :  { %1577 = vmatprep.mubr.bf16.mxu1 %v6055_v53 }
  0xd7   :  { %1417 = vmatmul.mubr.bf16.gmra.mxu0 %v6054_v54 }
  0xd8   :  { %1618 = vmatprep.mubr.bf16.mxu0 %v6061_v55 }
  0xd9   :  { %1578 = vmatmul.mubr.bf16.gmra.mxu1 %v6057_v56 }
  0xda   :  { %5715 = vmatprep.mubr.bf16.mxu1 %v6062_v57 }
  0xdf   :  { %1619 = vmatmul.mubr.bf16.vlgmr.msra.gmra.mxu0 %v6059_v58  ;;  %v6101_v58 = vld [vmem:[#allocation2 + $0x240] ss:$28 sps:$4 sm:$0xff]  }
  0xe0   :  { %1626 = vmatprep.mubr.bf16.mxu0 %v6064_v59 }
  0xe1   :  { %5716 = vmatmul.mubr.bf16.vlgmr.msra.gmra.mxu1 %v6063_v60 }
  0xe2   :  { %5719 = vmatprep.mubr.bf16.mxu1 %v6070_v61  ;;  %5748 = vmatpush3.bf16.msra.mxu1 %v6123_v11  ;;  %v6104_v61 = vld [vmem:[#allocation2 + $0x27c] ss:$28 sps:$4 sm:$0xff]  }
  0xe3   :  { %5749 = vmatprep.subr.bf16.mxu1 %v6124_v16 }
  0xe6   :  { %5750 = vmatpush3.bf16.msra.mxu1 %v6124_v16  ;;  %v6109_v16 = vld [vmem:[#allocation2 + $0x2b4] ss:$28 sps:$4 sm:$0xff]  }
  0xe7   :  { %1627 = vmatmul.mubr.bf16.gmra.mxu0 %v6066_v62  ;;  %5751 = vmatprep.subr.bf16.mxu1 %v6125_v21 }
  0xe8   :  { %1634 = vmatprep.mubr.bf16.mxu0 %v6067_v63 }
  0xe9   :  { %5720 = vmatmul.mubr.bf16.gmra.mxu1 %v6071_v0 }
  0xea   :  { %5723 = vmatprep.mubr.bf16.mxu1 %v6078_v1  ;;  %5752 = vmatpush3.bf16.msra.mxu1 %v6125_v21 }
  0xeb   :  { %5753 = vmatprep.subr.bf16.mxu1 %v6126_v26 }
  0xee   :  { %5754 = vmatpush3.bf16.msra.mxu1 %v6126_v26 }
  0xef   :  { %1635 = vmatmul.mubr.bf16.gmra.mxu0 %v6069_v2  ;;  %5755 = vmatprep.subr.bf16.mxu1 %v6127_v30 }
  0xf0   :  { %1642 = vmatprep.mubr.bf16.mxu0 %v6072_v3 }
  0xf1   :  { %5724 = vmatmul.mubr.bf16.gmra.mxu1 %v6079_v4 }
  0xf2   :  { %5727 = vmatprep.mubr.bf16.mxu1 %v6086_v5  ;;  %5756 = vmatpush3.bf16.msra.mxu1 %v6127_v30 }
  0xf3   :  { %5757 = vmatprep.subr.bf16.mxu1 %v6128_v39 }
  0xf6   :  { %5758 = vmatpush3.bf16.msra.mxu1 %v6128_v39 }
  0xf7   :  { %1643 = vmatmul.mubr.bf16.gmra.mxu0 %v6074_v6  ;;  %5759 = vmatprep.subr.bf16.mxu1 %v6129_v51 }
  0xf8   :  { %1650 = vmatprep.mubr.bf16.mxu0 %v6075_v7 }
  0xf9   :  { %5728 = vmatmul.mubr.bf16.gmra.mxu1 %v6087_v8 }
  0xfa   :  { %5731 = vmatprep.mubr.bf16.mxu1 %v6094_v9  ;;  %5760 = vmatpush3.bf16.msra.mxu1 %v6129_v51  ;;  %v6112_v51 = vld [vmem:[#allocation2 + $0x2e8] ss:$28 sps:$4 sm:$0xff]  }
  0xff   :  { %1651 = vmatmul.mubr.bf16.gmra.mxu0 %v6077_v10 }
 0x100   :  { %1658 = vmatprep.mubr.bf16.mxu0 %v6080_v12  ;;  %v6106_v12 = vld [vmem:[#allocation2 + $0x278] ss:$28 sps:$4 sm:$0xff]  }
 0x101   :  { %5732 = vmatmul.mubr.bf16.gmra.mxu1 %v6095_v13  ;;  %v6130_v13 = vld [vmem:[#allocation7] sm:$0xff]  }
 0x102   :  { %5735 = vmatprep.mubr.bf16.mxu1 %v6102_v14  ;;  %5761 = vmatprep.subr.bf16.mxu1 %v6130_v13 }
 0x103   :  { %5762 = vmatpush3.bf16.msra.mxu1 %v6130_v13 }
 0x107   :  { %1659 = vmatmul.mubr.bf16.gmra.mxu0 %v6082_v15 }
 0x108   :  { %1666 = vmatprep.mubr.bf16.mxu0 %v6083_v17 }
 0x109   :  { %5736 = vmatmul.mubr.bf16.gmra.mxu1 %v6103_v18 }
 0x10a   :  { %5739 = vmatprep.mubr.bf16.mxu1 %v6110_v19 }
 0x10f   :  { %1667 = vmatmul.mubr.bf16.gmra.mxu0 %v6085_v20 }
 0x110   :  { %1674 = vmatprep.mubr.bf16.mxu0 %v6088_v22 }
 0x111   :  { %5740 = vmatmul.mubr.bf16.gmra.mxu1 %v6111_v23 }
 0x112   :  { %5743 = vmatprep.mubr.bf16.mxu1 %v6118_v24 }
 0x117   :  { %1675 = vmatmul.mubr.bf16.gmra.mxu0 %v6090_v25 }
 0x118   :  { %1682 = vmatprep.mubr.bf16.mxu0 %v6091_v27 }
 0x119   :  { %5744 = vmatmul.mubr.bf16.gmra.mxu1 %v6119_v28 }
 0x11f   :  { %v5283_v32 = vpop.f32.mrf.mxu0  ;;  %1683 = vmatmul.mubr.bf16.gmra.mxu0 %v6093_v29 }
 0x120   :  { %1690 = vmatprep.mubr.bf16.mxu0 %v6096_v31  ;;  %v6107_v31 = vld [vmem:[#allocation2 + $0x2b0] ss:$28 sps:$4 sm:$0xff]  }
 0x121   :  { %v5284_v34 = vpop.f32.mrf.mxu0  ;;  %v5395_v36 = vpop.f32.mrf.mxu1 }
 0x122   :  { %v5285_v35 = vadd.f32 %v5284_v34, %v5283_v32 }
 0x123   :  { %v5286_v37 = vpop.f32.mrf.mxu0  ;;  %v5396_v41 = vpop.f32.mrf.mxu1 }
 0x124   :  { %v1299_v40 = vadd.f32 %v5285_v35, %v7364_v33  ;;  %v5397_v43 = vadd.f32 %v5396_v41, %v5395_v36  ;;  %v6114_v35 = vld [vmem:[#allocation2 + $0x2ec] ss:$28 sps:$4 sm:$0xff]  }
 0x125   :  { %v5287_v44 = vpop.f32.mrf.mxu0  ;;  %v5398_v46 = vpop.f32.mrf.mxu1 }
 0x126   :  { %v5288_v45 = vadd.f32 %v5287_v44, %v5286_v37  ;;  %v7367_v47 = vadd.f32 %v5397_v43, %v1299_v40 }
 0x127   :  { %v5289_v48 = vpop.f32.mrf.mxu0  ;;  %1691 = vmatmul.mubr.bf16.gmra.mxu0 %v6098_v38  ;;  %v5399_v50 = vpop.f32.mrf.mxu1 }
 0x128   :  { %v1302_v49 = vadd.f32 %v5288_v45, %v7364_v33  ;;  %1698 = vmatprep.mubr.bf16.mxu0 %v6099_v42  ;;  %v5400_v52 = vadd.f32 %v5399_v50, %v5398_v46 }
 0x129   :  { %v5290_v53 = vpop.f32.mrf.mxu0  ;;  %v5401_v55 = vpop.f32.mrf.mxu1 }
 0x12a   :  { %v5291_v54 = vadd.f32 %v5290_v53, %v5289_v48  ;;  %v7370_v56 = vadd.f32 %v5400_v52, %v1302_v49 }
 0x12b   :  { %v5292_v57 = vpop.f32.mrf.mxu0  ;;  %v5402_v60 = vpop.f32.mrf.mxu1 }
 0x12c   :  { %v1307_v59 = vadd.f32 %v5291_v54, %v7364_v33  ;;  %v5403_v62 = vadd.f32 %v5402_v60, %v5401_v55  ;;  %v6117_v54 = vld [vmem:[#allocation2 + $0x324] ss:$28 sps:$4 sm:$0xff]  }
 0x12d   :  { %v5293_v63 = vpop.f32.mrf.mxu0  ;;  %v5404_v1 = vpop.f32.mrf.mxu1 }
 0x12e   :  { %v5294_v0 = vadd.f32 %v5293_v63, %v5292_v57  ;;  %v7373_v2 = vadd.f32 %v5403_v62, %v1307_v59 }
 0x12f   :  { %v5295_v3 = vpop.f32.mrf.mxu0  ;;  %1699 = vmatmul.mubr.bf16.gmra.mxu0 %v6101_v58  ;;  %v5405_v5 = vpop.f32.mrf.mxu1 }
 0x130   :  { %v1310_v4 = vadd.f32 %v5294_v0, %v7364_v33  ;;  %1706 = vmatprep.mubr.bf16.mxu0 %v6104_v61  ;;  %v5406_v6 = vadd.f32 %v5405_v5, %v5404_v1 }
 0x131   :  { %v5296_v7 = vpop.f32.mrf.mxu0  ;;  %v5407_v9 = vpop.f32.mrf.mxu1 }
 0x132   :  { %v5297_v8 = vadd.f32 %v5296_v7, %v5295_v3  ;;  %v7376_v10 = vadd.f32 %v5406_v6, %v1310_v4  ;;  %v6115_v7 = vld [vmem:[#allocation2 + $0x320] ss:$28 sps:$4 sm:$0xff]  }
 0x133   :  { %v5298_v11 = vpop.f32.mrf.mxu0  ;;  %v5408_v15 = vpop.f32.mrf.mxu1 }
 0x134   :  { %v1315_v14 = vadd.f32 %v5297_v8, %v7364_v33  ;;  %v5409_v17 = vadd.f32 %v5408_v15, %v5407_v9 }
 0x135   :  { %v5299_v18 = vpop.f32.mrf.mxu0  ;;  %v5410_v20 = vpop.f32.mrf.mxu1 }
 0x136   :  { %v5300_v19 = vadd.f32 %v5299_v18, %v5298_v11  ;;  %v7379_v21 = vadd.f32 %v5409_v17, %v1315_v14  ;;  %v6122_v11 = vld [vmem:[#allocation2 + $0x35c] ss:$28 sps:$4 sm:$0xff]  }
 0x137   :  { %v5301_v22 = vpop.f32.mrf.mxu0  ;;  %1707 = vmatmul.mubr.bf16.gmra.mxu0 %v6106_v12  ;;  %v5411_v24 = vpop.f32.mrf.mxu1 }
 0x138   :  { %v1318_v23 = vadd.f32 %v5300_v19, %v7364_v33  ;;  %1714 = vmatprep.mubr.bf16.mxu0 %v6109_v16  ;;  %v5412_v25 = vadd.f32 %v5411_v24, %v5410_v20 }
 0x139   :  { %v5302_v26 = vpop.f32.mrf.mxu0  ;;  %v5413_v28 = vpop.f32.mrf.mxu1 }
 0x13a   :  { %v5303_v27 = vadd.f32 %v5302_v26, %v5301_v22  ;;  %v7382_v29 = vadd.f32 %v5412_v25, %v1318_v23 }
 0x13b   :  { %v5304_v30 = vpop.f32.mrf.mxu0  ;;  %v5414_v34 = vpop.f32.mrf.mxu1 }
 0x13c   :  { %v1323_v32 = vadd.f32 %v5303_v27, %v7364_v33  ;;  %v5415_v36 = vadd.f32 %v5414_v34, %v5413_v28  ;;  %v6120_v27 = vld [vmem:[#allocation2 + $0x358] ss:$28 sps:$4 sm:$0xff]  }
 0x13d   :  { %v5305_v37 = vpop.f32.mrf.mxu0  ;;  %v5416_v39 = vpop.f32.mrf.mxu1 }
 0x13e   :  { %v5306_v38 = vadd.f32 %v5305_v37, %v5304_v30  ;;  %v7385_v40 = vadd.f32 %v5415_v36, %v1323_v32 }
 0x13f   :  { %v5307_v41 = vpop.f32.mrf.mxu0  ;;  %1715 = vmatmul.mubr.bf16.gmra.mxu0 %v6107_v31  ;;  %v5417_v43 = vpop.f32.mrf.mxu1 }
 0x140   :  { %v1326_v42 = vadd.f32 %v5306_v38, %v7364_v33  ;;  %1722 = vmatprep.mubr.bf16.mxu0 %v6114_v35  ;;  %v5418_v44 = vadd.f32 %v5417_v43, %v5416_v39 }
 0x141   :  { %v5308_v45 = vpop.f32.mrf.mxu0  ;;  %v5419_v48 = vpop.f32.mrf.mxu1 }
 0x142   :  { %v5309_v46 = vadd.f32 %v5308_v45, %v5307_v41  ;;  %v7388_v49 = vadd.f32 %v5418_v44, %v1326_v42 }
 0x143   :  { %v5310_v50 = vpop.f32.mrf.mxu0  ;;  %v5420_v53 = vpop.f32.mrf.mxu1 }
 0x144   :  { %v1331_v52 = vadd.f32 %v5309_v46, %v7364_v33  ;;  %v5421_v55 = vadd.f32 %v5420_v53, %v5419_v48 }
 0x145   :  { %v5311_v57 = vpop.f32.mrf.mxu0  ;;  %v5422_v59 = vpop.f32.mrf.mxu1 }
 0x146   :  { %v5312_v58 = vadd.f32 %v5311_v57, %v5310_v50  ;;  %v7391_v60 = vadd.f32 %v5421_v55, %v1331_v52 }
 0x147   :  { %v5313_v61 = vpop.f32.mrf.mxu0  ;;  %1723 = vmatmul.mubr.bf16.gmra.mxu0 %v6112_v51  ;;  %v5423_v63 = vpop.f32.mrf.mxu1 }
 0x148   :  { %v1334_v62 = vadd.f32 %v5312_v58, %v7364_v33  ;;  %1730 = vmatprep.mubr.bf16.mxu0 %v6117_v54  ;;  %v5424_v0 = vadd.f32 %v5423_v63, %v5422_v59 }
 0x149   :  { %v5314_v1 = vpop.f32.mrf.mxu0  ;;  %v5425_v4 = vpop.f32.mrf.mxu1 }
 0x14a   :  { %v5315_v3 = vadd.f32 %v5314_v1, %v5313_v61  ;;  %v7394_v5 = vadd.f32 %v5424_v0, %v1334_v62 }
 0x14b   :  { %v5316_v6 = vpop.f32.mrf.mxu0  ;;  %v5426_v9 = vpop.f32.mrf.mxu1 }
 0x14c   :  { %v1339_v8 = vadd.f32 %v5315_v3, %v7364_v33  ;;  %v5427_v12 = vadd.f32 %v5426_v9, %v5425_v4 }
 0x14d   :  { %v5317_v13 = vpop.f32.mrf.mxu0  ;;  %v5428_v15 = vpop.f32.mrf.mxu1 }
 0x14e   :  { %v5318_v14 = vadd.f32 %v5317_v13, %v5316_v6  ;;  %v7397_v16 = vadd.f32 %v5427_v12, %v1339_v8 }
 0x14f   :  { %v5319_v17 = vpop.f32.mrf.mxu0  ;;  %1731 = vmatmul.mubr.bf16.gmra.mxu0 %v6115_v7  ;;  %v5429_v19 = vpop.f32.mrf.mxu1 }
 0x150   :  { %v1342_v18 = vadd.f32 %v5318_v14, %v7364_v33  ;;  %1738 = vmatprep.mubr.bf16.mxu0 %v6122_v11  ;;  %v5430_v20 = vadd.f32 %v5429_v19, %v5428_v15 }
 0x151   :  { %v5320_v22 = vpop.f32.mrf.mxu0  ;;  %v5431_v24 = vpop.f32.mrf.mxu1 }
 0x152   :  { %v5321_v23 = vadd.f32 %v5320_v22, %v5319_v17  ;;  %v7400_v25 = vadd.f32 %v5430_v20, %v1342_v18 }
 0x153   :  { %v5322_v26 = vpop.f32.mrf.mxu0  ;;  %v5432_v30 = vpop.f32.mrf.mxu1 }
 0x154   :  { %v1347_v28 = vadd.f32 %v5321_v23, %v7364_v33  ;;  %v5433_v31 = vadd.f32 %v5432_v30, %v5431_v24 }
 0x155   :  { %v5323_v32 = vpop.f32.mrf.mxu0  ;;  %v5434_v35 = vpop.f32.mrf.mxu1 }
 0x156   :  { %v5324_v34 = vadd.f32 %v5323_v32, %v5322_v26  ;;  %v7403_v36 = vadd.f32 %v5433_v31, %v1347_v28 }
 0x157   :  { %v5325_v37 = vpop.f32.mrf.mxu0  ;;  %1739 = vmatmul.mubr.bf16.gmra.mxu0 %v6120_v27  ;;  %v5435_v39 = vpop.f32.mrf.mxu1 }
 0x158   :  { %v1350_v38 = vadd.f32 %v5324_v34, %v7364_v33  ;;  %v5436_v41 = vadd.f32 %v5435_v39, %v5434_v35 }
 0x159   :  { %v5326_v42 = vpop.f32.mrf.mxu0  ;;  %v5437_v44 = vpop.f32.mrf.mxu1 }
 0x15a   :  { %v5327_v43 = vadd.f32 %v5326_v42, %v5325_v37  ;;  %v7406_v45 = vadd.f32 %v5436_v41, %v1350_v38 }
 0x15b   :  { %v5328_v46 = vpop.f32.mrf.mxu0  ;;  %v5438_v50 = vpop.f32.mrf.mxu1 }
 0x15c   :  { %v1355_v48 = vadd.f32 %v5327_v43, %v7364_v33  ;;  %v5439_v51 = vadd.f32 %v5438_v50, %v5437_v44 }
 0x15d   :  { %v5329_v52 = vpop.f32.mrf.mxu0  ;;  %v5440_v54 = vpop.f32.mrf.mxu1 }
 0x15e   :  { %v5330_v53 = vadd.f32 %v5329_v52, %v5328_v46  ;;  %v7409_v55 = vadd.f32 %v5439_v51, %v1355_v48 }
 0x15f   :  { %v5331_v57 = vpop.f32.mrf.mxu0  ;;  %v5441_v59 = vpop.f32.mrf.mxu1 }
 0x160   :  { %v1358_v58 = vadd.f32 %v5330_v53, %v7364_v33  ;;  %v5442_v61 = vadd.f32 %v5441_v59, %v5440_v54 }
 0x161   :  { %v5332_v62 = vpop.f32.mrf.mxu0  ;;  %v5443_v0 = vpop.f32.mrf.mxu1 }
 0x162   :  { %v5333_v63 = vadd.f32 %v5332_v62, %v5331_v57  ;;  %v7412_v1 = vadd.f32 %v5442_v61, %v1358_v58 }
 0x163   :  { %v5334_v3 = vpop.f32.mrf.mxu0  ;;  %v5444_v6 = vpop.f32.mrf.mxu1 }
 0x164   :  { %v1363_v4 = vadd.f32 %v5333_v63, %v7364_v33  ;;  %v5445_v7 = vadd.f32 %v5444_v6, %v5443_v0 }
 0x165   :  { %v5335_v8 = vpop.f32.mrf.mxu0  ;;  %v5446_v11 = vpop.f32.mrf.mxu1 }
 0x166   :  { %v5336_v9 = vadd.f32 %v5335_v8, %v5334_v3  ;;  %v7415_v12 = vadd.f32 %v5445_v7, %v1363_v4 }
 0x167   :  { %v5337_v13 = vpop.f32.mrf.mxu0  ;;  %v5447_v15 = vpop.f32.mrf.mxu1 }
 0x168   :  { %v1366_v14 = vadd.f32 %v5336_v9, %v7364_v33  ;;  %v5448_v17 = vadd.f32 %v5447_v15, %v5446_v11 }
 0x169   :  { %v5338_v18 = vpop.f32.mrf.mxu0  ;;  %v5449_v20 = vpop.f32.mrf.mxu1 }
 0x16a   :  { %v5339_v19 = vadd.f32 %v5338_v18, %v5337_v13  ;;  %v7418_v22 = vadd.f32 %v5448_v17, %v1366_v14 }
 0x16b   :  { %v5340_v23 = vpop.f32.mrf.mxu0  ;;  %v5450_v26 = vpop.f32.mrf.mxu1 }
 0x16c   :  { %v1371_v24 = vadd.f32 %v5339_v19, %v7364_v33  ;;  %v5451_v27 = vadd.f32 %v5450_v26, %v5449_v20 }
 0x16d   :  { %v5341_v28 = vpop.f32.mrf.mxu0  ;;  %v5452_v31 = vpop.f32.mrf.mxu1 }
 0x16e   :  { %v5342_v30 = vadd.f32 %v5341_v28, %v5340_v23  ;;  %v7421_v32 = vadd.f32 %v5451_v27, %v1371_v24 }
 0x16f   :  { %v5343_v34 = vpop.f32.mrf.mxu0  ;;  %v5453_v37 = vpop.f32.mrf.mxu1 }
 0x170   :  { %v1374_v35 = vadd.f32 %v5342_v30, %v7364_v33  ;;  %v5454_v38 = vadd.f32 %v5453_v37, %v5452_v31  ;;  %v6131_v31 = vld [vmem:[#allocation8 + $0x38] sm:$0xff]  }
 0x171   :  { %v5344_v39 = vpop.f32.mrf.mxu0  ;;  %v5455_v42 = vpop.f32.mrf.mxu1  ;;  %5795 = vmatprep.subr.bf16.mxu0 %v6131_v31 }
 0x172   :  { %v5345_v41 = vadd.f32 %v5344_v39, %v5343_v34  ;;  %v7424_v43 = vadd.f32 %v5454_v38, %v1374_v35  ;;  %5796 = vmatpush3.bf16.msra.mxu0 %v6131_v31 }
 0x173   :  { %v5346_v44 = vpop.f32.mrf.mxu0  ;;  %v5456_v48 = vpop.f32.mrf.mxu1 }
 0x174   :  { %v1379_v46 = vadd.f32 %v5345_v41, %v7364_v33  ;;  %v5457_v50 = vadd.f32 %v5456_v48, %v5455_v42 }
 0x175   :  { %v5347_v51 = vpop.f32.mrf.mxu0  ;;  %v5458_v53 = vpop.f32.mrf.mxu1 }
 0x176   :  { %v5348_v52 = vadd.f32 %v5347_v51, %v5346_v44  ;;  %v7427_v54 = vadd.f32 %v5457_v50, %v1379_v46 }
 0x177   :  { %v5349_v57 = vpop.f32.mrf.mxu0  ;;  %v5459_v59 = vpop.f32.mrf.mxu1 }
 0x178   :  { %v1382_v58 = vadd.f32 %v5348_v52, %v7364_v33  ;;  %v5460_v61 = vadd.f32 %v5459_v59, %v5458_v53 }
 0x179   :  { %v5350_v62 = vpop.f32.mrf.mxu0  ;;  %v5461_v0 = vpop.f32.mrf.mxu1 }
 0x17a   :  { %v5351_v63 = vadd.f32 %v5350_v62, %v5349_v57  ;;  %v7430_v3 = vadd.f32 %v5460_v61, %v1382_v58 }
 0x17b   :  { %v5352_v4 = vpop.f32.mrf.mxu0  ;;  %v5462_v7 = vpop.f32.mrf.mxu1 }
 0x17c   :  { %v1387_v6 = vadd.f32 %v5351_v63, %v7364_v33  ;;  %v5463_v8 = vadd.f32 %v5462_v7, %v5461_v0 }
 0x17d   :  { %v5353_v9 = vpop.f32.mrf.mxu0  ;;  %v5464_v13 = vpop.f32.mrf.mxu1 }
 0x17e   :  { %v5354_v11 = vadd.f32 %v5353_v9, %v5352_v4  ;;  %v7433_v14 = vadd.f32 %v5463_v8, %v1387_v6 }
 0x17f   :  { %v5355_v15 = vpop.f32.mrf.mxu0  ;;  %v5465_v18 = vpop.f32.mrf.mxu1 }
 0x180   :  { %v1390_v17 = vadd.f32 %v5354_v11, %v7364_v33  ;;  %v5466_v19 = vadd.f32 %v5465_v18, %v5464_v13 }
 0x181   :  { %v5356_v20 = vpop.f32.mrf.mxu0  ;;  %v5467_v24 = vpop.f32.mrf.mxu1 }
 0x182   :  { %v5357_v23 = vadd.f32 %v5356_v20, %v5355_v15  ;;  %v7436_v26 = vadd.f32 %v5466_v19, %v1390_v17  ;;  %v6132_v20 = vld [vmem:[#allocation8 + $0x30] sm:$0xff]  }
 0x183   :  { %v5358_v27 = vpop.f32.mrf.mxu0  ;;  %v5468_v30 = vpop.f32.mrf.mxu1  ;;  %5797 = vmatprep.subr.bf16.mxu0 %v6132_v20 }
 0x184   :  { %v1395_v28 = vadd.f32 %v5357_v23, %v7364_v33  ;;  %v5469_v34 = vadd.f32 %v5468_v30, %v5467_v24  ;;  %5798 = vmatpush3.bf16.msra.mxu0 %v6132_v20 }
 0x185   :  { %v5359_v35 = vpop.f32.mrf.mxu0  ;;  %v5470_v38 = vpop.f32.mrf.mxu1 }
 0x186   :  { %v5360_v37 = vadd.f32 %v5359_v35, %v5358_v27  ;;  %v7439_v39 = vadd.f32 %v5469_v34, %v1395_v28 }
 0x187   :  { %v5361_v41 = vpop.f32.mrf.mxu0  ;;  %v5471_v44 = vpop.f32.mrf.mxu1 }
 0x188   :  { %v1398_v42 = vadd.f32 %v5360_v37, %v7364_v33  ;;  %v5472_v46 = vadd.f32 %v5471_v44, %v5470_v38 }
 0x189   :  { %v5362_v48 = vpop.f32.mrf.mxu0  ;;  %v5473_v51 = vpop.f32.mrf.mxu1 }
 0x18a   :  { %v5363_v50 = vadd.f32 %v5362_v48, %v5361_v41  ;;  %v7442_v52 = vadd.f32 %v5472_v46, %v1398_v42 }
 0x18b   :  { %v5364_v53 = vpop.f32.mrf.mxu0  ;;  %v5474_v58 = vpop.f32.mrf.mxu1 }
 0x18c   :  { %v1403_v57 = vadd.f32 %v5363_v50, %v7364_v33  ;;  %v5475_v59 = vadd.f32 %v5474_v58, %v5473_v51 }
 0x18d   :  { %v5365_v61 = vpop.f32.mrf.mxu0  ;;  %v5476_v63 = vpop.f32.mrf.mxu1 }
 0x18e   :  { %v5366_v62 = vadd.f32 %v5365_v61, %v5364_v53  ;;  %v7445_v0 = vadd.f32 %v5475_v59, %v1403_v57 }
 0x18f   :  { %v5367_v4 = vpop.f32.mrf.mxu0  ;;  %v5477_v7 = vpop.f32.mrf.mxu1 }
 0x190   :  { %v1406_v6 = vadd.f32 %v5366_v62, %v7364_v33  ;;  %v5478_v8 = vadd.f32 %v5477_v7, %v5476_v63 }
 0x191   :  { %v5368_v9 = vpop.f32.mrf.mxu0  ;;  %v5479_v13 = vpop.f32.mrf.mxu1 }
 0x192   :  { %v5369_v11 = vadd.f32 %v5368_v9, %v5367_v4  ;;  %v7448_v15 = vadd.f32 %v5478_v8, %v1406_v6 }
 0x193   :  { %v5370_v17 = vpop.f32.mrf.mxu0  ;;  %v5480_v19 = vpop.f32.mrf.mxu1 }
 0x194   :  { %v1411_v18 = vadd.f32 %v5369_v11, %v7364_v33  ;;  %v5481_v23 = vadd.f32 %v5480_v19, %v5479_v13 }
 0x195   :  { %v5371_v24 = vpop.f32.mrf.mxu0  ;;  %v5482_v28 = vpop.f32.mrf.mxu1 }
 0x196   :  { %v5372_v27 = vadd.f32 %v5371_v24, %v5370_v17  ;;  %v7451_v30 = vadd.f32 %v5481_v23, %v1411_v18  ;;  %v6133_v18 = vld [vmem:[#allocation8 + $0x28] sm:$0xff]  }
 0x197   :  { %v5373_v31 = vpop.f32.mrf.mxu0  ;;  %v5483_v35 = vpop.f32.mrf.mxu1  ;;  %5799 = vmatprep.subr.bf16.mxu0 %v6133_v18 }
 0x198   :  { %v1414_v34 = vadd.f32 %v5372_v27, %v7364_v33  ;;  %v5484_v37 = vadd.f32 %v5483_v35, %v5482_v28  ;;  %5800 = vmatpush3.bf16.msra.mxu0 %v6133_v18 }
 0x199   :  { %v5374_v38 = vpop.f32.mrf.mxu0  ;;  %v5485_v42 = vpop.f32.mrf.mxu1 }
 0x19a   :  { %v5375_v41 = vadd.f32 %v5374_v38, %v5373_v31  ;;  %v7454_v44 = vadd.f32 %v5484_v37, %v1414_v34  ;;  %v6134_v31 = vld [vmem:[#allocation8 + $0x20] sm:$0xff]   ;;  %v6135_v34 = vld [vmem:[#allocation8 + $0x18] sm:$0xff]  }
 0x19b   :  { %v5376_v46 = vpop.f32.mrf.mxu0  ;;  %v5486_v50 = vpop.f32.mrf.mxu1  ;;  %5801 = vmatprep.subr.bf16.mxu0 %v6134_v31 }
 0x19c   :  { %v1419_v48 = vadd.f32 %v5375_v41, %v7364_v33  ;;  %v5487_v51 = vadd.f32 %v5486_v50, %v5485_v42  ;;  %5802 = vmatpush3.bf16.msra.mxu0 %v6134_v31  ;;  %v6136_v50 = vld [vmem:[#allocation8 + $0x10] sm:$0xff]  }
 0x19d   :  { %v5377_v53 = vpop.f32.mrf.mxu0  ;;  %v5488_v58 = vpop.f32.mrf.mxu1  ;;  %5803 = vmatprep.subr.bf16.mxu0 %v6135_v34 }
 0x19e   :  { %v5378_v57 = vadd.f32 %v5377_v53, %v5376_v46  ;;  %v7457_v59 = vadd.f32 %v5487_v51, %v1419_v48 }
 0x19f   :  { %v5507_v61 = vpop.f32.mrf.mxu0  ;;  %v5489_v63 = vpop.f32.mrf.mxu1 }
 0x1a0   :  { %v1422_v62 = vadd.f32 %v5378_v57, %v7364_v33  ;;  %v5490_v4 = vadd.f32 %v5489_v63, %v5488_v58  ;;  %5804 = vmatpush3.bf16.msra.mxu0 %v6135_v34  ;;  %v6137_v63 = vld [vmem:[#allocation8 + $0x8] sm:$0xff]  }
 0x1a1   :  { %v5508_v6 = vpop.f32.mrf.mxu0  ;;  %v5717_v8 = vpop.f32.mrf.mxu1  ;;  %5805 = vmatprep.subr.bf16.mxu0 %v6136_v50 }
 0x1a2   :  { %v5509_v7 = vadd.f32 %v5508_v6, %v5507_v61  ;;  %v7460_v9 = vadd.f32 %v5490_v4, %v1422_v62 }
 0x1a3   :  { %v5510_v11 = vpop.f32.mrf.mxu0  ;;  %v1781_v17 = vpop.f32.mrf.mxu1 }
 0x1a4   :  { %v1621_v13 = vadd.f32 %v5509_v7, %v7367_v47  ;;  %5806 = vmatpush3.bf16.msra.mxu0 %v6136_v50 }
 0x1a5   :  { %v5511_v19 = vpop.f32.mrf.mxu0  ;;  %v5718_v23 = vpop.f32.mrf.mxu1  ;;  %5807 = vmatprep.subr.bf16.mxu0 %v6137_v63 }
 0x1a6   :  { %v5512_v20 = vadd.f32 %v5511_v19, %v5510_v11  ;;  %v1782_v27 = vadd.f32 %v1781_v17, %v1621_v13  ;;  %v6138_v19 = vld [vmem:[#allocation8] sm:$0xff]  }
 0x1a7   :  { %v5513_v24 = vpop.f32.mrf.mxu0  ;;  %v1784_v28 = vpop.f32.mrf.mxu1 }
 0x1a8   :  { %v1624_v33 = vadd.f32 %v5512_v20, %v7370_v56  ;;  %v1908_v42 = vmax.f32 %v1782_v27, 0.0  ;;  %5808 = vmatpush3.bf16.msra.mxu0 %v6137_v63 }
 0x1a9   :  { %v5514_v35 = vpop.f32.mrf.mxu0  ;;  %v5721_v47 = vpop.f32.mrf.mxu1  ;;  %5809 = vmatprep.subr.bf16.mxu0 %v6138_v19 }
 0x1aa   :  { %v5515_v37 = vadd.f32 %v5514_v35, %v5513_v24  ;;  %v1785_v38 = vadd.f32 %v1784_v28, %v1624_v33 }
 0x1ab   :  { %v5516_v41 = vpop.f32.mrf.mxu0  ;;  %v1797_v58 = vpop.f32.mrf.mxu1 }
 0x1ac   :  { %v1629_v46 = vadd.f32 %v5515_v37, %v7373_v2  ;;  %v1909_v48 = vmax.f32 %v1785_v38, 0.0  ;;  %5810 = vmatpush3.bf16.msra.mxu0 %v6138_v19 }
 0x1ad   :  { %v5517_v51 = vpop.f32.mrf.mxu0  ;;  %v5722_v2 = vpop.f32.mrf.mxu1 }
 0x1ae   :  { %v5518_v53 = vadd.f32 %v5517_v51, %v5516_v41  ;;  %v1940_v57 = vpack.c.bf16 %v1909_v48, %v1908_v42  ;;  %v1790_v61 = vadd.f32 %v5717_v8, %v1629_v46 }
 0x1af   :  { %v5519_v56 = vpop.f32.mrf.mxu0 }
 0x1b0   :  { %v1632_v62 = vadd.f32 %v5518_v53, %v7376_v10  ;;  %5763 = vmatprep.mubr.bf16.mxu1 %v1940_v57  ;;  %v1910_v13 = vmax.f32 %v1790_v61, 0.0  ;;  %v1800_v10 = vpop.f32.mrf.mxu1 }
 0x1b1   :  { %v5520_v4 = vpop.f32.mrf.mxu0 }
 0x1b2   :  { %v1793_v6 = vadd.f32 %v5718_v23, %v1632_v62  ;;  %v5521_v7 = vadd.f32 %v5520_v4, %v5519_v56  ;;  %v5725_v37 = vpop.f32.mrf.mxu1 }
 0x1b3   :  { %v5522_v11 = vpop.f32.mrf.mxu0 }
 0x1b4   :  { %v1911_v17 = vmax.f32 %v1793_v6, 0.0  ;;  %v1637_v18 = vadd.f32 %v5521_v7, %v7379_v21  ;;  %v1813_v51 = vpop.f32.mrf.mxu1 }
 0x1b5   :  { %v5523_v20 = vpop.f32.mrf.mxu0 }
 0x1b6   :  { %v1941_v24 = vpack.c.bf16 %v1911_v17, %v1910_v13  ;;  %v5524_v8 = vadd.f32 %v5523_v20, %v5522_v11  ;;  %v1798_v33 = vadd.f32 %v1797_v58, %v1637_v18  ;;  %v5726_v62 = vpop.f32.mrf.mxu1 }
 0x1b7   :  { %v5525_v27 = vpop.f32.mrf.mxu0 }
 0x1b8   :  { %5764 = vmatmul.mubr.bf16.vlgmr.msra.gmra.mxu1 %v1941_v24  ;;  %v1640_v23 = vadd.f32 %v5524_v8, %v7382_v29  ;;  %v1912_v21 = vmax.f32 %v1798_v33, 0.0  ;;  %v1816_v17 = vpop.f32.mrf.mxu1 }
 0x1b9   :  { %v5526_v28 = vpop.f32.mrf.mxu0 }
 0x1ba   :  { %v5527_v31 = vadd.f32 %v5526_v28, %v5525_v27  ;;  %v1801_v34 = vadd.f32 %v1800_v10, %v1640_v23  ;;  %v5729_v24 = vpop.f32.mrf.mxu1 }
 0x1bb   :  { %v5528_v35 = vpop.f32.mrf.mxu0 }
 0x1bc   :  { %v1645_v38 = vadd.f32 %v5527_v31, %v7385_v40  ;;  %v1913_v41 = vmax.f32 %v1801_v34, 0.0  ;;  %v1829_v31 = vpop.f32.mrf.mxu1 }
 0x1bd   :  { %v5529_v42 = vpop.f32.mrf.mxu0 }
 0x1be   :  { %v5530_v46 = vadd.f32 %v5529_v42, %v5528_v35  ;;  %v1942_v48 = vpack.c.bf16 %v1913_v41, %v1912_v21  ;;  %v1806_v53 = vadd.f32 %v5721_v47, %v1645_v38  ;;  %v5730_v42 = vpop.f32.mrf.mxu1 }
 0x1bf   :  { %v5531_v50 = vpop.f32.mrf.mxu0 }
 0x1c0   :  { %v1648_v57 = vadd.f32 %v5530_v46, %v7388_v49  ;;  %5767 = vmatprep.mubr.bf16.mxu1 %v1942_v48  ;;  %v1914_v63 = vmax.f32 %v1806_v53, 0.0 }
 0x1c1   :  { %v5532_v29 = vpop.f32.mrf.mxu0 }
 0x1c2   :  { %v1809_v56 = vadd.f32 %v5722_v2, %v1648_v57  ;;  %v5533_v58 = vadd.f32 %v5532_v29, %v5531_v50  ;;  %v1832_v29 = vpop.f32.mrf.mxu1 }
 0x1c3   :  { %v5534_v61 = vpop.f32.mrf.mxu0 }
 0x1c4   :  { %v1653_v4 = vadd.f32 %v5533_v58, %v7391_v60  ;;  %v1915_v6 = vmax.f32 %v1809_v56, 0.0 }
 0x1c5   :  { %v5535_v40 = vpop.f32.mrf.mxu0 }
 0x1c6   :  { %v5536_v7 = vadd.f32 %v5535_v40, %v5534_v61  ;;  %v1943_v11 = vpack.c.bf16 %v1915_v6, %v1914_v63  ;;  %v1814_v18 = vadd.f32 %v1813_v51, %v1653_v4  ;;  %v5733_v63 = vpop.f32.mrf.mxu1 }
 0x1c7   :  { %v5537_v13 = vpop.f32.mrf.mxu0 }
 0x1c8   :  { %5768 = vmatmul.mubr.bf16.gmra.mxu1 %v1943_v11  ;;  %v1656_v47 = vadd.f32 %v5536_v7, %v7394_v5  ;;  %v1916_v8 = vmax.f32 %v1814_v18, 0.0 }
 0x1c9   :  { %v5538_v49 = vpop.f32.mrf.mxu0 }
 0x1ca   :  { %v5539_v19 = vadd.f32 %v5538_v49, %v5537_v13  ;;  %v1817_v20 = vadd.f32 %v1816_v17, %v1656_v47  ;;  %v1845_v17 = vpop.f32.mrf.mxu1 }
 0x1cb   :  { %v5540_v2 = vpop.f32.mrf.mxu0 }
 0x1cc   :  { %v1661_v27 = vadd.f32 %v5539_v19, %v7397_v16  ;;  %v1917_v10 = vmax.f32 %v1817_v20, 0.0 }
 0x1cd   :  { %v5541_v60 = vpop.f32.mrf.mxu0 }
 0x1ce   :  { %v5542_v33 = vadd.f32 %v5541_v60, %v5540_v2  ;;  %v1944_v23 = vpack.c.bf16 %v1917_v10, %v1916_v8  ;;  %v1822_v34 = vadd.f32 %v5725_v37, %v1661_v27  ;;  %v5734_v2 = vpop.f32.mrf.mxu1 }
 0x1cf   :  { %v5543_v28 = vpop.f32.mrf.mxu0 }
 0x1d0   :  { %v1664_v35 = vadd.f32 %v5542_v33, %v7400_v25  ;;  %5771 = vmatprep.mubr.bf16.mxu1 %v1944_v23  ;;  %v1918_v46 = vmax.f32 %v1822_v34, 0.0 }
 0x1d1   :  { %v5544_v21 = vpop.f32.mrf.mxu0 }
 0x1d2   :  { %v1825_v5 = vadd.f32 %v5726_v62, %v1664_v35  ;;  %v5545_v38 = vadd.f32 %v5544_v21, %v5543_v28  ;;  %v1848_v28 = vpop.f32.mrf.mxu1 }
 0x1d3   :  { %v5546_v41 = vpop.f32.mrf.mxu0 }
 0x1d4   :  { %v1669_v48 = vadd.f32 %v5545_v38, %v7403_v36  ;;  %v1919_v50 = vmax.f32 %v1825_v5, 0.0  ;;  %v5737_v5 = vpop.f32.mrf.mxu1 }
 0x1d5   :  { %v5547_v16 = vpop.f32.mrf.mxu0 }
 0x1d6   :  { %v5548_v51 = vadd.f32 %v5547_v16, %v5546_v41  ;;  %v1945_v53 = vpack.c.bf16 %v1919_v50, %v1918_v46  ;;  %v1830_v56 = vadd.f32 %v1829_v31, %v1669_v48  ;;  %v1861_v16 = vpop.f32.mrf.mxu1 }
 0x1d7   :  { %v5549_v57 = vpop.f32.mrf.mxu0 }
 0x1d8   :  { %5772 = vmatmul.mubr.bf16.gmra.mxu1 %v1945_v53  ;;  %v1672_v37 = vadd.f32 %v5548_v51, %v7406_v45  ;;  %v1920_v4 = vmax.f32 %v1830_v56, 0.0 }
 0x1d9   :  { %v5550_v25 = vpop.f32.mrf.mxu0 }
 0x1da   :  { %v5551_v58 = vadd.f32 %v5550_v25, %v5549_v57  ;;  %v1833_v61 = vadd.f32 %v1832_v29, %v1672_v37  ;;  %v5738_v37 = vpop.f32.mrf.mxu1 }
 0x1db   :  { %v5552_v62 = vpop.f32.mrf.mxu0 }
 0x1dc   :  { %v1677_v6 = vadd.f32 %v5551_v58, %v7409_v55  ;;  %v1921_v40 = vmax.f32 %v1833_v61, 0.0 }
 0x1dd   :  { %v5553_v36 = vpop.f32.mrf.mxu0 }
 0x1de   :  { %v5554_v7 = vadd.f32 %v5553_v36, %v5552_v62  ;;  %v1946_v11 = vpack.c.bf16 %v1921_v40, %v1920_v4  ;;  %v1838_v18 = vadd.f32 %v5729_v24, %v1677_v6  ;;  %v1864_v40 = vpop.f32.mrf.mxu1 }
 0x1df   :  { %v5555_v13 = vpop.f32.mrf.mxu0 }
 0x1e0   :  { %v1680_v47 = vadd.f32 %v5554_v7, %v7412_v1  ;;  %5775 = vmatprep.mubr.bf16.mxu1 %v1946_v11  ;;  %v1922_v8 = vmax.f32 %v1838_v18, 0.0 }
 0x1e1   :  { %v5556_v49 = vpop.f32.mrf.mxu0 }
 0x1e2   :  { %v1841_v45 = vadd.f32 %v5730_v42, %v1680_v47  ;;  %v5557_v19 = vadd.f32 %v5556_v49, %v5555_v13 }
 0x1e3   :  { %v5558_v20 = vpop.f32.mrf.mxu0 }
 0x1e4   :  { %v1685_v27 = vadd.f32 %v5557_v19, %v7415_v12  ;;  %v1923_v10 = vmax.f32 %v1841_v45, 0.0 }
 0x1e5   :  { %v5559_v55 = vpop.f32.mrf.mxu0 }
 0x1e6   :  { %v5560_v60 = vadd.f32 %v5559_v55, %v5558_v20  ;;  %v1947_v33 = vpack.c.bf16 %v1923_v10, %v1922_v8  ;;  %v1846_v31 = vadd.f32 %v1845_v17, %v1685_v27  ;;  %v5741_v17 = vpop.f32.mrf.mxu1 }
 0x1e7   :  { %v5561_v23 = vpop.f32.mrf.mxu0 }
 0x1e8   :  { %5776 = vmatmul.mubr.bf16.gmra.mxu1 %v1947_v33  ;;  %v1688_v24 = vadd.f32 %v5560_v60, %v7418_v22  ;;  %v1924_v38 = vmax.f32 %v1846_v31, 0.0 }
 0x1e9   :  { %v5562_v1 = vpop.f32.mrf.mxu0 }
 0x1ea   :  { %v5563_v34 = vadd.f32 %v5562_v1, %v5561_v23  ;;  %v1849_v35 = vadd.f32 %v1848_v28, %v1688_v24 }
 0x1eb   :  { %v5564_v21 = vpop.f32.mrf.mxu0 }
 0x1ec   :  { %v1693_v41 = vadd.f32 %v5563_v34, %v7421_v32  ;;  %v1925_v42 = vmax.f32 %v1849_v35, 0.0 }
 0x1ed   :  { %v5565_v12 = vpop.f32.mrf.mxu0 }
 0x1ee   :  { %v5566_v46 = vadd.f32 %v5565_v12, %v5564_v21  ;;  %v1948_v48 = vpack.c.bf16 %v1925_v42, %v1924_v38  ;;  %v1854_v51 = vadd.f32 %v5733_v63, %v1693_v41 }
 0x1ef   :  { %v5567_v50 = vpop.f32.mrf.mxu0 }
 0x1f0   :  { %v1696_v53 = vadd.f32 %v5566_v46, %v7424_v43  ;;  %5779 = vmatprep.mubr.bf16.mxu1 %v1948_v48  ;;  %v1926_v25 = vmax.f32 %v1854_v51, 0.0 }
 0x1f1   :  { %v5568_v57 = vpop.f32.mrf.mxu0 }
 0x1f2   :  { %v1857_v22 = vadd.f32 %v5734_v2, %v1696_v53  ;;  %v5569_v29 = vadd.f32 %v5568_v57, %v5567_v50  ;;  %v1877_v2 = vpop.f32.mrf.mxu1 }
 0x1f3   :  { %v5570_v56 = vpop.f32.mrf.mxu0 }
 0x1f4   :  { %v1927_v58 = vmax.f32 %v1857_v22, 0.0  ;;  %v1701_v61 = vadd.f32 %v5569_v29, %v7427_v54  ;;  %v5742_v33 = vpop.f32.mrf.mxu1 }
 0x1f5   :  { %v5571_v32 = vpop.f32.mrf.mxu0 }
 0x1f6   :  { %v5572_v62 = vadd.f32 %v5571_v32, %v5570_v56  ;;  %v1949_v4 = vpack.c.bf16 %v1927_v58, %v1926_v25  ;;  %v1862_v36 = vadd.f32 %v1861_v16, %v1701_v61  ;;  %v1880_v35 = vpop.f32.mrf.mxu1 }
 0x1f7   :  { %v5573_v6 = vpop.f32.mrf.mxu0 }
 0x1f8   :  { %5780 = vmatmul.mubr.bf16.gmra.mxu1 %v1949_v4  ;;  %v1704_v63 = vadd.f32 %v5572_v62, %v7430_v3  ;;  %v1928_v18 = vmax.f32 %v1862_v36, 0.0  ;;  %v5745_v12 = vpop.f32.mrf.mxu1 }
 0x1f9   :  { %v5574_v43 = vpop.f32.mrf.mxu0 }
 0x1fa   :  { %v5575_v7 = vadd.f32 %v5574_v43, %v5573_v6  ;;  %v1865_v11 = vadd.f32 %v1864_v40, %v1704_v63  ;;  %v1893_v57 = vpop.f32.mrf.mxu1 }
 0x1fb   :  { %v5576_v13 = vpop.f32.mrf.mxu0 }
 0x1fc   :  { %v1709_v47 = vadd.f32 %v5575_v7, %v7433_v14  ;;  %v1929_v49 = vmax.f32 %v1865_v11, 0.0  ;;  %v5746_v58 = vpop.f32.mrf.mxu1 }
 0x1fd   :  { %v5577_v45 = vpop.f32.mrf.mxu0 }
 0x1fe   :  { %v5578_v54 = vadd.f32 %v5577_v45, %v5576_v13  ;;  %v1950_v19 = vpack.c.bf16 %v1929_v49, %v1928_v18  ;;  %v1870_v8 = vadd.f32 %v5737_v5, %v1709_v47  ;;  %v1896_v36 = vpop.f32.mrf.mxu1 }
 0x1ff   :  { %v5579_v20 = vpop.f32.mrf.mxu0 }
 0x200   :  { %v1712_v27 = vadd.f32 %v5578_v54, %v7436_v26  ;;  %5783 = vmatprep.mubr.bf16.mxu1 %v1950_v19  ;;  %v1930_v23 = vmax.f32 %v1870_v8, 0.0 }
 0x201   :  { %v5580_v10 = vpop.f32.mrf.mxu0 }
 0x202   :  { %v1873_v3 = vadd.f32 %v5738_v37, %v1712_v27  ;;  %v5581_v55 = vadd.f32 %v5580_v10, %v5579_v20  ;;  %v6141_v10 = vld [vmem:[#allocation10 + $0x18c] ss:$28 sps:$4 sm:$0xff]  }
 0x203   :  { %v5582_v60 = vpop.f32.mrf.mxu0  ;;  %2873 = vmatprep.subr.bf16.mxu1 %v6141_v10 }
 0x204   :  { %v1931_v28 = vmax.f32 %v1873_v3, 0.0  ;;  %v1717_v31 = vadd.f32 %v5581_v55, %v7439_v39  ;;  %v6144_v3 = vld [vmem:[#allocation10 + $0x154] ss:$28 sps:$4 sm:$0xff]  }
 0x205   :  { %v5583_v14 = vpop.f32.mrf.mxu0  ;;  %v6142_v55 = vld [vmem:[#allocation10 + $0x150] ss:$28 sps:$4 sm:$0xff]  }
 0x206   :  { %v5584_v24 = vadd.f32 %v5583_v14, %v5582_v60  ;;  %v1951_v1 = vpack.c.bf16 %v1931_v28, %v1930_v23  ;;  %v1878_v21 = vadd.f32 %v1877_v2, %v1717_v31  ;;  %v6156_v60 = vld [vmem:[#allocation10 + $0x194] ss:$28 sps:$4 sm:$0xff]  }
 0x207   :  { %v5585_v34 = vpop.f32.mrf.mxu0  ;;  %3066 = vmatprep.subr.bf16.mxu0 %v6156_v60  ;;  %v6145_v14 = vld [vmem:[#allocation10 + $0x118] ss:$28 sps:$4 sm:$0xff]  }
 0x208   :  { %5784 = vmatmul.mubr.bf16.gmra.mxu1 %v1951_v1  ;;  %v1720_v5 = vadd.f32 %v5584_v24, %v7442_v52  ;;  %v1932_v46 = vmax.f32 %v1878_v21, 0.0  ;;  %v6150_v1 = vld [vmem:[#allocation10 + $0xe4] ss:$28 sps:$4 sm:$0xff]  }
 0x209   :  { %v5586_v26 = vpop.f32.mrf.mxu0 }
 0x20a   :  { %v5587_v38 = vadd.f32 %v5586_v26, %v5585_v34  ;;  %v1881_v41 = vadd.f32 %v1880_v35, %v1720_v5  ;;  %v6148_v5 = vld [vmem:[#allocation10 + $0xe0] ss:$28 sps:$4 sm:$0xff]   ;;  %v6153_v26 = vld [vmem:[#allocation10 + $0xac] ss:$28 sps:$4 sm:$0xff]  }
 0x20b   :  { %v5588_v42 = vpop.f32.mrf.mxu0 }
 0x20c   :  { %v1725_v48 = vadd.f32 %v5587_v38, %v7445_v0  ;;  %v1933_v50 = vmax.f32 %v1881_v41, 0.0  ;;  %v6154_v41 = vld [vmem:[#allocation10 + $0x190] ss:$28 sps:$4 sm:$0xff]  }
 0x20d   :  { %v5589_v16 = vpop.f32.mrf.mxu0 }
 0x20e   :  { %v5590_v39 = vadd.f32 %v5589_v16, %v5588_v42  ;;  %v1952_v51 = vpack.c.bf16 %v1933_v50, %v1932_v46  ;;  %v1886_v22 = vadd.f32 %v5741_v17, %v1725_v48  ;;  %v6151_v46 = vld [vmem:[#allocation10 + $0xa8] ss:$28 sps:$4 sm:$0xff]   ;;  %v6162_v48 = vld [vmem:[#allocation10 + $0x74] ss:$28 sps:$4 sm:$0xff]  }
 0x20f   :  { %v5591_v53 = vpop.f32.mrf.mxu0  ;;  %v6157_v50 = vld [vmem:[#allocation10 + $0x158] ss:$28 sps:$4 sm:$0xff]   ;;  %v6165_v16 = vld [vmem:[#allocation10 + $0x124] ss:$28 sps:$4 sm:$0xff]  }
 0x210   :  { %v1728_v29 = vadd.f32 %v5590_v39, %v7448_v15  ;;  %5787 = vmatprep.mubr.bf16.mxu1 %v1952_v51  ;;  %v1934_v61 = vmax.f32 %v1886_v22, 0.0  ;;  %v6160_v39 = vld [vmem:[#allocation10 + $0x70] ss:$28 sps:$4 sm:$0xff]   ;;  %v6163_v22 = vld [vmem:[#allocation10 + $0x120] ss:$28 sps:$4 sm:$0xff]  }
 0x211   :  { %v5592_v56 = vpop.f32.mrf.mxu0 }
 0x212   :  { %v1889_v52 = vadd.f32 %v5742_v33, %v1728_v29  ;;  %v5593_v37 = vadd.f32 %v5592_v56, %v5591_v53  ;;  %v6171_v53 = vld [vmem:[#allocation10 + $0x3c] ss:$28 sps:$4 sm:$0xff]   ;;  %v6168_v56 = vld [vmem:[#allocation10 + $0xec] ss:$28 sps:$4 sm:$0xff]  }
 0x213   :  { %v5594_v25 = vpop.f32.mrf.mxu0 }
 0x214   :  { %v1935_v32 = vmax.f32 %v1889_v52, 0.0  ;;  %v1733_v62 = vadd.f32 %v5593_v37, %v7451_v30  ;;  %v6169_v37 = vld [vmem:[#allocation10 + $0x38] ss:$28 sps:$4 sm:$0xff]  }
 0x215   :  { %v5595_v0 = vpop.f32.mrf.mxu0 }
 0x216   :  { %v5596_v4 = vadd.f32 %v5595_v0, %v5594_v25  ;;  %v1953_v6 = vpack.c.bf16 %v1935_v32, %v1934_v61  ;;  %v1894_v63 = vadd.f32 %v1893_v57, %v1733_v62  ;;  %v6166_v61 = vld [vmem:[#allocation10 + $0xe8] ss:$28 sps:$4 sm:$0xff]   ;;  %v6174_v62 = vld [vmem:[#allocation10 + $0xb4] ss:$28 sps:$4 sm:$0xff]  }
 0x217   :  { %v5597_v40 = vpop.f32.mrf.mxu0 }
 0x218   :  { %5788 = vmatmul.mubr.bf16.gmra.mxu1 %v1953_v6  ;;  %v1736_v43 = vadd.f32 %v5596_v4, %v7454_v44  ;;  %v1936_v17 = vmax.f32 %v1894_v63, 0.0  ;;  %v6139_v44 = vld [vmem:[#allocation10 + $0x188] ss:$28 sps:$4 sm:$0xff]   ;;  %v6172_v6 = vld [vmem:[#allocation10 + $0xb0] ss:$28 sps:$4 sm:$0xff]  }
 0x219   :  { %v5598_v15 = vpop.f32.mrf.mxu0  ;;  %2874 = vmatpush1.bf16.msra.mxu1 %v6139_v44 }
 0x21a   :  { %v5599_v7 = vadd.f32 %v5598_v15, %v5597_v40  ;;  %v1897_v11 = vadd.f32 %v1896_v36, %v1736_v43  ;;  %2875 = vmatprep.subr.bf16.mxu1 %v6144_v3 }
 0x21b   :  { %v5600_v13 = vpop.f32.mrf.mxu0 }
 0x21c   :  { %v1741_v18 = vadd.f32 %v5599_v7, %v7457_v59  ;;  %v1937_v47 = vmax.f32 %v1897_v11, 0.0  ;;  %v7497_v59 = vld [vmem:[%s8308_s4] ss:$0 sm:$0xff] }
 0x21d   :  { %v5601_v49 = vpop.f32.mrf.mxu0  ;;  %2876 = vmatpush1.bf16.msra.mxu1 %v6142_v55 }
 0x21e   :  { %v5602_v45 = vadd.f32 %v5601_v49, %v5600_v13  ;;  %v1954_v30 = vpack.c.bf16 %v1937_v47, %v1936_v17  ;;  %v1902_v54 = vadd.f32 %v5745_v12, %v1741_v18  ;;  %v6159_v12 = vld [vmem:[#allocation10 + $0x15c] ss:$28 sps:$4 sm:$0xff]  }
 0x220   :  { %v1744_v19 = vadd.f32 %v5602_v45, %v7460_v9  ;;  %5791 = vmatprep.mubr.bf16.mxu1 %v1954_v30  ;;  %v1938_v2 = vmax.f32 %v1902_v54, 0.0  ;;  %v6147_v9 = vld [vmem:[#allocation10 + $0x11c] ss:$28 sps:$4 sm:$0xff]  }
 0x221   :  { %2877 = vmatprep.subr.bf16.mxu1 %v6147_v9 }
 0x222   :  { %v1905_v20 = vadd.f32 %v5746_v58, %v1744_v19  ;;  %2878 = vmatpush1.bf16.msra.mxu1 %v6145_v14 }
 0x223   :  { %2879 = vmatprep.subr.bf16.mxu1 %v6150_v1  ;;  %v6175_v1 = vld [vmem:[#allocation10 + $0x78] ss:$28 sps:$4 sm:$0xff]  }
 0x224   :  { %v1939_v8 = vmax.f32 %v1905_v20, 0.0 }
 0x226   :  { %v1955_v27 = vpack.c.bf16 %v1939_v8, %v1938_v2  ;;  %2880 = vmatpush1.bf16.msra.mxu1 %v6148_v5  ;;  %v6181_v5 = vld [vmem:[#allocation10 + $0x40] ss:$28 sps:$4 sm:$0xff]  }
 0x227   :  { %2881 = vmatprep.subr.bf16.mxu1 %v6153_v26 }
 0x228   :  { %5792 = vmatmul.mubr.bf16.gmra.mxu1 %v1955_v27 }
 0x22a   :  { %2882 = vmatpush1.bf16.msra.mxu1 %v6151_v46 }
 0x22b   :  { %2883 = vmatprep.subr.bf16.mxu1 %v6162_v48  ;;  %v6178_v48 = vld [vmem:[#allocation10] ss:$28 sps:$4 sm:$0xff]  }
 0x22e   :  { %2884 = vmatpush1.bf16.msra.mxu1 %v6160_v39 }
 0x22f   :  { %2885 = vmatprep.subr.bf16.mxu1 %v6171_v53 }
 0x232   :  { %2886 = vmatpush1.bf16.msra.mxu1 %v6169_v37 }
 0x278   :  { %v5765_v33 = vpop.f32.mrf.mxu1 }
 0x279   :  { %v2070_v23 = vadd.f32 %v5765_v33, %v7497_v59 }
 0x27a   :  { %v2061_v28 = vpop.f32.mrf.mxu1 }
 0x27b   :  { %4959 = vst [vmem:[#allocation12 + $0x10] sm:$0xff] %v2070_v23  ;;  %v2062_v31 = vadd.f32 %v7497_v59, %v2061_v28 }
 0x27c   :  { %v5766_v24 = vpop.f32.mrf.mxu1 }
 0x27d   :  { %4957 = vst [vmem:[#allocation12] sm:$0xff] %v2062_v31  ;;  %v2073_v34 = vadd.f32 %v5766_v24, %v7497_v59  ;;  %v6177_v24 = vld [vmem:[#allocation10 + $0x7c] ss:$28 sps:$4 sm:$0xff]  }
 0x27e   :  { %v2064_v35 = vpop.f32.mrf.mxu1 }
 0x27f   :  { %4960 = vst [vmem:[#allocation12 + $0x18] sm:$0xff] %v2073_v34  ;;  %v2065_v21 = vadd.f32 %v7497_v59, %v2064_v35  ;;  %v2189_v42 = vpack.c.bf16 %v2073_v34, %v2070_v23  ;;  %v6183_v35 = vld [vmem:[#allocation10 + $0x44] ss:$28 sps:$4 sm:$0xff]  }
 0x281   :  { %v2188_v38 = vpack.c.bf16 %v2065_v21, %v2062_v31  ;;  %4958 = vst [vmem:[#allocation12 + $0x8] sm:$0xff] %v2065_v21 }
 0x283   :  { %5811 = vmatprep.mubr.bf16.mxu0 %v2188_v38 }
 0x284   :  { %5812 = vmatmul.mubr.bf16.vlgmr.msra.gmra.mxu0 %v2189_v42  ;;  %v6180_v42 = vld [vmem:[#allocation10 + $0x4] ss:$28 sps:$4 sm:$0xff]  }
 0x285   :  { %3067 = vmatpush1.bf16.msra.mxu0 %v6154_v41  ;;  %2887 = vmatprep.subr.bf16.mxu1 %v6180_v42 }
 0x286   :  { %3068 = vmatprep.subr.bf16.mxu0 %v6159_v12  ;;  %v6186_v12 = vld [vmem:[#allocation10 + $0xc] ss:$28 sps:$4 sm:$0xff]   ;;  %2888 = vmatpush1.bf16.msra.mxu1 %v6178_v48 }
 0x288   :  { %v5769_v51 = vpop.f32.mrf.mxu1 }
 0x289   :  { %v2086_v57 = vadd.f32 %v5769_v51, %v7497_v59  ;;  %3069 = vmatpush1.bf16.msra.mxu0 %v6157_v50  ;;  %v6184_v50 = vld [vmem:[#allocation10 + $0x8] ss:$28 sps:$4 sm:$0xff]   ;;  %v7275_v51 = vmov 0  }
 0x28a   :  { %v2077_v29 = vpop.f32.mrf.mxu1  ;;  %3070 = vmatprep.subr.bf16.mxu0 %v6165_v16  ;;  %2905 = vmatprep.mubr.bf16.mxu1 %v7275_v51 }
 0x28b   :  { %4963 = vst [vmem:[#allocation12 + $0x30] sm:$0xff] %v2086_v57  ;;  %v2078_v52 = vadd.f32 %v7497_v59, %v2077_v29 }
 0x28c   :  { %v5770_v25 = vpop.f32.mrf.mxu1 }
 0x28d   :  { %4961 = vst [vmem:[#allocation12 + $0x20] sm:$0xff] %v2078_v52  ;;  %v2089_v58 = vadd.f32 %v5770_v25, %v7497_v59  ;;  %3071 = vmatpush1.bf16.msra.mxu0 %v6163_v22 }
 0x28e   :  { %v2080_v32 = vpop.f32.mrf.mxu1  ;;  %3072 = vmatprep.subr.bf16.mxu0 %v6168_v56 }
 0x28f   :  { %4964 = vst [vmem:[#allocation12 + $0x38] sm:$0xff] %v2089_v58  ;;  %v2081_v0 = vadd.f32 %v7497_v59, %v2080_v32  ;;  %v2191_v40 = vpack.c.bf16 %v2089_v58, %v2086_v57  ;;  %v6189_v57 = vld [vmem:[#allocation10 + $0x19c] ss:$28 sps:$4 sm:$0xff]  }
 0x290   :  { %3259 = vmatprep.subr.bf16.mxu1 %v6189_v57  ;;  %v6216_v57 = vld [vmem:[#allocation10 + $0x88] ss:$28 sps:$4 sm:$0xff]  }
 0x291   :  { %v2190_v4 = vpack.c.bf16 %v2081_v0, %v2078_v52  ;;  %4962 = vst [vmem:[#allocation12 + $0x28] sm:$0xff] %v2081_v0  ;;  %3073 = vmatpush1.bf16.msra.mxu0 %v6166_v61 }
 0x292   :  { %3074 = vmatprep.subr.bf16.mxu0 %v6174_v62 }
 0x293   :  { %5815 = vmatprep.mubr.bf16.mxu0 %v2190_v4 }
 0x294   :  { %5816 = vmatmul.mubr.bf16.gmra.mxu0 %v2191_v40 }
 0x295   :  { %3075 = vmatpush1.bf16.msra.mxu0 %v6172_v6 }
 0x296   :  { %3076 = vmatprep.subr.bf16.mxu0 %v6177_v24  ;;  %v6210_v24 = vld [vmem:[#allocation10 + $0x130] ss:$28 sps:$4 sm:$0xff]  }
 0x298   :  { %v5773_v36 = vpop.f32.mrf.mxu1 }
 0x299   :  { %v2102_v63 = vadd.f32 %v5773_v36, %v7497_v59  ;;  %3077 = vmatpush1.bf16.msra.mxu0 %v6175_v1 }
 0x29a   :  { %v2093_v43 = vpop.f32.mrf.mxu1  ;;  %3078 = vmatprep.subr.bf16.mxu0 %v6183_v35 }
 0x29b   :  { %4967 = vst [vmem:[#allocation12 + $0x50] sm:$0xff] %v2102_v63  ;;  %v2094_v15 = vadd.f32 %v7497_v59, %v2093_v43 }
 0x29c   :  { %v5774_v7 = vpop.f32.mrf.mxu1 }
 0x29d   :  { %4965 = vst [vmem:[#allocation12 + $0x40] sm:$0xff] %v2094_v15  ;;  %v2105_v11 = vadd.f32 %v5774_v7, %v7497_v59  ;;  %3079 = vmatpush1.bf16.msra.mxu0 %v6181_v5 }
 0x29e   :  { %v2096_v13 = vpop.f32.mrf.mxu1  ;;  %3080 = vmatprep.subr.bf16.mxu0 %v6186_v12 }
 0x29f   :  { %4968 = vst [vmem:[#allocation12 + $0x58] sm:$0xff] %v2105_v11  ;;  %v2097_v17 = vadd.f32 %v7497_v59, %v2096_v13  ;;  %v2193_v47 = vpack.c.bf16 %v2105_v11, %v2102_v63 }
 0x2a1   :  { %v2192_v18 = vpack.c.bf16 %v2097_v17, %v2094_v15  ;;  %4966 = vst [vmem:[#allocation12 + $0x48] sm:$0xff] %v2097_v17  ;;  %3081 = vmatpush1.bf16.msra.mxu0 %v6184_v50  ;;  %v6202_v17 = vld [vmem:[#allocation10 + $0x1a0] ss:$28 sps:$4 sm:$0xff]   ;;  %v6199_v50 = vld [vmem:[#allocation10 + $0xb8] ss:$28 sps:$4 sm:$0xff]  }
 0x2a2   :  { %5843 = vmatprep.subr.bf16.mxu0 %v6202_v17 }
 0x2a3   :  { %5819 = vmatprep.mubr.bf16.mxu0 %v2192_v18 }
 0x2a4   :  { %5820 = vmatmul.mubr.bf16.gmra.mxu0 %v2193_v47 }
 0x2a8   :  { %v5777_v49 = vpop.f32.mrf.mxu1 }
 0x2a9   :  { %v2118_v45 = vadd.f32 %v5777_v49, %v7497_v59  ;;  %v7536_v49 = vld [vmem:[%s8310_s6] ss:$0 sm:$0xff] }
 0x2aa   :  { %v2109_v30 = vpop.f32.mrf.mxu1 }
 0x2ab   :  { %4971 = vst [vmem:[#allocation12 + $0x70] sm:$0xff] %v2118_v45  ;;  %v2110_v54 = vadd.f32 %v7497_v59, %v2109_v30 }
 0x2ac   :  { %v5778_v19 = vpop.f32.mrf.mxu1 }
 0x2ad   :  { %4969 = vst [vmem:[#allocation12 + $0x60] sm:$0xff] %v2110_v54  ;;  %v2121_v20 = vadd.f32 %v5778_v19, %v7497_v59 }
 0x2ae   :  { %v2112_v2 = vpop.f32.mrf.mxu1 }
 0x2af   :  { %4972 = vst [vmem:[#allocation12 + $0x78] sm:$0xff] %v2121_v20  ;;  %v2113_v8 = vadd.f32 %v7497_v59, %v2112_v2  ;;  %v2195_v44 = vpack.c.bf16 %v2121_v20, %v2118_v45  ;;  %v6187_v2 = vld [vmem:[#allocation10 + $0x198] ss:$28 sps:$4 sm:$0xff]  }
 0x2b1   :  { %v2194_v27 = vpack.c.bf16 %v2113_v8, %v2110_v54  ;;  %4970 = vst [vmem:[#allocation12 + $0x68] sm:$0xff] %v2113_v8 }
 0x2b3   :  { %5823 = vmatprep.mubr.bf16.mxu0 %v2194_v27 }
 0x2b4   :  { %5824 = vmatmul.mubr.bf16.gmra.mxu0 %v2195_v44  ;;  %v6192_v44 = vld [vmem:[#allocation10 + $0x164] ss:$28 sps:$4 sm:$0xff]  }
 0x2b8   :  { %v5781_v10 = vpop.f32.mrf.mxu1 }
 0x2b9   :  { %v2134_v3 = vadd.f32 %v5781_v10, %v7497_v59 }
 0x2ba   :  { %v2125_v55 = vpop.f32.mrf.mxu1 }
 0x2bb   :  { %4975 = vst [vmem:[#allocation12 + $0x90] sm:$0xff] %v2134_v3  ;;  %v2126_v60 = vadd.f32 %v7497_v59, %v2125_v55  ;;  %v6190_v55 = vld [vmem:[#allocation10 + $0x160] ss:$28 sps:$4 sm:$0xff]  }
 0x2bc   :  { %v5782_v33 = vpop.f32.mrf.mxu1 }
 0x2bd   :  { %4973 = vst [vmem:[#allocation12 + $0x80] sm:$0xff] %v2126_v60  ;;  %v2137_v9 = vadd.f32 %v5782_v33, %v7497_v59  ;;  %v6195_v33 = vld [vmem:[#allocation10 + $0x12c] ss:$28 sps:$4 sm:$0xff]  }
 0x2be   :  { %v2128_v23 = vpop.f32.mrf.mxu1 }
 0x2bf   :  { %4976 = vst [vmem:[#allocation12 + $0x98] sm:$0xff] %v2137_v9  ;;  %v2129_v28 = vadd.f32 %v7497_v59, %v2128_v23  ;;  %v2197_v14 = vpack.c.bf16 %v2137_v9, %v2134_v3  ;;  %v6206_v3 = vld [vmem:[#allocation10 + $0x168] ss:$28 sps:$4 sm:$0xff]  }
 0x2c1   :  { %v2196_v31 = vpack.c.bf16 %v2129_v28, %v2126_v60  ;;  %4974 = vst [vmem:[#allocation12 + $0x88] sm:$0xff] %v2129_v28 }
 0x2c3   :  { %5827 = vmatprep.mubr.bf16.mxu0 %v2196_v31 }
 0x2c4   :  { %5828 = vmatmul.mubr.bf16.gmra.mxu0 %v2197_v14  ;;  %v6193_v14 = vld [vmem:[#allocation10 + $0x128] ss:$28 sps:$4 sm:$0xff]  }
 0x2c8   :  { %v5785_v34 = vpop.f32.mrf.mxu1 }
 0x2c9   :  { %v2150_v21 = vadd.f32 %v5785_v34, %v7497_v59  ;;  %v6198_v34 = vld [vmem:[#allocation10 + $0xf4] ss:$28 sps:$4 sm:$0xff]  }
 0x2ca   :  { %v2141_v26 = vpop.f32.mrf.mxu1 }
 0x2cb   :  { %4979 = vst [vmem:[#allocation12 + $0xb0] sm:$0xff] %v2150_v21  ;;  %v2142_v38 = vadd.f32 %v7497_v59, %v2141_v26 }
 0x2cc   :  { %v5786_v41 = vpop.f32.mrf.mxu1 }
 0x2cd   :  { %4977 = vst [vmem:[#allocation12 + $0xa0] sm:$0xff] %v2142_v38  ;;  %v2153_v46 = vadd.f32 %v5786_v41, %v7497_v59  ;;  %v6201_v41 = vld [vmem:[#allocation10 + $0xbc] ss:$28 sps:$4 sm:$0xff]  }
 0x2ce   :  { %v2144_v16 = vpop.f32.mrf.mxu1 }
 0x2cf   :  { %4980 = vst [vmem:[#allocation12 + $0xb8] sm:$0xff] %v2153_v46  ;;  %v2145_v39 = vadd.f32 %v7497_v59, %v2144_v16  ;;  %v2199_v22 = vpack.c.bf16 %v2153_v46, %v2150_v21  ;;  %v6211_v21 = vld [vmem:[#allocation10 + $0xf8] ss:$28 sps:$4 sm:$0xff]   ;;  %v6215_v16 = vld [vmem:[#allocation10 + $0xc0] ss:$28 sps:$4 sm:$0xff]  }
 0x2d1   :  { %v2198_v53 = vpack.c.bf16 %v2145_v39, %v2142_v38  ;;  %4978 = vst [vmem:[#allocation12 + $0xa8] sm:$0xff] %v2145_v39  ;;  %v6196_v38 = vld [vmem:[#allocation10 + $0xf0] ss:$28 sps:$4 sm:$0xff]   ;;  %v6205_v39 = vld [vmem:[#allocation10 + $0x84] ss:$28 sps:$4 sm:$0xff]  }
 0x2d3   :  { %5831 = vmatprep.mubr.bf16.mxu0 %v2198_v53 }
 0x2d4   :  { %5832 = vmatmul.mubr.bf16.gmra.mxu0 %v2199_v22 }
 0x2d8   :  { %v5789_v29 = vpop.f32.mrf.mxu1 }
 0x2d9   :  { %v2166_v56 = vadd.f32 %v5789_v29, %v7497_v59  ;;  %v6203_v29 = vld [vmem:[#allocation10 + $0x80] ss:$28 sps:$4 sm:$0xff]  }
 0x2da   :  { %v2157_v52 = vpop.f32.mrf.mxu1 }
 0x2db   :  { %4983 = vst [vmem:[#allocation12 + $0xd0] sm:$0xff] %v2166_v56  ;;  %v2158_v37 = vadd.f32 %v7497_v59, %v2157_v52  ;;  %v6209_v52 = vld [vmem:[#allocation10 + $0x4c] ss:$28 sps:$4 sm:$0xff]  }
 0x2dc   :  { %v5790_v25 = vpop.f32.mrf.mxu1 }
 0x2dd   :  { %4981 = vst [vmem:[#allocation12 + $0xc0] sm:$0xff] %v2158_v37  ;;  %v2169_v58 = vadd.f32 %v5790_v25, %v7497_v59 }
 0x2de   :  { %v2160_v61 = vpop.f32.mrf.mxu1 }
 0x2df   :  { %4984 = vst [vmem:[#allocation12 + $0xd8] sm:$0xff] %v2169_v58  ;;  %v2161_v32 = vadd.f32 %v7497_v59, %v2160_v61  ;;  %v2201_v0 = vpack.c.bf16 %v2169_v58, %v2166_v56  ;;  %v6207_v61 = vld [vmem:[#allocation10 + $0x48] ss:$28 sps:$4 sm:$0xff]  }
 0x2e1   :  { %v2200_v62 = vpack.c.bf16 %v2161_v32, %v2158_v37  ;;  %4982 = vst [vmem:[#allocation12 + $0xc8] sm:$0xff] %v2161_v32  ;;  %v6217_v32 = vld [vmem:[#allocation10 + $0x50] ss:$28 sps:$4 sm:$0xff]  }
 0x2e3   :  { %5835 = vmatprep.mubr.bf16.mxu0 %v2200_v62 }
 0x2e4   :  { %5836 = vmatmul.mubr.bf16.gmra.mxu0 %v2201_v0  ;;  %v6214_v0 = vld [vmem:[#allocation10 + $0x14] ss:$28 sps:$4 sm:$0xff]  }
 0x2e8   :  { %v5793_v4 = vpop.f32.mrf.mxu1 }
 0x2e9   :  { %v2182_v6 = vadd.f32 %v5793_v4, %v7497_v59 }
 0x2ea   :  { %v2173_v40 = vpop.f32.mrf.mxu1 }
 0x2eb   :  { %4987 = vst [vmem:[#allocation12 + $0xf0] sm:$0xff] %v2182_v6  ;;  %v2174_v36 = vadd.f32 %v7497_v59, %v2173_v40 }
 0x2ec   :  { %v5794_v63 = vpop.f32.mrf.mxu1 }
 0x2ed   :  { %4985 = vst [vmem:[#allocation12 + $0xe0] sm:$0xff] %v2174_v36  ;;  %v2185_v43 = vadd.f32 %v5794_v63, %v7497_v59  ;;  %v6212_v63 = vld [vmem:[#allocation10 + $0x10] ss:$28 sps:$4 sm:$0xff]  }
 0x2ee   :  { %v2176_v15 = vpop.f32.mrf.mxu1 }
 0x2ef   :  { %4988 = vst [vmem:[#allocation12 + $0xf8] sm:$0xff] %v2185_v43  ;;  %v2177_v7 = vadd.f32 %v7497_v59, %v2176_v15  ;;  %v2203_v13 = vpack.c.bf16 %v2185_v43, %v2182_v6  ;;  %v6218_v6 = vld [vmem:[#allocation10 + $0x18] ss:$28 sps:$4 sm:$0xff]  }
 0x2f1   :  { %v2202_v11 = vpack.c.bf16 %v2177_v7, %v2174_v36  ;;  %4986 = vst [vmem:[#allocation12 + $0xe8] sm:$0xff] %v2177_v7 }
 0x2f3   :  { %5839 = vmatprep.mubr.bf16.mxu0 %v2202_v11 }
 0x2f4   :  { %5840 = vmatmul.mubr.bf16.gmra.mxu0 %v2203_v13 }
 0x2f5   :  { %3098 = vmatprep.mubr.bf16.mxu0 %v7275_v51 }
 0x344   :  { %v5813_v18 = vpop.f32.mrf.mxu0 }
 0x345   :  { %v2318_v10 = vadd.f32 %v5813_v18, %v7536_v49 }
 0x346   :  { %v2309_v47 = vpop.f32.mrf.mxu0 }
 0x347   :  { %v2310_v30 = vadd.f32 %v7536_v49, %v2309_v47  ;;  %v2438_v23 = vmax.f32 %v2318_v10, 0.0 }
 0x348   :  { %v5814_v45 = vpop.f32.mrf.mxu0 }
 0x349   :  { %v2436_v19 = vmax.f32 %v2310_v30, 0.0  ;;  %v2321_v8 = vadd.f32 %v5814_v45, %v7536_v49 }
 0x34a   :  { %v2312_v59 = vpop.f32.mrf.mxu0 }
 0x34b   :  { %v2313_v54 = vadd.f32 %v7536_v49, %v2312_v59  ;;  %v2439_v60 = vmax.f32 %v2321_v8, 0.0 }
 0x34d   :  { %v2437_v20 = vmax.f32 %v2313_v54, 0.0  ;;  %v7548_v31 = vpack.c.bf16 %v2439_v60, %v2438_v23 }
 0x34f   :  { %v7541_v27 = vpack.c.bf16 %v2437_v20, %v2436_v19 }
 0x351   :  { %2906 = vmatmul.mubr.bf16.vlgmr.msra.gmra.mxu1 %v7541_v27  ;;  %3099 = vmatmul.mubr.bf16.vlgmr.msra.gmra.mxu0 %v7541_v27 }
 0x352   :  { %3260 = vmatpush1.bf16.msra.mxu1 %v6187_v2  ;;  %2915 = vmatprep.mubr.bf16.mxu1 %v7275_v51 }
 0x353   :  { %3108 = vmatprep.mubr.bf16.mxu0 %v7275_v51  ;;  %3261 = vmatprep.subr.bf16.mxu1 %v6192_v44 }
 0x354   :  { %v5817_v9 = vpop.f32.mrf.mxu0  ;;  %5844 = vmatpush3.bf16.msra.mxu0 %v6202_v17 }
 0x355   :  { %5845 = vmatprep.subr.bf16.mxu0 %v6206_v3  ;;  %v2334_v53 = vadd.f32 %v5817_v9, %v7536_v49 }
 0x356   :  { %v2325_v28 = vpop.f32.mrf.mxu0  ;;  %3262 = vmatpush1.bf16.msra.mxu1 %v6190_v55 }
 0x357   :  { %3263 = vmatprep.subr.bf16.mxu1 %v6195_v33  ;;  %v2326_v35 = vadd.f32 %v7536_v49, %v2325_v28  ;;  %v2442_v37 = vmax.f32 %v2334_v53, 0.0 }
 0x358   :  { %v5818_v1 = vpop.f32.mrf.mxu0  ;;  %5846 = vmatpush3.bf16.msra.mxu0 %v6206_v3 }
 0x359   :  { %2916 = vmatmul.mubr.bf16.gmra.mxu1 %v7548_v31  ;;  %3109 = vmatmul.mubr.bf16.gmra.mxu0 %v7548_v31  ;;  %v2440_v42 = vmax.f32 %v2326_v35, 0.0  ;;  %v2337_v46 = vadd.f32 %v5818_v1, %v7536_v49 }
 0x35a   :  { %v2328_v5 = vpop.f32.mrf.mxu0  ;;  %2925 = vmatprep.mubr.bf16.mxu1 %v7275_v51  ;;  %3118 = vmatprep.mubr.bf16.mxu0 %v7275_v51 }
 0x35b   :  { %v2329_v26 = vadd.f32 %v7536_v49, %v2328_v5  ;;  %3264 = vmatpush1.bf16.msra.mxu1 %v6193_v14  ;;  %5847 = vmatprep.subr.bf16.mxu0 %v6210_v24  ;;  %v2443_v22 = vmax.f32 %v2337_v46, 0.0 }
 0x35c   :  { %3265 = vmatprep.subr.bf16.mxu1 %v6198_v34  ;;  %5848 = vmatpush3.bf16.msra.mxu0 %v6210_v24 }
 0x35d   :  { %v2441_v12 = vmax.f32 %v2329_v26, 0.0  ;;  %5849 = vmatprep.subr.bf16.mxu0 %v6211_v21  ;;  %v7564_v58 = vpack.c.bf16 %v2443_v22, %v2442_v37 }
 0x35f   :  { %v7557_v48 = vpack.c.bf16 %v2441_v12, %v2440_v42  ;;  %3266 = vmatpush1.bf16.msra.mxu1 %v6196_v38 }
 0x360   :  { %3267 = vmatprep.subr.bf16.mxu1 %v6201_v41  ;;  %5850 = vmatpush3.bf16.msra.mxu0 %v6211_v21 }
 0x361   :  { %2926 = vmatmul.mubr.bf16.gmra.mxu1 %v7557_v48  ;;  %3119 = vmatmul.mubr.bf16.gmra.mxu0 %v7557_v48 }
 0x362   :  { %2935 = vmatprep.mubr.bf16.mxu1 %v7275_v51  ;;  %3128 = vmatprep.mubr.bf16.mxu0 %v7275_v51 }
 0x363   :  { %3268 = vmatpush1.bf16.msra.mxu1 %v6199_v50  ;;  %5851 = vmatprep.subr.bf16.mxu0 %v6215_v16 }
 0x364   :  { %v5821_v56 = vpop.f32.mrf.mxu0  ;;  %3269 = vmatprep.subr.bf16.mxu1 %v6205_v39  ;;  %5852 = vmatpush3.bf16.msra.mxu0 %v6215_v16 }
 0x365   :  { %5853 = vmatprep.subr.bf16.mxu0 %v6216_v57  ;;  %v2350_v13 = vadd.f32 %v5821_v56, %v7536_v49 }
 0x366   :  { %v2341_v25 = vpop.f32.mrf.mxu0 }
 0x367   :  { %3270 = vmatpush1.bf16.msra.mxu1 %v6203_v29  ;;  %v2342_v4 = vadd.f32 %v7536_v49, %v2341_v25  ;;  %v2446_v47 = vmax.f32 %v2350_v13, 0.0 }
 0x368   :  { %v5822_v62 = vpop.f32.mrf.mxu0  ;;  %3271 = vmatprep.subr.bf16.mxu1 %v6209_v52  ;;  %5854 = vmatpush3.bf16.msra.mxu0 %v6216_v57 }
 0x369   :  { %2936 = vmatmul.mubr.bf16.gmra.mxu1 %v7564_v58  ;;  %3129 = vmatmul.mubr.bf16.gmra.mxu0 %v7564_v58  ;;  %v2444_v43 = vmax.f32 %v2342_v4, 0.0  ;;  %v2353_v7 = vadd.f32 %v5822_v62, %v7536_v49 }
 0x36a   :  { %v2344_v40 = vpop.f32.mrf.mxu0  ;;  %2945 = vmatprep.mubr.bf16.mxu1 %v7275_v51  ;;  %3138 = vmatprep.mubr.bf16.mxu0 %v7275_v51 }
 0x36b   :  { %v2345_v36 = vadd.f32 %v7536_v49, %v2344_v40  ;;  %3272 = vmatpush1.bf16.msra.mxu1 %v6207_v61  ;;  %5855 = vmatprep.subr.bf16.mxu0 %v6217_v32  ;;  %v2447_v17 = vmax.f32 %v2353_v7, 0.0 }
 0x36c   :  { %3273 = vmatprep.subr.bf16.mxu1 %v6214_v0  ;;  %5856 = vmatpush3.bf16.msra.mxu0 %v6217_v32 }
 0x36d   :  { %v2445_v15 = vmax.f32 %v2345_v36, 0.0  ;;  %5857 = vmatprep.subr.bf16.mxu0 %v6218_v6  ;;  %v7580_v30 = vpack.c.bf16 %v2447_v17, %v2446_v47 }
 0x36f   :  { %v7573_v11 = vpack.c.bf16 %v2445_v15, %v2444_v43  ;;  %3274 = vmatpush1.bf16.msra.mxu1 %v6212_v63 }
 0x370   :  { %5858 = vmatpush3.bf16.msra.mxu0 %v6218_v6 }
 0x371   :  { %2946 = vmatmul.mubr.bf16.gmra.mxu1 %v7573_v11  ;;  %3139 = vmatmul.mubr.bf16.gmra.mxu0 %v7573_v11 }
 0x372   :  { %2955 = vmatprep.mubr.bf16.mxu1 %v7275_v51  ;;  %3148 = vmatprep.mubr.bf16.mxu0 %v7275_v51 }
 0x374   :  { %v5825_v18 = vpop.f32.mrf.mxu0 }
 0x375   :  { %v2366_v3 = vadd.f32 %v5825_v18, %v7536_v49 }
 0x376   :  { %v2357_v45 = vpop.f32.mrf.mxu0 }
 0x377   :  { %v2358_v54 = vadd.f32 %v7536_v49, %v2357_v45  ;;  %v2450_v33 = vmax.f32 %v2366_v3, 0.0 }
 0x378   :  { %v5826_v59 = vpop.f32.mrf.mxu0 }
 0x379   :  { %2956 = vmatmul.mubr.bf16.gmra.mxu1 %v7580_v30  ;;  %3149 = vmatmul.mubr.bf16.gmra.mxu0 %v7580_v30  ;;  %v2448_v2 = vmax.f32 %v2358_v54, 0.0  ;;  %v2369_v44 = vadd.f32 %v5826_v59, %v7536_v49 }
 0x37a   :  { %v2360_v19 = vpop.f32.mrf.mxu0  ;;  %2965 = vmatprep.mubr.bf16.mxu1 %v7275_v51  ;;  %3158 = vmatprep.mubr.bf16.mxu0 %v7275_v51 }
 0x37b   :  { %v2361_v20 = vadd.f32 %v7536_v49, %v2360_v19  ;;  %v2451_v55 = vmax.f32 %v2369_v44, 0.0 }
 0x37d   :  { %v2449_v8 = vmax.f32 %v2361_v20, 0.0  ;;  %v7596_v23 = vpack.c.bf16 %v2451_v55, %v2450_v33 }
 0x37f   :  { %v7589_v10 = vpack.c.bf16 %v2449_v8, %v2448_v2 }
 0x381   :  { %2966 = vmatmul.mubr.bf16.gmra.mxu1 %v7589_v10  ;;  %3159 = vmatmul.mubr.bf16.gmra.mxu0 %v7589_v10 }
 0x382   :  { %2975 = vmatprep.mubr.bf16.mxu1 %v7275_v51  ;;  %3168 = vmatprep.mubr.bf16.mxu0 %v7275_v51 }
 0x384   :  { %v5829_v60 = vpop.f32.mrf.mxu0 }
 0x385   :  { %v2382_v26 = vadd.f32 %v5829_v60, %v7536_v49 }
 0x386   :  { %v2373_v9 = vpop.f32.mrf.mxu0 }
 0x387   :  { %v2374_v14 = vadd.f32 %v7536_v49, %v2373_v9  ;;  %v2454_v42 = vmax.f32 %v2382_v26, 0.0 }
 0x388   :  { %v5830_v28 = vpop.f32.mrf.mxu0 }
 0x389   :  { %2976 = vmatmul.mubr.bf16.gmra.mxu1 %v7596_v23  ;;  %3169 = vmatmul.mubr.bf16.gmra.mxu0 %v7596_v23  ;;  %v2452_v34 = vmax.f32 %v2374_v14, 0.0  ;;  %v2385_v21 = vadd.f32 %v5830_v28, %v7536_v49 }
 0x38a   :  { %v2376_v24 = vpop.f32.mrf.mxu0  ;;  %2985 = vmatprep.mubr.bf16.mxu1 %v7275_v51  ;;  %3178 = vmatprep.mubr.bf16.mxu0 %v7275_v51 }
 0x38b   :  { %v2377_v1 = vadd.f32 %v7536_v49, %v2376_v24  ;;  %v2455_v38 = vmax.f32 %v2385_v21, 0.0 }
 0x38d   :  { %v2453_v35 = vmax.f32 %v2377_v1, 0.0  ;;  %v7612_v46 = vpack.c.bf16 %v2455_v38, %v2454_v42 }
 0x38f   :  { %v7605_v5 = vpack.c.bf16 %v2453_v35, %v2452_v34 }
 0x391   :  { %2986 = vmatmul.mubr.bf16.gmra.mxu1 %v7605_v5  ;;  %3179 = vmatmul.mubr.bf16.gmra.mxu0 %v7605_v5 }
 0x392   :  { %2995 = vmatprep.mubr.bf16.mxu1 %v7275_v51  ;;  %3188 = vmatprep.mubr.bf16.mxu0 %v7275_v51 }
 0x394   :  { %v5833_v41 = vpop.f32.mrf.mxu0 }
 0x395   :  { %v2398_v52 = vadd.f32 %v5833_v41, %v7536_v49 }
 0x396   :  { %v2389_v12 = vpop.f32.mrf.mxu0 }
 0x397   :  { %v2390_v16 = vadd.f32 %v7536_v49, %v2389_v12  ;;  %v2458_v61 = vmax.f32 %v2398_v52, 0.0 }
 0x398   :  { %v5834_v50 = vpop.f32.mrf.mxu0 }
 0x399   :  { %2996 = vmatmul.mubr.bf16.gmra.mxu1 %v7612_v46  ;;  %3189 = vmatmul.mubr.bf16.gmra.mxu0 %v7612_v46  ;;  %v2456_v57 = vmax.f32 %v2390_v16, 0.0  ;;  %v2401_v29 = vadd.f32 %v5834_v50, %v7536_v49 }
 0x39a   :  { %v2392_v39 = vpop.f32.mrf.mxu0  ;;  %3005 = vmatprep.mubr.bf16.mxu1 %v7275_v51  ;;  %3198 = vmatprep.mubr.bf16.mxu0 %v7275_v51 }
 0x39b   :  { %v2393_v53 = vadd.f32 %v7536_v49, %v2392_v39  ;;  %v2459_v37 = vmax.f32 %v2401_v29, 0.0 }
 0x39d   :  { %v2457_v22 = vmax.f32 %v2393_v53, 0.0  ;;  %v7628_v62 = vpack.c.bf16 %v2459_v37, %v2458_v61 }
 0x39f   :  { %v7621_v56 = vpack.c.bf16 %v2457_v22, %v2456_v57 }
 0x3a1   :  { %3006 = vmatmul.mubr.bf16.gmra.mxu1 %v7621_v56  ;;  %3199 = vmatmul.mubr.bf16.gmra.mxu0 %v7621_v56 }
 0x3a2   :  { %3015 = vmatprep.mubr.bf16.mxu1 %v7275_v51  ;;  %3208 = vmatprep.mubr.bf16.mxu0 %v7275_v51 }
 0x3a4   :  { %v5837_v25 = vpop.f32.mrf.mxu0 }
 0x3a5   :  { %v2414_v7 = vadd.f32 %v5837_v25, %v7536_v49 }
 0x3a6   :  { %v2405_v32 = vpop.f32.mrf.mxu0 }
 0x3a7   :  { %v2406_v4 = vadd.f32 %v7536_v49, %v2405_v32  ;;  %v2462_v18 = vmax.f32 %v2414_v7, 0.0 }
 0x3a8   :  { %v5838_v0 = vpop.f32.mrf.mxu0 }
 0x3a9   :  { %3016 = vmatmul.mubr.bf16.gmra.mxu1 %v7628_v62  ;;  %3209 = vmatmul.mubr.bf16.gmra.mxu0 %v7628_v62  ;;  %v2460_v36 = vmax.f32 %v2406_v4, 0.0  ;;  %v2417_v43 = vadd.f32 %v5838_v0, %v7536_v49 }
 0x3aa   :  { %v2408_v6 = vpop.f32.mrf.mxu0  ;;  %3025 = vmatprep.mubr.bf16.mxu1 %v7275_v51  ;;  %3218 = vmatprep.mubr.bf16.mxu0 %v7275_v51 }
 0x3ab   :  { %v2409_v40 = vadd.f32 %v7536_v49, %v2408_v6  ;;  %v2463_v13 = vmax.f32 %v2417_v43, 0.0 }
 0x3ad   :  { %v2461_v63 = vmax.f32 %v2409_v40, 0.0  ;;  %v7644_v45 = vpack.c.bf16 %v2463_v13, %v2462_v18 }
 0x3af   :  { %v7637_v15 = vpack.c.bf16 %v2461_v63, %v2460_v36 }
 0x3b1   :  { %3026 = vmatmul.mubr.bf16.gmra.mxu1 %v7637_v15  ;;  %3219 = vmatmul.mubr.bf16.gmra.mxu0 %v7637_v15 }
 0x3b2   :  { %3035 = vmatprep.mubr.bf16.mxu1 %v7275_v51  ;;  %3228 = vmatprep.mubr.bf16.mxu0 %v7275_v51 }
 0x3b4   :  { %v5841_v17 = vpop.f32.mrf.mxu0 }
 0x3b5   :  { %v2430_v55 = vadd.f32 %v5841_v17, %v7536_v49 }
 0x3b6   :  { %v2421_v47 = vpop.f32.mrf.mxu0 }
 0x3b7   :  { %v2422_v54 = vadd.f32 %v7536_v49, %v2421_v47  ;;  %v2466_v33 = vmax.f32 %v2430_v55, 0.0 }
 0x3b8   :  { %v5842_v59 = vpop.f32.mrf.mxu0 }
 0x3b9   :  { %3036 = vmatmul.mubr.bf16.gmra.mxu1 %v7644_v45  ;;  %3229 = vmatmul.mubr.bf16.gmra.mxu0 %v7644_v45  ;;  %v2464_v2 = vmax.f32 %v2422_v54, 0.0  ;;  %v2433_v44 = vadd.f32 %v5842_v59, %v7536_v49 }
 0x3ba   :  { %v2424_v19 = vpop.f32.mrf.mxu0  ;;  %3045 = vmatprep.mubr.bf16.mxu1 %v7275_v51  ;;  %3238 = vmatprep.mubr.bf16.mxu0 %v7275_v51 }
 0x3bb   :  { %v2425_v20 = vadd.f32 %v7536_v49, %v2424_v19  ;;  %v2467_v60 = vmax.f32 %v2433_v44, 0.0  ;;  %v2550_v49 = vlaneseq }
 0x3bd   :  { %v2465_v8 = vmax.f32 %v2425_v20, 0.0  ;;  %v7660_v9 = vpack.c.bf16 %v2467_v60, %v2466_v33 }
 0x3bf   :  { %v7653_v3 = vpack.c.bf16 %v2465_v8, %v2464_v2 }
 0x3c1   :  { %3046 = vmatmul.mubr.bf16.gmra.mxu1 %v7653_v3  ;;  %3239 = vmatmul.mubr.bf16.gmra.mxu0 %v7653_v3 }
 0x3c2   :  { %3055 = vmatprep.mubr.bf16.mxu1 %v7275_v51  ;;  %3248 = vmatprep.mubr.bf16.mxu0 %v7275_v51 }
 0x3c9   :  { %3056 = vmatmul.mubr.bf16.gmra.mxu1 %v7660_v9  ;;  %3249 = vmatmul.mubr.bf16.gmra.mxu0 %v7660_v9 }
 0x3ca   :  { %5859 = vmatprep.mubr.bf16.mxu0 %v7541_v27  ;;  %3291 = vmatprep.mubr.bf16.mxu1 %v7275_v51 }
 0x3d1   :  { %3292 = vmatmul.mubr.bf16.vlgmr.msra.gmra.mxu1 %v7541_v27  ;;  %5860 = vmatmul.mubr.bf16.vlgmr.msra.gmra.mxu0 %v7548_v31  ;;  %v7694_v27 = vshrl.u32 %v2550_v49, 7 }
 0x3d2   :  { %5863 = vmatprep.mubr.bf16.mxu0 %v7557_v48  ;;  %3301 = vmatprep.mubr.bf16.mxu1 %v7275_v51 }
 0x3d9   :  { %3302 = vmatmul.mubr.bf16.gmra.mxu1 %v7548_v31  ;;  %5864 = vmatmul.mubr.bf16.gmra.mxu0 %v7564_v58  ;;  %v2552_v31 = vsub.s32 0, %v7694_v27 }
 0x3da   :  { %5867 = vmatprep.mubr.bf16.mxu0 %v7573_v11  ;;  %3311 = vmatprep.mubr.bf16.mxu1 %v7275_v51 }
 0x3e1   :  { %3312 = vmatmul.mubr.bf16.gmra.mxu1 %v7557_v48  ;;  %5868 = vmatmul.mubr.bf16.gmra.mxu0 %v7580_v30  ;;  %v2560_v48 = vsub.s32 2, %v7694_v27 }
 0x3e2   :  { %5871 = vmatprep.mubr.bf16.mxu0 %v7589_v10  ;;  %3321 = vmatprep.mubr.bf16.mxu1 %v7275_v51 }
 0x3e9   :  { %3322 = vmatmul.mubr.bf16.gmra.mxu1 %v7564_v58  ;;  %5872 = vmatmul.mubr.bf16.gmra.mxu0 %v7596_v23  ;;  %v2548_v58 = vld [vmem:[%s8312_s8] sm:$0xff] }
 0x3ea   :  { %5875 = vmatprep.mubr.bf16.mxu0 %v7605_v5  ;;  %3331 = vmatprep.mubr.bf16.mxu1 %v7275_v51  ;;  %v7708_v28 = vrot.slane %v2548_v58, %v2560_v48 }
 0x3f1   :  { %3332 = vmatmul.mubr.bf16.gmra.mxu1 %v7573_v11  ;;  %5876 = vmatmul.mubr.bf16.gmra.mxu0 %v7612_v46  ;;  %v2556_v11 = vsub.s32 1, %v7694_v27 }
 0x3f2   :  { %5879 = vmatprep.mubr.bf16.mxu0 %v7621_v56  ;;  %3341 = vmatprep.mubr.bf16.mxu1 %v7275_v51 }
 0x3f9   :  { %3342 = vmatmul.mubr.bf16.gmra.mxu1 %v7580_v30  ;;  %5880 = vmatmul.mubr.bf16.gmra.mxu0 %v7628_v62  ;;  %v2564_v30 = vsub.s32 3, %v7694_v27 }
 0x3fa   :  { %5883 = vmatprep.mubr.bf16.mxu0 %v7637_v15  ;;  %3351 = vmatprep.mubr.bf16.mxu1 %v7275_v51 }
 0x3fb   :  { %v7712_v14 = vrot.slane %v2548_v58, %v2564_v30 }
 0x401   :  { %3352 = vmatmul.mubr.bf16.gmra.mxu1 %v7589_v10  ;;  %5884 = vmatmul.mubr.bf16.gmra.mxu0 %v7644_v45  ;;  %v7706_v10 = vrot.slane %v2548_v58, %v2552_v31 }
 0x402   :  { %5887 = vmatprep.mubr.bf16.mxu0 %v7653_v3  ;;  %3361 = vmatprep.mubr.bf16.mxu1 %v7275_v51 }
 0x409   :  { %3362 = vmatmul.mubr.bf16.gmra.mxu1 %v7596_v23  ;;  %5888 = vmatmul.mubr.bf16.gmra.mxu0 %v7660_v9  ;;  %v7710_v23 = vrot.slane %v2548_v58, %v2556_v11 }
 0x40a   :  { %3371 = vmatprep.mubr.bf16.mxu1 %v7275_v51 }
 0x411   :  { %v2907_v24 = vpop.f32.mrf.mxu1  ;;  %v3100_v1 = vpop.f32.mrf.mxu0  ;;  %3372 = vmatmul.mubr.bf16.gmra.mxu1 %v7605_v5 }
 0x412   :  { %v2908_v34 = vadd.f32 %v2907_v24, %v7706_v10  ;;  %v3101_v35 = vadd.f32 %v3100_v1, %v7708_v28  ;;  %3381 = vmatprep.mubr.bf16.mxu1 %v7275_v51 }
 0x413   :  { %v2909_v21 = vpop.f32.mrf.mxu1  ;;  %v3102_v26 = vpop.f32.mrf.mxu0 }
 0x414   :  { %v3613_v38 = vsub.f32 0.0, %v2908_v34  ;;  %v3615_v41 = vsub.f32 0.0, %v3101_v35  ;;  %v2910_v42 = vadd.f32 %v2909_v21, %v7710_v23  ;;  %v3103_v12 = vadd.f32 %v3102_v26, %v7712_v14 }
 0x415   :  { %v2911_v50 = vpop.f32.mrf.mxu1  ;;  %v3104_v16 = vpop.f32.mrf.mxu0 }
 0x416   :  { %v3837_v39 = vmul.f32 1.442695, %v3613_v38  ;;  %v3841_v53 = vmul.f32 1.442695, %v3615_v41  ;;  %v3614_v57 = vsub.f32 0.0, %v2910_v42  ;;  %v3616_v5 = vsub.f32 0.0, %v3103_v12 }
 0x417   :  { %v2912_v22 = vadd.f32 %v2911_v50, %v7706_v10  ;;  %v3105_v29 = vadd.f32 %v3104_v16, %v7708_v28  ;;  %v2913_v52 = vpop.f32.mrf.mxu1  ;;  %v3106_v37 = vpop.f32.mrf.mxu0 }
 0x418   :  { %6219 = vpow2.f32 %v3837_v39  ;;  %v3839_v25 = vmul.f32 1.442695, %v3614_v57  ;;  %v3843_v61 = vmul.f32 1.442695, %v3616_v5  ;;  %v2914_v32 = vadd.f32 %v2913_v52, %v7710_v23 }
 0x419   :  { %6221 = vpow2.f32 %v3841_v53  ;;  %v3620_v0 = vsub.f32 0.0, %v2912_v22  ;;  %v3622_v4 = vsub.f32 0.0, %v3105_v29  ;;  %v3107_v6 = vadd.f32 %v3106_v37, %v7712_v14  ;;  %v2917_v40 = vpop.f32.mrf.mxu1  ;;  %v3110_v36 = vpop.f32.mrf.mxu0  ;;  %3382 = vmatmul.mubr.bf16.gmra.mxu1 %v7612_v46 }
 0x41a   :  { %6223 = vpow2.f32 %v3839_v25  ;;  %v3621_v63 = vsub.f32 0.0, %v2914_v32  ;;  %v2918_v43 = vadd.f32 %v2917_v40, %v7706_v10  ;;  %v3111_v7 = vadd.f32 %v3110_v36, %v7708_v28  ;;  %3391 = vmatprep.mubr.bf16.mxu1 %v7275_v51 }
 0x41b   :  { %6225 = vpow2.f32 %v3843_v61  ;;  %v3851_v13 = vmul.f32 1.442695, %v3620_v0  ;;  %v3855_v17 = vmul.f32 1.442695, %v3622_v4  ;;  %v3623_v18 = vsub.f32 0.0, %v3107_v6  ;;  %v2919_v47 = vpop.f32.mrf.mxu1  ;;  %v3112_v59 = vpop.f32.mrf.mxu0 }
 0x41c   :  { %v3853_v54 = vmul.f32 1.442695, %v3621_v63  ;;  %v3627_v19 = vsub.f32 0.0, %v2918_v43  ;;  %v3629_v20 = vsub.f32 0.0, %v3111_v7  ;;  %v2920_v2 = vadd.f32 %v2919_v47, %v7710_v23 }
 0x41d   :  { %6227 = vpow2.f32 %v3851_v13  ;;  %v3857_v46 = vmul.f32 1.442695, %v3623_v18  ;;  %v3113_v8 = vadd.f32 %v3112_v59, %v7712_v14  ;;  %v2921_v44 = vpop.f32.mrf.mxu1  ;;  %v3114_v55 = vpop.f32.mrf.mxu0 }
 0x41e   :  { %6229 = vpow2.f32 %v3855_v17  ;;  %v3865_v60 = vmul.f32 1.442695, %v3627_v19  ;;  %v3869_v33 = vmul.f32 1.442695, %v3629_v20  ;;  %v3628_v49 = vsub.f32 0.0, %v2920_v2 }
 0x41f   :  { %6231 = vpow2.f32 %v3853_v54  ;;  %v3630_v31 = vsub.f32 0.0, %v3113_v8  ;;  %v2922_v48 = vadd.f32 %v2921_v44, %v7706_v10  ;;  %v3115_v58 = vadd.f32 %v3114_v55, %v7708_v28  ;;  %v2923_v11 = vpop.f32.mrf.mxu1  ;;  %v3116_v30 = vpop.f32.mrf.mxu0 }
 0x420   :  { %6233 = vpow2.f32 %v3857_v46  ;;  %v3867_v24 = vmul.f32 1.442695, %v3628_v49  ;;  %v2924_v1 = vadd.f32 %v2923_v11, %v7710_v23  ;;  %v3117_v34 = vadd.f32 %v3116_v30, %v7712_v14 }
 0x421   :  { %6235 = vpow2.f32 %v3865_v60  ;;  %v3871_v35 = vmul.f32 1.442695, %v3630_v31  ;;  %v3634_v21 = vsub.f32 0.0, %v2922_v48  ;;  %v3636_v26 = vsub.f32 0.0, %v3115_v58  ;;  %v2927_v38 = vpop.f32.mrf.mxu1  ;;  %v3120_v41 = vpop.f32.mrf.mxu0  ;;  %3392 = vmatmul.mubr.bf16.gmra.mxu1 %v7621_v56 }
 0x422   :  { %6237 = vpow2.f32 %v3869_v33  ;;  %v3635_v42 = vsub.f32 0.0, %v2924_v1  ;;  %3401 = vmatprep.mubr.bf16.mxu1 %v7275_v51  ;;  %v3637_v57 = vsub.f32 0.0, %v3117_v34  ;;  %v2928_v40 = vadd.f32 %v2927_v38, %v7706_v10 }
 0x423   :  { %6239 = vpow2.f32 %v3867_v24  ;;  %v3879_v12 = vmul.f32 1.442695, %v3634_v21  ;;  %v3883_v50 = vmul.f32 1.442695, %v3636_v26  ;;  %v2929_v16 = vpop.f32.mrf.mxu1  ;;  %v3122_v39 = vpop.f32.mrf.mxu0  ;;  %v3121_v43 = vadd.f32 %v3120_v41, %v7708_v28 }
 0x424   :  { %6241 = vpow2.f32 %v3871_v35  ;;  %v3881_v53 = vmul.f32 1.442695, %v3635_v42  ;;  %v3885_v4 = vmul.f32 1.442695, %v3637_v57  ;;  %v3641_v20 = vsub.f32 0.0, %v2928_v40 }
 0x425   :  { %v6220_v5 = vpop.eup %6219  ;;  %6243 = vpow2.f32 %v3879_v12  ;;  %v2931_v22 = vpop.f32.mrf.mxu1  ;;  %v3643_v8 = vsub.f32 0.0, %v3121_v43  ;;  %v2930_v44 = vadd.f32 %v2929_v16, %v7710_v23  ;;  %v3123_v33 = vadd.f32 %v3122_v39, %v7712_v14 }
 0x426   :  { %v6222_v29 = vpop.eup %6221  ;;  %v4285_v52 = vadd.f32 1.0, %v6220_v5  ;;  %6245 = vpow2.f32 %v3883_v50  ;;  %v3124_v25 = vpop.f32.mrf.mxu0  ;;  %v2932_v11 = vadd.f32 %v2931_v22, %v7706_v10  ;;  %v3893_v1 = vmul.f32 1.442695, %v3641_v20 }
 0x427   :  { %v6224_v37 = vpop.eup %6223  ;;  %v4287_v56 = vadd.f32 1.0, %v6222_v29  ;;  %6247 = vpow2.f32 %v3881_v53  ;;  %v2933_v61 = vpop.f32.mrf.mxu1  ;;  %v3125_v34 = vadd.f32 %v3124_v25, %v7708_v28  ;;  %v3897_v38 = vmul.f32 1.442695, %v3643_v8 }
 0x428   :  { %v6226_v32 = vpop.eup %6225  ;;  %6249 = vrcp.f32 %v4285_v52  ;;  %v4286_v0 = vadd.f32 1.0, %v6224_v37  ;;  %v3126_v17 = vpop.f32.mrf.mxu0  ;;  %v3642_v41 = vsub.f32 0.0, %v2930_v44  ;;  %v3644_v50 = vsub.f32 0.0, %v3123_v33 }
 0x429   :  { %6251 = vrcp.f32 %v4287_v56  ;;  %v4288_v6 = vadd.f32 1.0, %v6226_v32  ;;  %v7737_v36 = vpop.f32.mrf.mxu1  ;;  %3402 = vmatmul.mubr.bf16.gmra.mxu1 %v7628_v62  ;;  %v2934_v16 = vadd.f32 %v2933_v61, %v7710_v23  ;;  %v3127_v22 = vadd.f32 %v3126_v17, %v7712_v14 }
 0x42a   :  { %v6228_v63 = vpop.eup %6227  ;;  %6253 = vrcp.f32 %v4286_v0  ;;  %3411 = vmatprep.mubr.bf16.mxu1 %v7275_v51  ;;  %v3130_v49 = vpop.f32.mrf.mxu0  ;;  %v3650_v37 = vsub.f32 0.0, %v3125_v34  ;;  %v2938_v56 = vadd.f32 %v7737_v36, %v7706_v10  ;;  %v3895_v61 = vmul.f32 1.442695, %v3642_v41 }
 0x42b   :  { %v6230_v7 = vpop.eup %6229  ;;  %6255 = vrcp.f32 %v4288_v6  ;;  %v4292_v13 = vadd.f32 1.0, %v6228_v63  ;;  %v7742_v18 = vpop.f32.mrf.mxu1  ;;  %v3131_v0 = vadd.f32 %v3130_v49, %v7708_v28  ;;  %v3899_v6 = vmul.f32 1.442695, %v3644_v50 }
 0x42c   :  { %v6232_v47 = vpop.eup %6231  ;;  %v4294_v59 = vadd.f32 1.0, %v6230_v7  ;;  %6257 = vpow2.f32 %v3885_v4  ;;  %v3132_v39 = vpop.f32.mrf.mxu0  ;;  %v3649_v40 = vsub.f32 0.0, %v2934_v16  ;;  %v2940_v63 = vadd.f32 %v7742_v18, %v7710_v23 }
 0x42d   :  { %v6234_v54 = vpop.eup %6233  ;;  %6259 = vrcp.f32 %v4292_v13  ;;  %v4293_v19 = vadd.f32 1.0, %v6232_v47  ;;  %v7744_v62 = vpop.f32.mrf.mxu1  ;;  %v3651_v17 = vsub.f32 0.0, %v3127_v22  ;;  %v3133_v47 = vadd.f32 %v3132_v39, %v7712_v14 }
 0x42e   :  { %v6236_v2 = vpop.eup %6235  ;;  %6261 = vrcp.f32 %v4294_v59  ;;  %v4295_v46 = vadd.f32 1.0, %v6234_v54  ;;  %v3134_v43 = vpop.f32.mrf.mxu0  ;;  %v3911_v54 = vmul.f32 1.442695, %v3650_v37  ;;  %v2942_v20 = vadd.f32 %v7744_v62, %v7706_v10 }
 0x42f   :  { %v6238_v55 = vpop.eup %6237  ;;  %6263 = vrcp.f32 %v4293_v19  ;;  %v4299_v60 = vadd.f32 1.0, %v6236_v2  ;;  %v7748_v31 = vpop.f32.mrf.mxu1  ;;  %v3655_v19 = vsub.f32 0.0, %v2938_v56  ;;  %v3657_v8 = vsub.f32 0.0, %v3131_v0 }
 0x430   :  { %v6240_v48 = vpop.eup %6239  ;;  %6265 = vrcp.f32 %v4295_v46  ;;  %v4301_v58 = vadd.f32 1.0, %v6238_v55  ;;  %v3135_v44 = vadd.f32 %v3134_v43, %v7708_v28  ;;  %v3656_v33 = vsub.f32 0.0, %v2940_v63  ;;  %v3136_v49 = vpop.f32.mrf.mxu0 }
 0x431   :  { %v6242_v30 = vpop.eup %6241  ;;  %6267 = vrcp.f32 %v4299_v60  ;;  %v4300_v24 = vadd.f32 1.0, %v6240_v48  ;;  %v7752_v35 = vpop.f32.mrf.mxu1  ;;  %3412 = vmatmul.mubr.bf16.gmra.mxu1 %v7637_v15  ;;  %v3648_v15 = vsub.f32 0.0, %v2932_v11  ;;  %v3909_v60 = vmul.f32 1.442695, %v3649_v40 }
 0x432   :  { %v6244_v21 = vpop.eup %6243  ;;  %6269 = vrcp.f32 %v4301_v58  ;;  %v4302_v26 = vadd.f32 1.0, %v6242_v30  ;;  %3421 = vmatprep.mubr.bf16.mxu1 %v7275_v51  ;;  %v2944_v62 = vadd.f32 %v7748_v31, %v7710_v23  ;;  %v3913_v58 = vmul.f32 1.442695, %v3651_v17 }
 0x433   :  { %v6246_v42 = vpop.eup %6245  ;;  %6271 = vrcp.f32 %v4300_v24  ;;  %v4306_v12 = vadd.f32 1.0, %v6244_v21  ;;  %v7757_v53 = vpop.f32.mrf.mxu1  ;;  %v3907_v13 = vmul.f32 1.442695, %v3648_v15  ;;  %v3658_v11 = vsub.f32 0.0, %v3133_v47 }
 0x434   :  { %v6248_v57 = vpop.eup %6247  ;;  %6273 = vrcp.f32 %v4302_v26  ;;  %v4308_v5 = vadd.f32 1.0, %v6246_v42  ;;  %v3921_v24 = vmul.f32 1.442695, %v3655_v19  ;;  %v3925_v26 = vmul.f32 1.442695, %v3657_v8 }
 0x435   :  { %v6250_v29 = vpop.eup %6249  ;;  %6275 = vrcp.f32 %v4306_v12  ;;  %v4307_v52 = vadd.f32 1.0, %v6248_v57  ;;  %v7762_v25 = vpop.f32.mrf.mxu1  ;;  %v3664_v31 = vsub.f32 0.0, %v3135_v44  ;;  %v3923_v41 = vmul.f32 1.442695, %v3656_v33 }
 0x436   :  { %v6252_v32 = vpop.eup %6251  ;;  %4733 = vst [vmem:[#allocation11] sm:$0xff] %v6250_v29  ;;  %6277 = vrcp.f32 %v4308_v5  ;;  %v3663_v42 = vsub.f32 0.0, %v2944_v62  ;;  %v3140_v12 = vpop.f32.mrf.mxu0  ;;  %v3927_v39 = vmul.f32 1.442695, %v3658_v11  ;;  %v3137_v57 = vadd.f32 %v3136_v49, %v7712_v14 }
 0x437   :  { %v6254_v4 = vpop.eup %6253  ;;  %4735 = vst [vmem:[#allocation11 + $0x10] sm:$0xff] %v6252_v32  ;;  %6279 = vrcp.f32 %v4307_v52  ;;  %v7767_v7 = vpop.f32.mrf.mxu1  ;;  %v3939_v52 = vmul.f32 1.442695, %v3664_v31  ;;  %v3141_v8 = vadd.f32 %v3140_v12, %v7708_v28 }
 0x438   :  { %v6256_v36 = vpop.eup %6255  ;;  %4734 = vst [vmem:[#allocation11 + $0x8] sm:$0xff] %v6254_v4  ;;  %6281 = vpow2.f32 %v3893_v1  ;;  %v3662_v1 = vsub.f32 0.0, %v2942_v20  ;;  %v3937_v56 = vmul.f32 1.442695, %v3663_v42  ;;  %v3142_v32 = vpop.f32.mrf.mxu0  ;;  %v3665_v4 = vsub.f32 0.0, %v3137_v57 }
 0x439   :  { %v6258_v59 = vpop.eup %6257  ;;  %4736 = vst [vmem:[#allocation11 + $0x18] sm:$0xff] %v6256_v36  ;;  %6283 = vpow2.f32 %v3897_v38  ;;  %v7772_v2 = vpop.f32.mrf.mxu1  ;;  %3422 = vmatmul.mubr.bf16.gmra.mxu1 %v7644_v45  ;;  %v2948_v20 = vadd.f32 %v7752_v35, %v7706_v10  ;;  %v3143_v31 = vadd.f32 %v3142_v32, %v7712_v14 }
 0x43a   :  { %v6260_v18 = vpop.eup %6259  ;;  %v4309_v46 = vadd.f32 1.0, %v6258_v59  ;;  %6285 = vpow2.f32 %v3895_v61  ;;  %3431 = vmatprep.mubr.bf16.mxu1 %v7275_v51  ;;  %v3935_v15 = vmul.f32 1.442695, %v3662_v1  ;;  %v3144_v36 = vpop.f32.mrf.mxu0  ;;  %v3941_v59 = vmul.f32 1.442695, %v3665_v4 }
 0x43b   :  { %v6262_v55 = vpop.eup %6261  ;;  %4740 = vst [vmem:[#allocation11 + $0x38] sm:$0xff] %v6260_v18  ;;  %6287 = vpow2.f32 %v3899_v6  ;;  %v7779_v48 = vpop.f32.mrf.mxu1  ;;  %v2950_v1 = vadd.f32 %v7757_v53, %v7710_v23  ;;  %v3145_v53 = vadd.f32 %v3144_v36, %v7708_v28  ;;  %v3672_v4 = vsub.f32 0.0, %v3143_v31 }
 0x43c   :  { %v6264_v45 = vpop.eup %6263  ;;  %4742 = vst [vmem:[#allocation11 + $0x48] sm:$0xff] %v6262_v55  ;;  %6289 = vrcp.f32 %v4309_v46 }
 0x43d   :  { %v6266_v30 = vpop.eup %6265  ;;  %4741 = vst [vmem:[#allocation11 + $0x40] sm:$0xff] %v6264_v45  ;;  %6291 = vpow2.f32 %v3907_v13  ;;  %v7781_v34 = vpop.f32.mrf.mxu1 }
 0x43e   :  { %v6268_v21 = vpop.eup %6267  ;;  %4743 = vst [vmem:[#allocation11 + $0x50] sm:$0xff] %v6266_v30  ;;  %6293 = vpow2.f32 %v3911_v54 }
 0x43f   :  { %v6270_v38 = vpop.eup %6269  ;;  %4747 = vst [vmem:[#allocation11 + $0x70] sm:$0xff] %v6268_v21  ;;  %6295 = vpow2.f32 %v3909_v60  ;;  %v7783_v50 = vpop.f32.mrf.mxu1 }
 0x440   :  { %v6272_v16 = vpop.eup %6271  ;;  %4749 = vst [vmem:[#allocation11 + $0x80] sm:$0xff] %v6270_v38  ;;  %6297 = vpow2.f32 %v3913_v58  ;;  %v3146_v60 = vpop.f32.mrf.mxu0  ;;  %v3669_v58 = vsub.f32 0.0, %v2948_v20 }
 0x441   :  { %v6274_v5 = vpop.eup %6273  ;;  %4748 = vst [vmem:[#allocation11 + $0x78] sm:$0xff] %v6272_v16  ;;  %6299 = vpow2.f32 %v3921_v24  ;;  %v7786_v22 = vpop.f32.mrf.mxu1  ;;  %3432 = vmatmul.mubr.bf16.gmra.mxu1 %v7653_v3  ;;  %v3671_v24 = vsub.f32 0.0, %v3141_v8  ;;  %v2952_v16 = vadd.f32 %v7762_v25, %v7706_v10  ;;  %v2954_v25 = vadd.f32 %v7767_v7, %v7710_v23 }
 0x442   :  { %v6276_v29 = vpop.eup %6275  ;;  %4750 = vst [vmem:[#allocation11 + $0x88] sm:$0xff] %v6274_v5  ;;  %6301 = vpow2.f32 %v3925_v26  ;;  %3441 = vmatprep.mubr.bf16.mxu1 %v7275_v51  ;;  %v3150_v38 = vpop.f32.mrf.mxu0  ;;  %v3949_v5 = vmul.f32 1.442695, %v3669_v58  ;;  %v3147_v36 = vadd.f32 %v3146_v60, %v7712_v14  ;;  %v2960_v60 = vadd.f32 %v7779_v48, %v7710_v23 }
 0x443   :  { %v6278_v37 = vpop.eup %6277  ;;  %4754 = vst [vmem:[#allocation11 + $0xa8] sm:$0xff] %v6276_v29  ;;  %6303 = vpow2.f32 %v3923_v41  ;;  %v7790_v61 = vpop.f32.mrf.mxu1 }
 0x444   :  { %v6280_v0 = vpop.eup %6279  ;;  %4756 = vst [vmem:[#allocation11 + $0xb8] sm:$0xff] %v6278_v37  ;;  %6305 = vpow2.f32 %v3927_v39  ;;  %v3953_v37 = vmul.f32 1.442695, %v3671_v24 }
 0x445   :  { %v6282_v6 = vpop.eup %6281  ;;  %4755 = vst [vmem:[#allocation11 + $0xb0] sm:$0xff] %v6280_v0  ;;  %6307 = vpow2.f32 %v3935_v15  ;;  %v7792_v3 = vpop.f32.mrf.mxu1 }
 0x446   :  { %v6284_v40 = vpop.eup %6283  ;;  %v4313_v63 = vadd.f32 1.0, %v6282_v6  ;;  %6309 = vpow2.f32 %v3939_v52  ;;  %v3152_v6 = vpop.f32.mrf.mxu0 }
 0x447   :  { %v6286_v51 = vpop.eup %6285  ;;  %v4315_v43 = vadd.f32 1.0, %v6284_v40  ;;  %6311 = vpow2.f32 %v3937_v56  ;;  %v7794_v13 = vpop.f32.mrf.mxu1  ;;  %v3670_v56 = vsub.f32 0.0, %v2950_v1  ;;  %v3153_v58 = vadd.f32 %v3152_v6, %v7712_v14 }
 0x448   :  { %v6288_v17 = vpop.eup %6287  ;;  %6313 = vrcp.f32 %v4313_v63  ;;  %v4314_v47 = vadd.f32 1.0, %v6286_v51  ;;  %v2962_v1 = vadd.f32 %v7781_v34, %v7706_v10 }
 0x449   :  { %v6290_v54 = vpop.eup %6289  ;;  %6315 = vrcp.f32 %v4315_v43  ;;  %v4316_v19 = vadd.f32 1.0, %v6288_v17  ;;  %v7798_v18 = vpop.f32.mrf.mxu1  ;;  %3442 = vmatmul.mubr.bf16.gmra.mxu1 %v7660_v9  ;;  %v3676_v43 = vsub.f32 0.0, %v2952_v16  ;;  %v3951_v7 = vmul.f32 1.442695, %v3670_v56 }
 0x44a   :  { %v6292_v46 = vpop.eup %6291  ;;  %4757 = vst [vmem:[#allocation11 + $0xc0] sm:$0xff] %v6290_v54  ;;  %6317 = vrcp.f32 %v4314_v47  ;;  %v2958_v54 = vadd.f32 %v7772_v2, %v7706_v10  ;;  %v3684_v16 = vsub.f32 0.0, %v2960_v60  ;;  %v3690_v56 = vsub.f32 0.0, %v2962_v1 }
 0x44b   :  { %v6294_v44 = vpop.eup %6293  ;;  %6319 = vrcp.f32 %v4316_v19  ;;  %v4320_v55 = vadd.f32 1.0, %v6292_v46  ;;  %v7802_v33 = vpop.f32.mrf.mxu1  ;;  %v3151_v46 = vadd.f32 %v3150_v38, %v7708_v28 }
 0x44c   :  { %v6296_v62 = vpop.eup %6295  ;;  %v4322_v49 = vadd.f32 1.0, %v6294_v44  ;;  %6321 = vpow2.f32 %v3941_v59  ;;  %v3678_v59 = vsub.f32 0.0, %v3145_v53  ;;  %v3955_v44 = vmul.f32 1.442695, %v3672_v4 }
 0x44d   :  { %v6298_v45 = vpop.eup %6297  ;;  %6323 = vrcp.f32 %v4320_v55  ;;  %v4321_v35 = vadd.f32 1.0, %v6296_v62  ;;  %v7804_v11 = vpop.f32.mrf.mxu1  ;;  %v3677_v55 = vsub.f32 0.0, %v2954_v25  ;;  %v3683_v24 = vsub.f32 0.0, %v2958_v54 }
 0x44e   :  { %v6300_v9 = vpop.eup %6299  ;;  %6325 = vrcp.f32 %v4322_v49  ;;  %v4323_v30 = vadd.f32 1.0, %v6298_v45  ;;  %v3154_v62 = vpop.f32.mrf.mxu0  ;;  %v3963_v45 = vmul.f32 1.442695, %v3676_v43  ;;  %v3685_v31 = vsub.f32 0.0, %v3151_v46 }
 0x44f   :  { %v6302_v21 = vpop.eup %6301  ;;  %6327 = vrcp.f32 %v4321_v35  ;;  %v4327_v26 = vadd.f32 1.0, %v6300_v9  ;;  %v7809_v41 = vpop.f32.mrf.mxu1  ;;  %v3679_v35 = vsub.f32 0.0, %v3147_v36  ;;  %v3155_v38 = vadd.f32 %v3154_v62, %v7708_v28 }
 0x450   :  { %v6304_v42 = vpop.eup %6303  ;;  %6329 = vrcp.f32 %v4323_v30  ;;  %v4329_v12 = vadd.f32 1.0, %v6302_v21  ;;  %v3967_v30 = vmul.f32 1.442695, %v3678_v59  ;;  %v3981_v4 = vmul.f32 1.442695, %v3685_v31 }
 0x451   :  { %v6306_v39 = vpop.eup %6305  ;;  %6331 = vrcp.f32 %v4327_v26  ;;  %v4328_v57 = vadd.f32 1.0, %v6304_v42  ;;  %v7814_v15 = vpop.f32.mrf.mxu1  ;;  %v3969_v53 = vmul.f32 1.442695, %v3679_v35  ;;  %v3979_v6 = vmul.f32 1.442695, %v3684_v16 }
 0x452   :  { %v6308_v29 = vpop.eup %6307  ;;  %6333 = vrcp.f32 %v4329_v12  ;;  %v4330_v52 = vadd.f32 1.0, %v6306_v39  ;;  %v3965_v12 = vmul.f32 1.442695, %v3677_v55  ;;  %v2964_v39 = vadd.f32 %v7783_v50, %v7710_v23 }
 0x453   :  { %v6310_v32 = vpop.eup %6309  ;;  %6335 = vrcp.f32 %v4328_v57  ;;  %v4334_v0 = vadd.f32 1.0, %v6308_v29  ;;  %v7818_v40 = vpop.f32.mrf.mxu1  ;;  %v3686_v29 = vsub.f32 0.0, %v3153_v58  ;;  %v3692_v50 = vsub.f32 0.0, %v3155_v38 }
 0x454   :  { %v6312_v63 = vpop.eup %6311  ;;  %6337 = vrcp.f32 %v4330_v52  ;;  %v4336_v51 = vadd.f32 1.0, %v6310_v32  ;;  %v3156_v57 = vpop.f32.mrf.mxu0  ;;  %v3991_v54 = vmul.f32 1.442695, %v3690_v56  ;;  %v2968_v16 = vadd.f32 %v7786_v22, %v7706_v10 }
 0x455   :  { %v6314_v17 = vpop.eup %6313  ;;  %6339 = vrcp.f32 %v4334_v0  ;;  %v4335_v47 = vadd.f32 1.0, %v6312_v63  ;;  %v7823_v19 = vpop.f32.mrf.mxu1  ;;  %v3691_v63 = vsub.f32 0.0, %v2964_v39  ;;  %v3995_v46 = vmul.f32 1.442695, %v3692_v50 }
 0x456   :  { %v6316_v20 = vpop.eup %6315  ;;  %4761 = vst [vmem:[#allocation11 + $0xe0] sm:$0xff] %v6314_v17  ;;  %6341 = vrcp.f32 %v4336_v51  ;;  %v3160_v51 = vpop.f32.mrf.mxu0  ;;  %v3983_v17 = vmul.f32 1.442695, %v3686_v29 }
 0x457   :  { %v6318_v8 = vpop.eup %6317  ;;  %4763 = vst [vmem:[#allocation11 + $0xf0] sm:$0xff] %v6316_v20  ;;  %6343 = vrcp.f32 %v4335_v47  ;;  %v7828_v49 = vpop.f32.mrf.mxu1  ;;  %v3157_v47 = vadd.f32 %v3156_v57, %v7712_v14  ;;  %v3161_v39 = vadd.f32 %v3160_v51, %v7708_v28 }
 0x458   :  { %v6320_v2 = vpop.eup %6319  ;;  %4762 = vst [vmem:[#allocation11 + $0xe8] sm:$0xff] %v6318_v8  ;;  %6345 = vpow2.f32 %v3949_v5  ;;  %v3162_v55 = vpop.f32.mrf.mxu0 }
 0x459   :  { %v6322_v9 = vpop.eup %6321  ;;  %4764 = vst [vmem:[#allocation11 + $0xf8] sm:$0xff] %v6320_v2  ;;  %6347 = vpow2.f32 %v3953_v37  ;;  %v7833_v21 = vpop.f32.mrf.mxu1  ;;  %v3977_v37 = vmul.f32 1.442695, %v3683_v24  ;;  %v3693_v62 = vsub.f32 0.0, %v3157_v47 }
 0x45a   :  { %v6324_v48 = vpop.eup %6323  ;;  %v4337_v26 = vadd.f32 1.0, %v6322_v9  ;;  %6349 = vpow2.f32 %v3951_v7  ;;  %v3164_v24 = vpop.f32.mrf.mxu0 }
 0x45b   :  { %v6326_v42 = vpop.eup %6325  ;;  %4768 = vst [vmem:[#allocation11 + $0x118] sm:$0xff] %v6324_v48  ;;  %6351 = vpow2.f32 %v3955_v44  ;;  %v7838_v5 = vpop.f32.mrf.mxu1  ;;  %v3993_v44 = vmul.f32 1.442695, %v3691_v63 }
 0x45c   :  { %v6328_v34 = vpop.eup %6327  ;;  %4770 = vst [vmem:[#allocation11 + $0x128] sm:$0xff] %v6326_v42  ;;  %6353 = vrcp.f32 %v4337_v26  ;;  %v3997_v26 = vmul.f32 1.442695, %v3693_v62 }
 0x45d   :  { %v6330_v52 = vpop.eup %6329  ;;  %4769 = vst [vmem:[#allocation11 + $0x120] sm:$0xff] %v6328_v34  ;;  %6355 = vpow2.f32 %v3963_v45  ;;  %v7840_v32 = vpop.f32.mrf.mxu1 }
 0x45e   :  { %v6332_v0 = vpop.eup %6331  ;;  %4771 = vst [vmem:[#allocation11 + $0x130] sm:$0xff] %v6330_v52  ;;  %6357 = vpow2.f32 %v3967_v30 }
 0x45f   :  { %v6334_v25 = vpop.eup %6333  ;;  %4775 = vst [vmem:[#allocation11 + $0x150] sm:$0xff] %v6332_v0  ;;  %6359 = vpow2.f32 %v3965_v12  ;;  %v7842_v43 = vpop.f32.mrf.mxu1 }
 0x460   :  { %v6336_v36 = vpop.eup %6335  ;;  %4777 = vst [vmem:[#allocation11 + $0x160] sm:$0xff] %v6334_v25  ;;  %6361 = vpow2.f32 %v3969_v53  ;;  %v3166_v53 = vpop.f32.mrf.mxu0  ;;  %v3697_v25 = vsub.f32 0.0, %v2968_v16 }
 0x461   :  { %v6338_v59 = vpop.eup %6337  ;;  %4776 = vst [vmem:[#allocation11 + $0x158] sm:$0xff] %v6336_v36  ;;  %6363 = vpow2.f32 %v3977_v37  ;;  %v7845_v20 = vpop.f32.mrf.mxu1  ;;  %v3163_v36 = vadd.f32 %v3162_v55, %v7712_v14 }
 0x462   :  { %v6340_v7 = vpop.eup %6339  ;;  %4778 = vst [vmem:[#allocation11 + $0x168] sm:$0xff] %v6338_v59  ;;  %6365 = vpow2.f32 %v3981_v4  ;;  %v2970_v4 = vadd.f32 %v7790_v61, %v7710_v23 }
 0x463   :  { %v6342_v8 = vpop.eup %6341  ;;  %4782 = vst [vmem:[#allocation11 + $0x188] sm:$0xff] %v6340_v7  ;;  %6367 = vpow2.f32 %v3979_v6  ;;  %v7847_v2 = vpop.f32.mrf.mxu1  ;;  %v3699_v6 = vsub.f32 0.0, %v3161_v39  ;;  %v2978_v39 = vadd.f32 %v7798_v18, %v7706_v10 }
 0x464   :  { %v6344_v60 = vpop.eup %6343  ;;  %4784 = vst [vmem:[#allocation11 + $0x198] sm:$0xff] %v6342_v8  ;;  %6369 = vpow2.f32 %v3983_v17  ;;  %v3170_v17 = vpop.f32.mrf.mxu0  ;;  %v3698_v8 = vsub.f32 0.0, %v2970_v4 }
 0x465   :  { %v6346_v45 = vpop.eup %6345  ;;  %4783 = vst [vmem:[#allocation11 + $0x190] sm:$0xff] %v6344_v60  ;;  %6371 = vpow2.f32 %v3991_v54  ;;  %v7849_v31 = vpop.f32.mrf.mxu1  ;;  %v2972_v54 = vadd.f32 %v7792_v3, %v7706_v10  ;;  %v4009_v55 = vmul.f32 1.442695, %v3699_v6  ;;  %v2974_v3 = vadd.f32 %v7794_v13, %v7710_v23 }
 0x466   :  { %v6348_v35 = vpop.eup %6347  ;;  %v4341_v58 = vadd.f32 1.0, %v6346_v45  ;;  %6373 = vpow2.f32 %v3995_v46  ;;  %v4005_v45 = vmul.f32 1.442695, %v3697_v25  ;;  %v4007_v13 = vmul.f32 1.442695, %v3698_v8 }
 0x467   :  { %v6350_v9 = vpop.eup %6349  ;;  %v4343_v30 = vadd.f32 1.0, %v6348_v35  ;;  %6375 = vpow2.f32 %v3993_v44  ;;  %v7854_v37 = vpop.f32.mrf.mxu1  ;;  %v3165_v44 = vadd.f32 %v3164_v24, %v7708_v28  ;;  %v2984_v8 = vadd.f32 %v7809_v41, %v7710_v23 }
 0x468   :  { %v6352_v1 = vpop.eup %6351  ;;  %6377 = vrcp.f32 %v4341_v58  ;;  %v4342_v48 = vadd.f32 1.0, %v6350_v9  ;;  %v3700_v9 = vsub.f32 0.0, %v3163_v36  ;;  %v2982_v36 = vadd.f32 %v7804_v11, %v7706_v10 }
 0x469   :  { %v6354_v38 = vpop.eup %6353  ;;  %6379 = vrcp.f32 %v4343_v30  ;;  %v4344_v42 = vadd.f32 1.0, %v6352_v1  ;;  %v7861_v7 = vpop.f32.mrf.mxu1  ;;  %v3706_v16 = vsub.f32 0.0, %v3165_v44 }
 0x46a   :  { %v6356_v12 = vpop.eup %6355  ;;  %4785 = vst [vmem:[#allocation11 + $0x1a0] sm:$0xff] %v6354_v38  ;;  %6381 = vrcp.f32 %v4342_v48  ;;  %v3172_v30 = vpop.f32.mrf.mxu0  ;;  %v3167_v38 = vadd.f32 %v3166_v53, %v7712_v14  ;;  %v3705_v53 = vsub.f32 0.0, %v2974_v3 }
 0x46b   :  { %v6358_v57 = vpop.eup %6357  ;;  %6383 = vrcp.f32 %v4344_v42  ;;  %v4348_v34 = vadd.f32 1.0, %v6356_v12  ;;  %v7867_v24 = vpop.f32.mrf.mxu1 }
 0x46c   :  { %v6360_v29 = vpop.eup %6359  ;;  %v4350_v52 = vadd.f32 1.0, %v6358_v57  ;;  %6385 = vpow2.f32 %v3997_v26  ;;  %v3704_v26 = vsub.f32 0.0, %v2972_v54  ;;  %v3707_v18 = vsub.f32 0.0, %v3167_v38 }
 0x46d   :  { %v6362_v56 = vpop.eup %6361  ;;  %6387 = vrcp.f32 %v4348_v34  ;;  %v4349_v0 = vadd.f32 1.0, %v6360_v29  ;;  %v3171_v34 = vadd.f32 %v3170_v17, %v7708_v28  ;;  %v7875_v25 = vpop.f32.mrf.mxu1 }
 0x46e   :  { %v6364_v50 = vpop.eup %6363  ;;  %6389 = vrcp.f32 %v4350_v52  ;;  %v4351_v22 = vadd.f32 1.0, %v6362_v56  ;;  %v4011_v52 = vmul.f32 1.442695, %v3700_v9  ;;  %v2980_v56 = vadd.f32 %v7802_v33, %v7710_v23 }
 0x46f   :  { %v6366_v63 = vpop.eup %6365  ;;  %6391 = vrcp.f32 %v4349_v0  ;;  %v4355_v51 = vadd.f32 1.0, %v6364_v50  ;;  %v3174_v0 = vpop.f32.mrf.mxu0  ;;  %v4019_v50 = vmul.f32 1.442695, %v3704_v26 }
 0x470   :  { %v6368_v47 = vpop.eup %6367  ;;  %6393 = vrcp.f32 %v4351_v22  ;;  %v4357_v59 = vadd.f32 1.0, %v6366_v63  ;;  %v3173_v22 = vadd.f32 %v3172_v30, %v7712_v14  ;;  %v4023_v63 = vmul.f32 1.442695, %v3706_v16 }
 0x471   :  { %v6370_v61 = vpop.eup %6369  ;;  %6395 = vrcp.f32 %v4355_v51  ;;  %v4356_v46 = vadd.f32 1.0, %v6368_v47  ;;  %v3711_v51 = vsub.f32 0.0, %v2978_v39  ;;  %v3713_v47 = vsub.f32 0.0, %v3171_v34  ;;  %v3176_v44 = vpop.f32.mrf.mxu0 }
 0x472   :  { %v6372_v60 = vpop.eup %6371  ;;  %6397 = vrcp.f32 %v4357_v59  ;;  %v4358_v62 = vadd.f32 1.0, %v6370_v61  ;;  %v3175_v59 = vadd.f32 %v3174_v0, %v7708_v28  ;;  %v4021_v61 = vmul.f32 1.442695, %v3705_v53 }
 0x473   :  { %v6374_v35 = vpop.eup %6373  ;;  %6399 = vrcp.f32 %v4356_v46  ;;  %v4362_v58 = vadd.f32 1.0, %v6372_v60  ;;  %v3712_v46 = vsub.f32 0.0, %v2980_v56  ;;  %v3714_v11 = vsub.f32 0.0, %v3173_v22  ;;  %v3180_v26 = vpop.f32.mrf.mxu0 }
 0x474   :  { %v6376_v1 = vpop.eup %6375  ;;  %6401 = vrcp.f32 %v4358_v62  ;;  %v4364_v48 = vadd.f32 1.0, %v6374_v35  ;;  %v4025_v62 = vmul.f32 1.442695, %v3707_v18  ;;  %v4033_v35 = vmul.f32 1.442695, %v3711_v51 }
 0x475   :  { %v6378_v42 = vpop.eup %6377  ;;  %6403 = vrcp.f32 %v4362_v58  ;;  %v4363_v12 = vadd.f32 1.0, %v6376_v1  ;;  %v3718_v58 = vsub.f32 0.0, %v2982_v36  ;;  %v4037_v3 = vmul.f32 1.442695, %v3713_v47  ;;  %v3182_v53 = vpop.f32.mrf.mxu0 }
 0x476   :  { %v6380_v57 = vpop.eup %6379  ;;  %4789 = vst [vmem:[#allocation11 + $0x1c0] sm:$0xff] %v6378_v42  ;;  %6405 = vrcp.f32 %v4364_v48  ;;  %v3720_v30 = vsub.f32 0.0, %v3175_v59  ;;  %v4035_v41 = vmul.f32 1.442695, %v3712_v46  ;;  %v3719_v48 = vsub.f32 0.0, %v2984_v8 }
 0x477   :  { %v6382_v29 = vpop.eup %6381  ;;  %4791 = vst [vmem:[#allocation11 + $0x1d0] sm:$0xff] %v6380_v57  ;;  %6407 = vrcp.f32 %v4363_v12  ;;  %v4039_v42 = vmul.f32 1.442695, %v3714_v11  ;;  %v3177_v12 = vadd.f32 %v3176_v44, %v7712_v14  ;;  %v4047_v57 = vmul.f32 1.442695, %v3718_v58  ;;  %v3184_v51 = vpop.f32.mrf.mxu0 }
 0x478   :  { %v6384_v4 = vpop.eup %6383  ;;  %4790 = vst [vmem:[#allocation11 + $0x1c8] sm:$0xff] %v6382_v29  ;;  %6409 = vpow2.f32 %v4005_v45  ;;  %v7882_v45 = vpop.f32.mrf.mxu1  ;;  %v4051_v34 = vmul.f32 1.442695, %v3720_v30  ;;  %v2988_v46 = vadd.f32 %v7814_v15, %v7706_v10  ;;  %v3181_v8 = vadd.f32 %v3180_v26, %v7708_v28 }
 0x479   :  { %v6386_v6 = vpop.eup %6385  ;;  %4792 = vst [vmem:[#allocation11 + $0x1d8] sm:$0xff] %v6384_v4  ;;  %6411 = vpow2.f32 %v4009_v55  ;;  %v3721_v0 = vsub.f32 0.0, %v3177_v12 }
 0x47a   :  { %v6388_v17 = vpop.eup %6387  ;;  %v4365_v33 = vadd.f32 1.0, %v6386_v6  ;;  %6413 = vpow2.f32 %v4007_v13  ;;  %v7885_v16 = vpop.f32.mrf.mxu1 }
 0x47b   :  { %v6390_v54 = vpop.eup %6389  ;;  %4796 = vst [vmem:[#allocation11 + $0x1f8] sm:$0xff] %v6388_v17  ;;  %6415 = vpow2.f32 %v4011_v52  ;;  %v4049_v52 = vmul.f32 1.442695, %v3719_v48 }
 0x47c   :  { %v6392_v60 = vpop.eup %6391  ;;  %4798 = vst [vmem:[#allocation11 + $0x208] sm:$0xff] %v6390_v54  ;;  %6417 = vrcp.f32 %v4365_v33  ;;  %v7887_v4 = vpop.f32.mrf.mxu1  ;;  %v4053_v33 = vmul.f32 1.442695, %v3721_v0 }
 0x47d   :  { %v6394_v55 = vpop.eup %6393  ;;  %4797 = vst [vmem:[#allocation11 + $0x200] sm:$0xff] %v6392_v60  ;;  %6419 = vpow2.f32 %v4019_v50 }
 0x47e   :  { %v6396_v9 = vpop.eup %6395  ;;  %4799 = vst [vmem:[#allocation11 + $0x210] sm:$0xff] %v6394_v55  ;;  %6421 = vpow2.f32 %v4023_v63  ;;  %v7889_v47 = vpop.f32.mrf.mxu1 }
 0x47f   :  { %v6398_v1 = vpop.eup %6397  ;;  %4803 = vst [vmem:[#allocation11 + $0x230] sm:$0xff] %v6396_v9  ;;  %6423 = vpow2.f32 %v4021_v61 }
 0x480   :  { %v6400_v38 = vpop.eup %6399  ;;  %4805 = vst [vmem:[#allocation11 + $0x240] sm:$0xff] %v6398_v1  ;;  %6425 = vpow2.f32 %v4025_v62  ;;  %v3186_v62 = vpop.f32.mrf.mxu0  ;;  %v3725_v1 = vsub.f32 0.0, %v2988_v46 }
 0x481   :  { %v6402_v39 = vpop.eup %6401  ;;  %4804 = vst [vmem:[#allocation11 + $0x238] sm:$0xff] %v6400_v38  ;;  %6427 = vpow2.f32 %v4033_v35  ;;  %v2990_v35 = vadd.f32 %v7818_v40, %v7710_v23  ;;  %v7896_v58 = vpop.f32.mrf.mxu1  ;;  %v3183_v38 = vadd.f32 %v3182_v53, %v7712_v14 }
 0x482   :  { %v6404_v13 = vpop.eup %6403  ;;  %4806 = vst [vmem:[#allocation11 + $0x248] sm:$0xff] %v6402_v39  ;;  %6429 = vpow2.f32 %v4037_v3 }
 0x483   :  { %v6406_v29 = vpop.eup %6405  ;;  %4810 = vst [vmem:[#allocation11 + $0x268] sm:$0xff] %v6404_v13  ;;  %6431 = vpow2.f32 %v4035_v41  ;;  %v3727_v41 = vsub.f32 0.0, %v3181_v8  ;;  %v3726_v40 = vsub.f32 0.0, %v2990_v35 }
 0x484   :  { %v6408_v56 = vpop.eup %6407  ;;  %4812 = vst [vmem:[#allocation11 + $0x278] sm:$0xff] %v6406_v29  ;;  %6433 = vpow2.f32 %v4039_v42  ;;  %v3190_v42 = vpop.f32.mrf.mxu0  ;;  %v2992_v29 = vadd.f32 %v7823_v19, %v7706_v10  ;;  %v3187_v19 = vadd.f32 %v3186_v62, %v7712_v14 }
 0x485   :  { %v6410_v50 = vpop.eup %6409  ;;  %4811 = vst [vmem:[#allocation11 + $0x270] sm:$0xff] %v6408_v56  ;;  %6435 = vpow2.f32 %v4047_v57  ;;  %v7899_v57 = vpop.f32.mrf.mxu1  ;;  %v4065_v53 = vmul.f32 1.442695, %v3727_v41 }
 0x486   :  { %v6412_v18 = vpop.eup %6411  ;;  %v4369_v22 = vadd.f32 1.0, %v6410_v50  ;;  %6437 = vpow2.f32 %v4051_v34  ;;  %v4061_v50 = vmul.f32 1.442695, %v3725_v1  ;;  %v3732_v46 = vsub.f32 0.0, %v2992_v29 }
 0x487   :  { %v6414_v6 = vpop.eup %6413  ;;  %v4371_v63 = vadd.f32 1.0, %v6412_v18  ;;  %6439 = vpow2.f32 %v4049_v52  ;;  %v3185_v52 = vadd.f32 %v3184_v51, %v7708_v28  ;;  %v2998_v51 = vadd.f32 %v7833_v21, %v7706_v10 }
 0x488   :  { %v6416_v36 = vpop.eup %6415  ;;  %6441 = vrcp.f32 %v4369_v22  ;;  %v4370_v17 = vadd.f32 1.0, %v6414_v6  ;;  %v3728_v6 = vsub.f32 0.0, %v3183_v38  ;;  %v3000_v21 = vadd.f32 %v7838_v5, %v7710_v23 }
 0x489   :  { %v6418_v59 = vpop.eup %6417  ;;  %6443 = vrcp.f32 %v4371_v63  ;;  %v4372_v54 = vadd.f32 1.0, %v6416_v36  ;;  %v2994_v63 = vadd.f32 %v7828_v49, %v7710_v23  ;;  %v3192_v36 = vpop.f32.mrf.mxu0  ;;  %v3734_v8 = vsub.f32 0.0, %v3185_v52 }
 0x48a   :  { %v6420_v61 = vpop.eup %6419  ;;  %4813 = vst [vmem:[#allocation11 + $0x280] sm:$0xff] %v6418_v59  ;;  %6445 = vrcp.f32 %v4370_v17  ;;  %v7909_v59 = vpop.f32.mrf.mxu1  ;;  %v4063_v49 = vmul.f32 1.442695, %v3726_v40  ;;  %v4067_v62 = vmul.f32 1.442695, %v3728_v6  ;;  %v3002_v38 = vadd.f32 %v7840_v32, %v7706_v10 }
 0x48b   :  { %v6422_v44 = vpop.eup %6421  ;;  %6447 = vrcp.f32 %v4372_v54  ;;  %v4376_v60 = vadd.f32 1.0, %v6420_v61  ;;  %v3194_v35 = vpop.f32.mrf.mxu0  ;;  %v3004_v29 = vadd.f32 %v7842_v43, %v7710_v23 }
 0x48c   :  { %v6424_v11 = vpop.eup %6423  ;;  %v4378_v55 = vadd.f32 1.0, %v6422_v44  ;;  %6449 = vpow2.f32 %v4053_v33  ;;  %v7915_v1 = vpop.f32.mrf.mxu1 }
 0x48d   :  { %v6426_v9 = vpop.eup %6425  ;;  %6451 = vrcp.f32 %v4376_v60  ;;  %v4377_v3 = vadd.f32 1.0, %v6424_v11  ;;  %v3191_v60 = vadd.f32 %v3190_v42, %v7708_v28  ;;  %v3196_v52 = vpop.f32.mrf.mxu0 }
 0x48e   :  { %v6428_v30 = vpop.eup %6427  ;;  %6453 = vrcp.f32 %v4378_v55  ;;  %v4379_v15 = vadd.f32 1.0, %v6426_v9  ;;  %v3733_v55 = vsub.f32 0.0, %v2994_v63 }
 0x48f   :  { %v6430_v48 = vpop.eup %6429  ;;  %6455 = vrcp.f32 %v4377_v3  ;;  %v4383_v26 = vadd.f32 1.0, %v6428_v30  ;;  %v3735_v3 = vsub.f32 0.0, %v3187_v19  ;;  %v3739_v30 = vsub.f32 0.0, %v2998_v51  ;;  %v3200_v19 = vpop.f32.mrf.mxu0 }
 0x490   :  { %v6432_v12 = vpop.eup %6431  ;;  %6457 = vrcp.f32 %v4379_v15  ;;  %v4385_v39 = vadd.f32 1.0, %v6430_v48  ;;  %v3193_v15 = vadd.f32 %v3192_v36, %v7712_v14  ;;  %v4075_v48 = vmul.f32 1.442695, %v3732_v46 }
 0x491   :  { %v6434_v13 = vpop.eup %6433  ;;  %6459 = vrcp.f32 %v4383_v26  ;;  %v4384_v34 = vadd.f32 1.0, %v6432_v12  ;;  %v4079_v26 = vmul.f32 1.442695, %v3734_v8  ;;  %v3741_v12 = vsub.f32 0.0, %v3191_v60 }
 0x492   :  { %v6436_v56 = vpop.eup %6435  ;;  %6461 = vrcp.f32 %v4385_v39  ;;  %v4386_v0 = vadd.f32 1.0, %v6434_v13  ;;  %v3195_v39 = vadd.f32 %v3194_v35, %v7708_v28  ;;  %v4077_v13 = vmul.f32 1.442695, %v3733_v55  ;;  %v3202_v55 = vpop.f32.mrf.mxu0 }
 0x493   :  { %v6438_v18 = vpop.eup %6437  ;;  %6463 = vrcp.f32 %v4384_v34  ;;  %v4390_v22 = vadd.f32 1.0, %v6436_v56  ;;  %v3740_v34 = vsub.f32 0.0, %v3000_v21  ;;  %v3742_v32 = vsub.f32 0.0, %v3193_v15 }
 0x494   :  { %v6440_v17 = vpop.eup %6439  ;;  %6465 = vrcp.f32 %v4386_v0  ;;  %v4392_v33 = vadd.f32 1.0, %v6438_v18  ;;  %v4081_v0 = vmul.f32 1.442695, %v3735_v3  ;;  %v4089_v18 = vmul.f32 1.442695, %v3739_v30 }
 0x495   :  { %v6442_v54 = vpop.eup %6441  ;;  %6467 = vrcp.f32 %v4390_v22  ;;  %v4391_v61 = vadd.f32 1.0, %v6440_v17  ;;  %v3746_v22 = vsub.f32 0.0, %v3002_v38  ;;  %v4093_v63 = vmul.f32 1.442695, %v3741_v12 }
 0x496   :  { %v6444_v44 = vpop.eup %6443  ;;  %4817 = vst [vmem:[#allocation11 + $0x2a0] sm:$0xff] %v6442_v54  ;;  %6469 = vrcp.f32 %v4392_v33  ;;  %v3748_v36 = vsub.f32 0.0, %v3195_v39  ;;  %v4091_v43 = vmul.f32 1.442695, %v3740_v34  ;;  %v3747_v33 = vsub.f32 0.0, %v3004_v29 }
 0x497   :  { %v6446_v11 = vpop.eup %6445  ;;  %4819 = vst [vmem:[#allocation11 + $0x2b0] sm:$0xff] %v6444_v44  ;;  %6471 = vrcp.f32 %v4391_v61  ;;  %v4095_v54 = vmul.f32 1.442695, %v3742_v32  ;;  %v3197_v61 = vadd.f32 %v3196_v52, %v7712_v14  ;;  %v4103_v44 = vmul.f32 1.442695, %v3746_v22 }
 0x498   :  { %v6448_v9 = vpop.eup %6447  ;;  %4818 = vst [vmem:[#allocation11 + $0x2a8] sm:$0xff] %v6446_v11  ;;  %6473 = vpow2.f32 %v4061_v50  ;;  %v7922_v50 = vpop.f32.mrf.mxu1  ;;  %v4107_v60 = vmul.f32 1.442695, %v3748_v36  ;;  %v3201_v29 = vadd.f32 %v3200_v19, %v7708_v28 }
 0x499   :  { %v6450_v41 = vpop.eup %6449  ;;  %4820 = vst [vmem:[#allocation11 + $0x2b8] sm:$0xff] %v6448_v9  ;;  %6475 = vpow2.f32 %v4065_v53  ;;  %v3749_v35 = vsub.f32 0.0, %v3197_v61 }
 0x49a   :  { %v6452_v42 = vpop.eup %6451  ;;  %v4393_v5 = vadd.f32 1.0, %v6450_v41  ;;  %6477 = vpow2.f32 %v4063_v49  ;;  %v7925_v46 = vpop.f32.mrf.mxu1 }
 0x49b   :  { %v6454_v40 = vpop.eup %6453  ;;  %4824 = vst [vmem:[#allocation11 + $0x2d8] sm:$0xff] %v6452_v42  ;;  %6479 = vpow2.f32 %v4067_v62  ;;  %v4105_v62 = vmul.f32 1.442695, %v3747_v33 }
 0x49c   :  { %v6456_v56 = vpop.eup %6455  ;;  %4826 = vst [vmem:[#allocation11 + $0x2e8] sm:$0xff] %v6454_v40  ;;  %6481 = vrcp.f32 %v4393_v5  ;;  %v7927_v9 = vpop.f32.mrf.mxu1  ;;  %v4109_v5 = vmul.f32 1.442695, %v3749_v35 }
 0x49d   :  { %v6458_v53 = vpop.eup %6457  ;;  %4825 = vst [vmem:[#allocation11 + $0x2e0] sm:$0xff] %v6456_v56  ;;  %6483 = vpow2.f32 %v4075_v48 }
 0x49e   :  { %v6460_v6 = vpop.eup %6459  ;;  %4827 = vst [vmem:[#allocation11 + $0x2f0] sm:$0xff] %v6458_v53  ;;  %6485 = vpow2.f32 %v4079_v26  ;;  %v3204_v26 = vpop.f32.mrf.mxu0 }
 0x49f   :  { %v6462_v17 = vpop.eup %6461  ;;  %4831 = vst [vmem:[#allocation11 + $0x310] sm:$0xff] %v6460_v6  ;;  %6487 = vpow2.f32 %v4077_v13  ;;  %v7929_v12 = vpop.f32.mrf.mxu1  ;;  %v3008_v13 = vadd.f32 %v7845_v20, %v7706_v10 }
 0x4a0   :  { %v6464_v51 = vpop.eup %6463  ;;  %4833 = vst [vmem:[#allocation11 + $0x320] sm:$0xff] %v6462_v17  ;;  %6489 = vpow2.f32 %v4081_v0  ;;  %v3206_v0 = vpop.f32.mrf.mxu0  ;;  %v3755_v17 = vsub.f32 0.0, %v3201_v29  ;;  %v3018_v29 = vadd.f32 %v7861_v7, %v7706_v10 }
 0x4a1   :  { %v6466_v8 = vpop.eup %6465  ;;  %4832 = vst [vmem:[#allocation11 + $0x318] sm:$0xff] %v6464_v51  ;;  %6491 = vpow2.f32 %v4089_v18  ;;  %v7934_v18 = vpop.f32.mrf.mxu1  ;;  %v3203_v51 = vadd.f32 %v3202_v55, %v7712_v14 }
 0x4a2   :  { %v6468_v49 = vpop.eup %6467  ;;  %4834 = vst [vmem:[#allocation11 + $0x328] sm:$0xff] %v6466_v8  ;;  %6493 = vpow2.f32 %v4093_v63  ;;  %v3753_v63 = vsub.f32 0.0, %v3008_v13 }
 0x4a3   :  { %v6470_v11 = vpop.eup %6469  ;;  %4838 = vst [vmem:[#allocation11 + $0x348] sm:$0xff] %v6468_v49  ;;  %6495 = vpow2.f32 %v4091_v43  ;;  %v3010_v43 = vadd.f32 %v7847_v2, %v7710_v23  ;;  %v7941_v49 = vpop.f32.mrf.mxu1  ;;  %v3205_v2 = vadd.f32 %v3204_v26, %v7708_v28 }
 0x4a4   :  { %v6472_v21 = vpop.eup %6471  ;;  %4840 = vst [vmem:[#allocation11 + $0x358] sm:$0xff] %v6470_v11  ;;  %6497 = vpow2.f32 %v4095_v54  ;;  %v3210_v54 = vpop.f32.mrf.mxu0 }
 0x4a5   :  { %v6474_v3 = vpop.eup %6473  ;;  %4839 = vst [vmem:[#allocation11 + $0x350] sm:$0xff] %v6472_v21  ;;  %6499 = vpow2.f32 %v4103_v44  ;;  %v3012_v44 = vadd.f32 %v7849_v31, %v7706_v10  ;;  %v3754_v55 = vsub.f32 0.0, %v3010_v43  ;;  %v3014_v31 = vadd.f32 %v7854_v37, %v7710_v23  ;;  %v7947_v26 = vpop.f32.mrf.mxu1 }
 0x4a6   :  { %v6476_v30 = vpop.eup %6475  ;;  %v4397_v15 = vadd.f32 1.0, %v6474_v3  ;;  %6501 = vpow2.f32 %v4107_v60  ;;  %v4121_v3 = vmul.f32 1.442695, %v3755_v17 }
 0x4a7   :  { %v6478_v41 = vpop.eup %6477  ;;  %v4399_v48 = vadd.f32 1.0, %v6476_v30  ;;  %6503 = vpow2.f32 %v4105_v62  ;;  %v4117_v62 = vmul.f32 1.442695, %v3753_v63  ;;  %v4119_v37 = vmul.f32 1.442695, %v3754_v55  ;;  %v7955_v17 = vpop.f32.mrf.mxu1 }
 0x4a8   :  { %v6480_v38 = vpop.eup %6479  ;;  %6505 = vrcp.f32 %v4397_v15  ;;  %v4398_v42 = vadd.f32 1.0, %v6478_v41  ;;  %v3756_v41 = vsub.f32 0.0, %v3203_v51  ;;  %v3022_v51 = vadd.f32 %v7875_v25, %v7706_v10 }
 0x4a9   :  { %v6482_v39 = vpop.eup %6481  ;;  %6507 = vrcp.f32 %v4399_v48  ;;  %v4400_v40 = vadd.f32 1.0, %v6480_v38  ;;  %v3212_v48 = vpop.f32.mrf.mxu0 }
 0x4aa   :  { %v6484_v34 = vpop.eup %6483  ;;  %4841 = vst [vmem:[#allocation11 + $0x360] sm:$0xff] %v6482_v39  ;;  %6509 = vrcp.f32 %v4398_v42  ;;  %v3207_v39 = vadd.f32 %v3206_v0, %v7712_v14  ;;  %v3761_v0 = vsub.f32 0.0, %v3014_v31 }
 0x4ab   :  { %v6486_v52 = vpop.eup %6485  ;;  %6511 = vrcp.f32 %v4400_v40  ;;  %v4404_v56 = vadd.f32 1.0, %v6484_v34  ;;  %v3762_v34 = vsub.f32 0.0, %v3205_v2 }
 0x4ac   :  { %v6488_v32 = vpop.eup %6487  ;;  %v4406_v53 = vadd.f32 1.0, %v6486_v52  ;;  %6513 = vpow2.f32 %v4109_v5  ;;  %v3760_v5 = vsub.f32 0.0, %v3012_v44  ;;  %v3763_v7 = vsub.f32 0.0, %v3207_v39 }
 0x4ad   :  { %v6490_v22 = vpop.eup %6489  ;;  %6515 = vrcp.f32 %v4404_v56  ;;  %v4405_v6 = vadd.f32 1.0, %v6488_v32  ;;  %v3211_v56 = vadd.f32 %v3210_v54, %v7708_v28 }
 0x4ae   :  { %v6492_v36 = vpop.eup %6491  ;;  %6517 = vrcp.f32 %v4406_v53  ;;  %v4407_v20 = vadd.f32 1.0, %v6490_v22  ;;  %v4123_v53 = vmul.f32 1.442695, %v3756_v41  ;;  %v3020_v22 = vadd.f32 %v7867_v24, %v7710_v23 }
 0x4af   :  { %v6494_v33 = vpop.eup %6493  ;;  %6519 = vrcp.f32 %v4405_v6  ;;  %v4411_v19 = vadd.f32 1.0, %v6492_v36  ;;  %v3214_v6 = vpop.f32.mrf.mxu0  ;;  %v4131_v36 = vmul.f32 1.442695, %v3760_v5 }
 0x4b0   :  { %v6496_v61 = vpop.eup %6495  ;;  %6521 = vrcp.f32 %v4407_v20  ;;  %v4413_v8 = vadd.f32 1.0, %v6494_v33  ;;  %v3213_v20 = vadd.f32 %v3212_v48, %v7712_v14  ;;  %v4135_v33 = vmul.f32 1.442695, %v3762_v34 }
 0x4b1   :  { %v6498_v60 = vpop.eup %6497  ;;  %6523 = vrcp.f32 %v4411_v19  ;;  %v4412_v11 = vadd.f32 1.0, %v6496_v61  ;;  %v3767_v19 = vsub.f32 0.0, %v3018_v29  ;;  %v3769_v61 = vsub.f32 0.0, %v3211_v56  ;;  %v3216_v2 = vpop.f32.mrf.mxu0 }
 0x4b2   :  { %v6500_v21 = vpop.eup %6499  ;;  %6525 = vrcp.f32 %v4413_v8  ;;  %v4414_v35 = vadd.f32 1.0, %v6498_v60  ;;  %v3215_v8 = vadd.f32 %v3214_v6, %v7708_v28  ;;  %v4133_v60 = vmul.f32 1.442695, %v3761_v0 }
 0x4b3   :  { %v6502_v30 = vpop.eup %6501  ;;  %6527 = vrcp.f32 %v4412_v11  ;;  %v4418_v15 = vadd.f32 1.0, %v6500_v21  ;;  %v3768_v11 = vsub.f32 0.0, %v3020_v22  ;;  %v3770_v25 = vsub.f32 0.0, %v3213_v20  ;;  %v3220_v5 = vpop.f32.mrf.mxu0 }
 0x4b4   :  { %v6504_v38 = vpop.eup %6503  ;;  %6529 = vrcp.f32 %v4414_v35  ;;  %v4420_v42 = vadd.f32 1.0, %v6502_v30  ;;  %v4137_v35 = vmul.f32 1.442695, %v3763_v7  ;;  %v4145_v30 = vmul.f32 1.442695, %v3767_v19 }
 0x4b5   :  { %v6506_v40 = vpop.eup %6505  ;;  %6531 = vrcp.f32 %v4418_v15  ;;  %v4419_v13 = vadd.f32 1.0, %v6504_v38  ;;  %v3774_v15 = vsub.f32 0.0, %v3022_v51  ;;  %v4149_v31 = vmul.f32 1.442695, %v3769_v61  ;;  %v3222_v0 = vpop.f32.mrf.mxu0 }
 0x4b6   :  { %v6508_v52 = vpop.eup %6507  ;;  %4845 = vst [vmem:[#allocation11 + $0x380] sm:$0xff] %v6506_v40  ;;  %6533 = vrcp.f32 %v4420_v42  ;;  %v3776_v48 = vsub.f32 0.0, %v3215_v8  ;;  %v4151_v40 = vmul.f32 1.442695, %v3770_v25 }
 0x4b7   :  { %v6510_v32 = vpop.eup %6509  ;;  %4847 = vst [vmem:[#allocation11 + $0x390] sm:$0xff] %v6508_v52  ;;  %6535 = vrcp.f32 %v4419_v13  ;;  %v3217_v13 = vadd.f32 %v3216_v2, %v7712_v14  ;;  %v4159_v52 = vmul.f32 1.442695, %v3774_v15  ;;  %v3224_v19 = vpop.f32.mrf.mxu0 }
 0x4b8   :  { %v6512_v63 = vpop.eup %6511  ;;  %4846 = vst [vmem:[#allocation11 + $0x388] sm:$0xff] %v6510_v32  ;;  %6537 = vpow2.f32 %v4117_v62  ;;  %v3024_v62 = vadd.f32 %v7882_v45, %v7710_v23  ;;  %v4147_v45 = vmul.f32 1.442695, %v3768_v11  ;;  %v4163_v56 = vmul.f32 1.442695, %v3776_v48 }
 0x4b9   :  { %v6514_v43 = vpop.eup %6513  ;;  %4848 = vst [vmem:[#allocation11 + $0x398] sm:$0xff] %v6512_v63  ;;  %6539 = vpow2.f32 %v4121_v3  ;;  %v7962_v3 = vpop.f32.mrf.mxu1  ;;  %v3777_v6 = vsub.f32 0.0, %v3217_v13  ;;  %v3028_v11 = vadd.f32 %v7885_v16, %v7706_v10 }
 0x4ba   :  { %v6516_v54 = vpop.eup %6515  ;;  %v4421_v24 = vadd.f32 1.0, %v6514_v43  ;;  %6541 = vpow2.f32 %v4119_v37  ;;  %v3775_v42 = vsub.f32 0.0, %v3024_v62  ;;  %v3221_v62 = vadd.f32 %v3220_v5, %v7708_v28 }
 0x4bb   :  { %v6518_v44 = vpop.eup %6517  ;;  %4852 = vst [vmem:[#allocation11 + $0x3b8] sm:$0xff] %v6516_v54  ;;  %6543 = vpow2.f32 %v4123_v53  ;;  %v7965_v34 = vpop.f32.mrf.mxu1 }
 0x4bc   :  { %v6520_v21 = vpop.eup %6519  ;;  %4854 = vst [vmem:[#allocation11 + $0x3c8] sm:$0xff] %v6518_v44  ;;  %6545 = vrcp.f32 %v4421_v24  ;;  %v4161_v53 = vmul.f32 1.442695, %v3775_v42  ;;  %v4165_v24 = vmul.f32 1.442695, %v3777_v6 }
 0x4bd   :  { %v6522_v55 = vpop.eup %6521  ;;  %4853 = vst [vmem:[#allocation11 + $0x3c0] sm:$0xff] %v6520_v21  ;;  %6547 = vpow2.f32 %v4131_v36  ;;  %v7967_v63 = vpop.f32.mrf.mxu1 }
 0x4be   :  { %v6524_v41 = vpop.eup %6523  ;;  %4855 = vst [vmem:[#allocation11 + $0x3d0] sm:$0xff] %v6522_v55  ;;  %6549 = vpow2.f32 %v4135_v33 }
 0x4bf   :  { %v6526_v38 = vpop.eup %6525  ;;  %4859 = vst [vmem:[#allocation11 + $0x3f0] sm:$0xff] %v6524_v41  ;;  %6551 = vpow2.f32 %v4133_v60  ;;  %v7969_v61 = vpop.f32.mrf.mxu1 }
 0x4c0   :  { %v6528_v39 = vpop.eup %6527  ;;  %4861 = vst [vmem:[#allocation11 + $0x400] sm:$0xff] %v6526_v38  ;;  %6553 = vpow2.f32 %v4137_v35  ;;  %v3226_v35 = vpop.f32.mrf.mxu0  ;;  %v3781_v38 = vsub.f32 0.0, %v3028_v11 }
 0x4c1   :  { %v6530_v29 = vpop.eup %6529  ;;  %4860 = vst [vmem:[#allocation11 + $0x3f8] sm:$0xff] %v6528_v39  ;;  %6555 = vpow2.f32 %v4145_v30  ;;  %v7974_v30 = vpop.f32.mrf.mxu1  ;;  %v3223_v39 = vadd.f32 %v3222_v0, %v7712_v14 }
 0x4c2   :  { %v6532_v37 = vpop.eup %6531  ;;  %4862 = vst [vmem:[#allocation11 + $0x408] sm:$0xff] %v6530_v29  ;;  %6557 = vpow2.f32 %v4149_v31  ;;  %v3030_v31 = vadd.f32 %v7887_v4, %v7710_v23 }
 0x4c3   :  { %v6534_v32 = vpop.eup %6533  ;;  %4866 = vst [vmem:[#allocation11 + $0x428] sm:$0xff] %v6532_v37  ;;  %6559 = vpow2.f32 %v4147_v45  ;;  %v3783_v45 = vsub.f32 0.0, %v3221_v62  ;;  %v7981_v37 = vpop.f32.mrf.mxu1  ;;  %v3038_v62 = vadd.f32 %v7899_v57, %v7706_v10 }
 0x4c4   :  { %v6536_v22 = vpop.eup %6535  ;;  %4868 = vst [vmem:[#allocation11 + $0x438] sm:$0xff] %v6534_v32  ;;  %6561 = vpow2.f32 %v4151_v40  ;;  %v3230_v40 = vpop.f32.mrf.mxu0  ;;  %v3782_v32 = vsub.f32 0.0, %v3030_v31 }
 0x4c5   :  { %v6538_v36 = vpop.eup %6537  ;;  %4867 = vst [vmem:[#allocation11 + $0x430] sm:$0xff] %v6536_v22  ;;  %6563 = vpow2.f32 %v4159_v52  ;;  %v3032_v52 = vadd.f32 %v7889_v47, %v7706_v10  ;;  %v4177_v0 = vmul.f32 1.442695, %v3783_v45  ;;  %v3034_v47 = vadd.f32 %v7896_v58, %v7710_v23 }
 0x4c6   :  { %v6540_v7 = vpop.eup %6539  ;;  %v4425_v20 = vadd.f32 1.0, %v6538_v36  ;;  %6565 = vpow2.f32 %v4163_v56  ;;  %v4173_v36 = vmul.f32 1.442695, %v3781_v38  ;;  %v4175_v58 = vmul.f32 1.442695, %v3782_v32 }
 0x4c7   :  { %v6542_v43 = vpop.eup %6541  ;;  %v4427_v33 = vadd.f32 1.0, %v6540_v7  ;;  %6567 = vpow2.f32 %v4161_v53  ;;  %v3225_v53 = vadd.f32 %v3224_v19, %v7708_v28  ;;  %v7987_v19 = vpop.f32.mrf.mxu1  ;;  %v3044_v32 = vadd.f32 %v7922_v50, %v7710_v23 }
 0x4c8   :  { %v6544_v51 = vpop.eup %6543  ;;  %6569 = vrcp.f32 %v4425_v20  ;;  %v4426_v54 = vadd.f32 1.0, %v6542_v43  ;;  %v3784_v43 = vsub.f32 0.0, %v3223_v39  ;;  %v3042_v39 = vadd.f32 %v7915_v1, %v7706_v10 }
 0x4c9   :  { %v6546_v8 = vpop.eup %6545  ;;  %6571 = vrcp.f32 %v4427_v33  ;;  %v4428_v44 = vadd.f32 1.0, %v6544_v51  ;;  %v3232_v33 = vpop.f32.mrf.mxu0  ;;  %v3790_v11 = vsub.f32 0.0, %v3225_v53 }
 0x4ca   :  { %v6548_v60 = vpop.eup %6547  ;;  %4869 = vst [vmem:[#allocation11 + $0x440] sm:$0xff] %v6546_v8  ;;  %6573 = vrcp.f32 %v4426_v54  ;;  %v3227_v8 = vadd.f32 %v3226_v35, %v7712_v14  ;;  %v3789_v35 = vsub.f32 0.0, %v3034_v47  ;;  %v7995_v38 = vpop.f32.mrf.mxu1 }
 0x4cb   :  { %v6550_v2 = vpop.eup %6549  ;;  %6575 = vrcp.f32 %v4428_v44  ;;  %v4432_v21 = vadd.f32 1.0, %v6548_v60 }
 0x4cc   :  { %v6552_v25 = vpop.eup %6551  ;;  %v4434_v55 = vadd.f32 1.0, %v6550_v2  ;;  %6577 = vpow2.f32 %v4165_v24  ;;  %v3788_v24 = vsub.f32 0.0, %v3032_v52  ;;  %v3791_v57 = vsub.f32 0.0, %v3227_v8 }
 0x4cd   :  { %v6554_v15 = vpop.eup %6553  ;;  %6579 = vrcp.f32 %v4432_v21  ;;  %v4433_v41 = vadd.f32 1.0, %v6552_v25  ;;  %v3231_v21 = vadd.f32 %v3230_v40, %v7708_v28 }
 0x4ce   :  { %v6556_v48 = vpop.eup %6555  ;;  %6581 = vrcp.f32 %v4434_v55  ;;  %v4435_v16 = vadd.f32 1.0, %v6554_v15  ;;  %v4179_v55 = vmul.f32 1.442695, %v3784_v43  ;;  %v3040_v15 = vadd.f32 %v7909_v59, %v7710_v23 }
 0x4cf   :  { %v6558_v42 = vpop.eup %6557  ;;  %6583 = vrcp.f32 %v4433_v41  ;;  %v4439_v5 = vadd.f32 1.0, %v6556_v48  ;;  %v3234_v41 = vpop.f32.mrf.mxu0  ;;  %v4187_v48 = vmul.f32 1.442695, %v3788_v24 }
 0x4d0   :  { %v6560_v13 = vpop.eup %6559  ;;  %6585 = vrcp.f32 %v4435_v16  ;;  %v4441_v29 = vadd.f32 1.0, %v6558_v42  ;;  %v3233_v16 = vadd.f32 %v3232_v33, %v7712_v14  ;;  %v4191_v42 = vmul.f32 1.442695, %v3790_v11 }
 0x4d1   :  { %v6562_v4 = vpop.eup %6561  ;;  %6587 = vrcp.f32 %v4439_v5  ;;  %v4440_v56 = vadd.f32 1.0, %v6560_v13  ;;  %v3795_v5 = vsub.f32 0.0, %v3038_v62  ;;  %v3797_v13 = vsub.f32 0.0, %v3231_v21  ;;  %v3236_v53 = vpop.f32.mrf.mxu0 }
 0x4d2   :  { %v6564_v22 = vpop.eup %6563  ;;  %6589 = vrcp.f32 %v4441_v29  ;;  %v4442_v6 = vadd.f32 1.0, %v6562_v4  ;;  %v3235_v29 = vadd.f32 %v3234_v41, %v7708_v28  ;;  %v4189_v4 = vmul.f32 1.442695, %v3789_v35 }
 0x4d3   :  { %v6566_v7 = vpop.eup %6565  ;;  %6591 = vrcp.f32 %v4440_v56  ;;  %v4446_v20 = vadd.f32 1.0, %v6564_v22  ;;  %v3796_v56 = vsub.f32 0.0, %v3040_v15  ;;  %v3798_v1 = vsub.f32 0.0, %v3233_v16  ;;  %v3240_v24 = vpop.f32.mrf.mxu0 }
 0x4d4   :  { %v6568_v51 = vpop.eup %6567  ;;  %6593 = vrcp.f32 %v4442_v6  ;;  %v4448_v54 = vadd.f32 1.0, %v6566_v7  ;;  %v4193_v6 = vmul.f32 1.442695, %v3791_v57  ;;  %v4201_v7 = vmul.f32 1.442695, %v3795_v5 }
 0x4d5   :  { %v6570_v44 = vpop.eup %6569  ;;  %6595 = vrcp.f32 %v4446_v20  ;;  %v4447_v60 = vadd.f32 1.0, %v6568_v51  ;;  %v3802_v20 = vsub.f32 0.0, %v3042_v39  ;;  %v4205_v47 = vmul.f32 1.442695, %v3797_v13  ;;  %v3242_v35 = vpop.f32.mrf.mxu0 }
 0x4d6   :  { %v6572_v2 = vpop.eup %6571  ;;  %4873 = vst [vmem:[#allocation11 + $0x460] sm:$0xff] %v6570_v44  ;;  %6597 = vrcp.f32 %v4448_v54  ;;  %v3804_v33 = vsub.f32 0.0, %v3235_v29  ;;  %v4203_v50 = vmul.f32 1.442695, %v3796_v56  ;;  %v3803_v54 = vsub.f32 0.0, %v3044_v32 }
 0x4d7   :  { %v6574_v25 = vpop.eup %6573  ;;  %4875 = vst [vmem:[#allocation11 + $0x470] sm:$0xff] %v6572_v2  ;;  %6599 = vrcp.f32 %v4447_v60  ;;  %v4207_v44 = vmul.f32 1.442695, %v3798_v1  ;;  %v3237_v60 = vadd.f32 %v3236_v53, %v7712_v14  ;;  %v4215_v2 = vmul.f32 1.442695, %v3802_v20  ;;  %v3244_v5 = vpop.f32.mrf.mxu0 }
 0x4d8   :  { %v6576_v31 = vpop.eup %6575  ;;  %4874 = vst [vmem:[#allocation11 + $0x468] sm:$0xff] %v6574_v25  ;;  %6601 = vpow2.f32 %v4173_v36  ;;  %v8002_v36 = vpop.f32.mrf.mxu1  ;;  %v4219_v21 = vmul.f32 1.442695, %v3804_v33  ;;  %v3241_v32 = vadd.f32 %v3240_v24, %v7708_v28 }
 0x4d9   :  { %v6578_v45 = vpop.eup %6577  ;;  %4876 = vst [vmem:[#allocation11 + $0x478] sm:$0xff] %v6576_v31  ;;  %6603 = vpow2.f32 %v4177_v0  ;;  %v3805_v41 = vsub.f32 0.0, %v3237_v60 }
 0x4da   :  { %v6580_v40 = vpop.eup %6579  ;;  %v4449_v59 = vadd.f32 1.0, %v6578_v45  ;;  %6605 = vpow2.f32 %v4175_v58  ;;  %v8005_v11 = vpop.f32.mrf.mxu1 }
 0x4db   :  { %v6582_v52 = vpop.eup %6581  ;;  %4880 = vst [vmem:[#allocation11 + $0x498] sm:$0xff] %v6580_v40  ;;  %6607 = vpow2.f32 %v4179_v55  ;;  %v4217_v55 = vmul.f32 1.442695, %v3803_v54 }
 0x4dc   :  { %v6584_v22 = vpop.eup %6583  ;;  %4882 = vst [vmem:[#allocation11 + $0x4a8] sm:$0xff] %v6582_v52  ;;  %6609 = vrcp.f32 %v4449_v59  ;;  %v8007_v31 = vpop.f32.mrf.mxu1  ;;  %v4221_v59 = vmul.f32 1.442695, %v3805_v41 }
 0x4dd   :  { %v6586_v0 = vpop.eup %6585  ;;  %4881 = vst [vmem:[#allocation11 + $0x4a0] sm:$0xff] %v6584_v22  ;;  %6611 = vpow2.f32 %v4187_v48 }
 0x4de   :  { %v6588_v43 = vpop.eup %6587  ;;  %4883 = vst [vmem:[#allocation11 + $0x4b0] sm:$0xff] %v6586_v0  ;;  %6613 = vpow2.f32 %v4191_v42  ;;  %v8009_v13 = vpop.f32.mrf.mxu1 }
 0x4df   :  { %v6590_v51 = vpop.eup %6589  ;;  %4887 = vst [vmem:[#allocation11 + $0x4d0] sm:$0xff] %v6588_v43  ;;  %6615 = vpow2.f32 %v4189_v4  ;;  %v3048_v4 = vadd.f32 %v7925_v46, %v7706_v10 }
 0x4e0   :  { %v6592_v8 = vpop.eup %6591  ;;  %4889 = vst [vmem:[#allocation11 + $0x4e0] sm:$0xff] %v6590_v51  ;;  %6617 = vpow2.f32 %v4193_v6  ;;  %v3246_v6 = vpop.f32.mrf.mxu0  ;;  %v3811_v51 = vsub.f32 0.0, %v3241_v32  ;;  %v3058_v32 = vadd.f32 %v7941_v49, %v7706_v10 }
 0x4e1   :  { %v6594_v62 = vpop.eup %6593  ;;  %4888 = vst [vmem:[#allocation11 + $0x4d8] sm:$0xff] %v6592_v8  ;;  %6619 = vpow2.f32 %v4201_v7  ;;  %v8014_v7 = vpop.f32.mrf.mxu1  ;;  %v3243_v8 = vadd.f32 %v3242_v35, %v7712_v14 }
 0x4e2   :  { %v6596_v58 = vpop.eup %6595  ;;  %4890 = vst [vmem:[#allocation11 + $0x4e8] sm:$0xff] %v6594_v62  ;;  %6621 = vpow2.f32 %v4205_v47  ;;  %v3809_v47 = vsub.f32 0.0, %v3048_v4 }
 0x4e3   :  { %v6598_v25 = vpop.eup %6597  ;;  %4894 = vst [vmem:[#allocation11 + $0x508] sm:$0xff] %v6596_v58  ;;  %6623 = vpow2.f32 %v4203_v50  ;;  %v3050_v50 = vadd.f32 %v7927_v9, %v7710_v23  ;;  %v8021_v58 = vpop.f32.mrf.mxu1  ;;  %v3245_v9 = vadd.f32 %v3244_v5, %v7708_v28 }
 0x4e4   :  { %v6600_v15 = vpop.eup %6599  ;;  %4896 = vst [vmem:[#allocation11 + $0x518] sm:$0xff] %v6598_v25  ;;  %6625 = vpow2.f32 %v4207_v44  ;;  %v3250_v44 = vpop.f32.mrf.mxu0 }
 0x4e5   :  { %v6602_v48 = vpop.eup %6601  ;;  %4895 = vst [vmem:[#allocation11 + $0x510] sm:$0xff] %v6600_v15  ;;  %6627 = vpow2.f32 %v4215_v2  ;;  %v3052_v2 = vadd.f32 %v7929_v12, %v7706_v10  ;;  %v3810_v35 = vsub.f32 0.0, %v3050_v50  ;;  %v3054_v12 = vadd.f32 %v7934_v18, %v7710_v23  ;;  %v8027_v5 = vpop.f32.mrf.mxu1 }
 0x4e6   :  { %v6604_v57 = vpop.eup %6603  ;;  %v4453_v16 = vadd.f32 1.0, %v6602_v48  ;;  %6629 = vpow2.f32 %v4219_v21  ;;  %v4233_v48 = vmul.f32 1.442695, %v3811_v51 }
 0x4e7   :  { %v6606_v45 = vpop.eup %6605  ;;  %v4455_v42 = vadd.f32 1.0, %v6604_v57  ;;  %6631 = vpow2.f32 %v4217_v55  ;;  %v4229_v55 = vmul.f32 1.442695, %v3809_v47  ;;  %v4231_v18 = vmul.f32 1.442695, %v3810_v35  ;;  %v8035_v51 = vpop.f32.mrf.mxu1 }
 0x4e8   :  { %v6608_v39 = vpop.eup %6607  ;;  %6633 = vrcp.f32 %v4453_v16  ;;  %v4454_v40 = vadd.f32 1.0, %v6606_v45  ;;  %v3812_v45 = vsub.f32 0.0, %v3243_v8  ;;  %v3062_v8 = vadd.f32 %v7955_v17, %v7706_v10 }
 0x4e9   :  { %v6610_v29 = vpop.eup %6609  ;;  %6635 = vrcp.f32 %v4455_v42  ;;  %v4456_v52 = vadd.f32 1.0, %v6608_v39  ;;  %v3252_v42 = vpop.f32.mrf.mxu0 }
 0x4ea   :  { %v6612_v56 = vpop.eup %6611  ;;  %4897 = vst [vmem:[#allocation11 + $0x520] sm:$0xff] %v6610_v29  ;;  %6637 = vrcp.f32 %v4454_v40  ;;  %v3247_v29 = vadd.f32 %v3246_v6, %v7712_v14  ;;  %v3817_v6 = vsub.f32 0.0, %v3054_v12  ;;  %v8042_v17 = vpop.f32.mrf.mxu1  ;;  %v3830_v35 = vsub.f32 0.0, %v3062_v8 }
 0x4eb   :  { %v6614_v53 = vpop.eup %6613  ;;  %6639 = vrcp.f32 %v4456_v52  ;;  %v4460_v22 = vadd.f32 1.0, %v6612_v56  ;;  %v3818_v56 = vsub.f32 0.0, %v3245_v9 }
 0x4ec   :  { %v6616_v1 = vpop.eup %6615  ;;  %v4462_v0 = vadd.f32 1.0, %v6614_v53  ;;  %6641 = vpow2.f32 %v4221_v59  ;;  %v3816_v59 = vsub.f32 0.0, %v3052_v2  ;;  %v3819_v49 = vsub.f32 0.0, %v3247_v29  ;;  %v8045_v29 = vpop.f32.mrf.mxu1 }
 0x4ed   :  { %v6618_v20 = vpop.eup %6617  ;;  %6643 = vrcp.f32 %v4460_v22  ;;  %v4461_v43 = vadd.f32 1.0, %v6616_v1  ;;  %v3251_v22 = vadd.f32 %v3250_v44, %v7708_v28 }
 0x4ee   :  { %v6620_v33 = vpop.eup %6619  ;;  %6645 = vrcp.f32 %v4462_v0  ;;  %v4463_v46 = vadd.f32 1.0, %v6618_v20  ;;  %v4235_v0 = vmul.f32 1.442695, %v3812_v45  ;;  %v3060_v20 = vadd.f32 %v7947_v26, %v7710_v23 }
 0x4ef   :  { %v6622_v54 = vpop.eup %6621  ;;  %6647 = vrcp.f32 %v4461_v43  ;;  %v4467_v24 = vadd.f32 1.0, %v6620_v33  ;;  %v3254_v43 = vpop.f32.mrf.mxu0  ;;  %v4243_v33 = vmul.f32 1.442695, %v3816_v59 }
 0x4f0   :  { %v6624_v60 = vpop.eup %6623  ;;  %6649 = vrcp.f32 %v4463_v46  ;;  %v4469_v62 = vadd.f32 1.0, %v6622_v54  ;;  %v3253_v46 = vadd.f32 %v3252_v42, %v7712_v14  ;;  %v4247_v54 = vmul.f32 1.442695, %v3818_v56 }
 0x4f1   :  { %v6626_v21 = vpop.eup %6625  ;;  %6651 = vrcp.f32 %v4467_v24  ;;  %v4468_v25 = vadd.f32 1.0, %v6624_v60  ;;  %v3823_v24 = vsub.f32 0.0, %v3058_v32  ;;  %v3825_v60 = vsub.f32 0.0, %v3251_v22  ;;  %v3256_v9 = vpop.f32.mrf.mxu0 }
 0x4f2   :  { %v6628_v15 = vpop.eup %6627  ;;  %6653 = vrcp.f32 %v4469_v62  ;;  %v4470_v41 = vadd.f32 1.0, %v6626_v21  ;;  %v3255_v62 = vadd.f32 %v3254_v43, %v7708_v28  ;;  %v4245_v21 = vmul.f32 1.442695, %v3817_v6 }
 0x4f3   :  { %v6630_v57 = vpop.eup %6629  ;;  %6655 = vrcp.f32 %v4468_v25  ;;  %v4474_v16 = vadd.f32 1.0, %v6628_v15  ;;  %v3824_v25 = vsub.f32 0.0, %v3060_v20  ;;  %v3826_v10 = vsub.f32 0.0, %v3253_v46  ;;  %v5861_v42 = vpop.f32.mrf.mxu0 }
 0x4f4   :  { %v6632_v39 = vpop.eup %6631  ;;  %6657 = vrcp.f32 %v4470_v41  ;;  %v4476_v40 = vadd.f32 1.0, %v6630_v57  ;;  %v4249_v41 = vmul.f32 1.442695, %v3819_v49  ;;  %v4257_v28 = vmul.f32 1.442695, %v3823_v24  ;;  %v8049_v20 = vpop.f32.mrf.mxu1  ;;  %v7115_v49 = vld [vmem:[%s8312_s8] sm:$0xff] }
 0x4f5   :  { %v6634_v52 = vpop.eup %6633  ;;  %6659 = vrcp.f32 %v4474_v16  ;;  %v4475_v4 = vadd.f32 1.0, %v6632_v39  ;;  %v4261_v16 = vmul.f32 1.442695, %v3825_v60  ;;  %v3832_v45 = vsub.f32 0.0, %v3255_v62  ;;  %s7276_s8 = smov [#allocation12]  }
 0x4f6   :  { %v6636_v53 = vpop.eup %6635  ;;  %4901 = vst [vmem:[#allocation11 + $0x540] sm:$0xff] %v6634_v52  ;;  %6661 = vrcp.f32 %v4476_v40  ;;  %v4263_v40 = vmul.f32 1.442695, %v3826_v10  ;;  %v3257_v59 = vadd.f32 %v3256_v9, %v7712_v14  ;;  %s5006_s24 = sshll.u32 %s7276_s8, 4  ;;  %s5007_s24 = int_to_ptr.vmem [resolvable:$true] %s5006_s24 }
 0x4f7   :  { %v6638_v1 = vpop.eup %6637  ;;  %4903 = vst [vmem:[#allocation11 + $0x550] sm:$0xff] %v6636_v53  ;;  %6663 = vrcp.f32 %v4475_v4  ;;  %v4271_v4 = vmul.f32 1.442695, %v3830_v35  ;;  %v4275_v32 = vmul.f32 1.442695, %v3832_v45  ;;  %v2568_v53 = vsub.s32 4, %v7694_v27  ;;  %p7221_p12 = scmp.lt.s32.totalorder %s5007_s24, %s5007_s24 }
 0x4f8   :  { %v6640_v47 = vpop.eup %6639  ;;  %4902 = vst [vmem:[#allocation11 + $0x548] sm:$0xff] %v6638_v1  ;;  %6665 = vpow2.f32 %v4229_v55  ;;  %v3064_v55 = vadd.f32 %v7962_v3, %v7710_v23  ;;  %v4259_v23 = vmul.f32 1.442695, %v3824_v25  ;;  %v2576_v1 = vsub.s32 6, %v7694_v27  ;;  %s7216_s25 = scalar_lea.vmem %s5007_s24, 4096 }
 0x4f9   :  { %v6642_v50 = vpop.eup %6641  ;;  %4904 = vst [vmem:[#allocation11 + $0x558] sm:$0xff] %v6640_v47  ;;  %6667 = vpow2.f32 %v4233_v48  ;;  %v3833_v6 = vsub.f32 0.0, %v3257_v59  ;;  %v8054_v46 = vrot.slane %v7115_v49, %v2568_v53  ;;  %p7217_p11 = scmp.ne.s32.totalorder %s5007_s24, %s7216_s25  ;;  %p7222_p13 = scmp.lt.s32.totalorder %s7216_s25, %s7216_s25 }
 0x4fa   :  { %v6644_v44 = vpop.eup %6643  ;;  %v4477_v26 = vadd.f32 1.0, %v6642_v50  ;;  %6669 = vpow2.f32 %v4231_v18  ;;  %v3831_v3 = vsub.f32 0.0, %v3064_v55  ;;  %v2572_v50 = vsub.s32 5, %v7694_v27 }
 0x4fb   :  { %v6646_v2 = vpop.eup %6645  ;;  %4908 = vst [vmem:[#allocation11 + $0x578] sm:$0xff] %v6644_v44  ;;  %6671 = vpow2.f32 %v4235_v0  ;;  %v3486_v0 = vpop.f32.mrf.mxu0  ;;  %v8057_v8 = vrot.slane %v7115_v49, %v2576_v1  ;;  %v4277_v62 = vmul.f32 1.442695, %v3833_v6  ;;  %v3294_v27 = vadd.f32 %v7965_v34, %v8054_v46  ;;  %p7223_p0 = por %p7222_p13, %p7221_p12 }
 0x4fc   :  { %v6648_v15 = vpop.eup %6647  ;;  %4910 = vst [vmem:[#allocation11 + $0x588] sm:$0xff] %v6646_v2  ;;  %6673 = vrcp.f32 %v4477_v26  ;;  %v4273_v22 = vmul.f32 1.442695, %v3831_v3  ;;  %v8059_v2 = vpop.f32.mrf.mxu1  ;;  %v8063_v9 = vrot.slane %v7115_v49, %v2572_v50 }
 0x4fd   :  { %v6650_v48 = vpop.eup %6649  ;;  %4909 = vst [vmem:[#allocation11 + $0x580] sm:$0xff] %v6648_v15  ;;  %6675 = vpow2.f32 %v4243_v33  ;;  %v5862_v44 = vpop.f32.mrf.mxu0  ;;  %v3495_v10 = vadd.f32 %v5861_v42, %v8057_v8  ;;  %v3617_v3 = vsub.f32 0.0, %v3294_v27  ;;  %p7224_p1 = pnand %p7223_p0, %p7217_p11 }
 0x4fe   :  { %v6652_v57 = vpop.eup %6651  ;;  %4911 = vst [vmem:[#allocation11 + $0x590] sm:$0xff] %v6650_v48  ;;  %6677 = vpow2.f32 %v4247_v54 }
 0x4ff   :  { %v6654_v12 = vpop.eup %6653  ;;  %4915 = vst [vmem:[#allocation11 + $0x5b0] sm:$0xff] %v6652_v57  ;;  %6679 = vpow2.f32 %v4245_v21  ;;  %v3489_v48 = vpop.f32.mrf.mxu0  ;;  %v3633_v59 = vsub.f32 0.0, %v3495_v10  ;;  %v3845_v6 = vmul.f32 1.442695, %v3617_v3 }
 0x500   :  { %v6656_v39 = vpop.eup %6655  ;;  %4917 = vst [vmem:[#allocation11 + $0x5c0] sm:$0xff] %v6654_v12  ;;  %6681 = vpow2.f32 %v4249_v41  ;;  %v8066_v57 = vpop.f32.mrf.mxu1  ;;  %v3487_v12 = vadd.f32 %v3486_v0, %v8057_v8  ;;  %v3498_v0 = vadd.f32 %v5862_v44, %v8057_v8 }
 0x501   :  { %v6658_v52 = vpop.eup %6657  ;;  %4916 = vst [vmem:[#allocation11 + $0x5b8] sm:$0xff] %v6656_v39  ;;  %6683 = vpow2.f32 %v4257_v28  ;;  %v3296_v39 = vadd.f32 %v7967_v63, %v8063_v9  ;;  %v3877_v49 = vmul.f32 1.442695, %v3633_v59 }
 0x502   :  { %v6660_v56 = vpop.eup %6659  ;;  %4918 = vst [vmem:[#allocation11 + $0x5c8] sm:$0xff] %v6658_v52  ;;  %6685 = vpow2.f32 %v4261_v16  ;;  %v5865_v52 = vpop.f32.mrf.mxu0  ;;  %v3619_v1 = vsub.f32 0.0, %v3487_v12 }
 0x503   :  { %v6662_v18 = vpop.eup %6661  ;;  %4922 = vst [vmem:[#allocation11 + $0x5e8] sm:$0xff] %v6660_v56  ;;  %6687 = vpow2.f32 %v4259_v23  ;;  %v8073_v53 = vpop.f32.mrf.mxu1 }
 0x504   :  { %v6664_v14 = vpop.eup %6663  ;;  %4924 = vst [vmem:[#allocation11 + $0x5f8] sm:$0xff] %v6662_v18  ;;  %6689 = vpow2.f32 %v4263_v40  ;;  %v3502_v50 = vpop.f32.mrf.mxu0  ;;  %v3849_v10 = vmul.f32 1.442695, %v3619_v1 }
 0x505   :  { %v6666_v43 = vpop.eup %6665  ;;  %4923 = vst [vmem:[#allocation11 + $0x5f0] sm:$0xff] %v6664_v14  ;;  %6691 = vpow2.f32 %v4271_v4  ;;  %v8079_v44 = vpop.f32.mrf.mxu1  ;;  %v3503_v12 = vadd.f32 %v3502_v50, %v8057_v8 }
 0x506   :  { %v6668_v47 = vpop.eup %6667  ;;  %v4481_v33 = vadd.f32 1.0, %v6666_v43  ;;  %6693 = vpow2.f32 %v4275_v32  ;;  %v3298_v32 = vadd.f32 %v7969_v61, %v8054_v46  ;;  %v3618_v43 = vsub.f32 0.0, %v3296_v39 }
 0x507   :  { %v6670_v54 = vpop.eup %6669  ;;  %v4483_v24 = vadd.f32 1.0, %v6668_v47  ;;  %6695 = vpow2.f32 %v4273_v22  ;;  %v3300_v61 = vadd.f32 %v7974_v30, %v8063_v9 }
 0x508   :  { %v6672_v26 = vpop.eup %6671  ;;  %6697 = vrcp.f32 %v4481_v33  ;;  %v4482_v60 = vadd.f32 1.0, %v6670_v54  ;;  %v3847_v30 = vmul.f32 1.442695, %v3618_v43 }
 0x509   :  { %v6674_v21 = vpop.eup %6673  ;;  %6699 = vrcp.f32 %v4483_v24  ;;  %v4484_v25 = vadd.f32 1.0, %v6672_v26  ;;  %v3624_v26 = vsub.f32 0.0, %v3298_v32 }
 0x50a   :  { %v6676_v55 = vpop.eup %6675  ;;  %4925 = vst [vmem:[#allocation11 + $0x600] sm:$0xff] %v6674_v21  ;;  %6701 = vrcp.f32 %v4482_v60  ;;  %v3490_v60 = vadd.f32 %v3489_v48, %v8057_v8  ;;  %v3625_v48 = vsub.f32 0.0, %v3300_v61 }
 0x50b   :  { %v6678_v15 = vpop.eup %6677  ;;  %6703 = vrcp.f32 %v4484_v25  ;;  %v4488_v41 = vadd.f32 1.0, %v6676_v55  ;;  %v3640_v25 = vsub.f32 0.0, %v3498_v0  ;;  %v3304_v55 = vadd.f32 %v7981_v37, %v8054_v46 }
 0x50c   :  { %v6680_v28 = vpop.eup %6679  ;;  %v4490_v35 = vadd.f32 1.0, %v6678_v15  ;;  %6705 = vpow2.f32 %v4277_v62  ;;  %v3511_v15 = vadd.f32 %v5865_v52, %v8057_v8  ;;  %v3626_v37 = vsub.f32 0.0, %v3490_v60 }
 0x50d   :  { %v6682_v16 = vpop.eup %6681  ;;  %6707 = vrcp.f32 %v4488_v41  ;;  %v4489_v45 = vadd.f32 1.0, %v6680_v28  ;;  %v3306_v28 = vadd.f32 %v7987_v19, %v8063_v9  ;;  %v3891_v3 = vmul.f32 1.442695, %v3640_v25 }
 0x50e   :  { %v6684_v23 = vpop.eup %6683  ;;  %6709 = vrcp.f32 %v4490_v35  ;;  %v4491_v34 = vadd.f32 1.0, %v6682_v16  ;;  %v5866_v35 = vpop.f32.mrf.mxu0  ;;  %v3631_v39 = vsub.f32 0.0, %v3304_v55  ;;  %v3661_v59 = vsub.f32 0.0, %v3511_v15 }
 0x50f   :  { %v6686_v40 = vpop.eup %6685  ;;  %6711 = vrcp.f32 %v4489_v45  ;;  %v4495_v42 = vadd.f32 1.0, %v6684_v23  ;;  %v3859_v45 = vmul.f32 1.442695, %v3624_v26  ;;  %v8087_v23 = vpop.f32.mrf.mxu1  ;;  %v3514_v52 = vadd.f32 %v5866_v35, %v8057_v8 }
 0x510   :  { %v6688_v4 = vpop.eup %6687  ;;  %6713 = vrcp.f32 %v4491_v34  ;;  %v4497_v56 = vadd.f32 1.0, %v6686_v40  ;;  %v3308_v40 = vadd.f32 %v7995_v38, %v8054_v46  ;;  %v3632_v32 = vsub.f32 0.0, %v3306_v28 }
 0x511   :  { %v6690_v18 = vpop.eup %6689  ;;  %6715 = vrcp.f32 %v4495_v42  ;;  %v4496_v22 = vadd.f32 1.0, %v6688_v4  ;;  %v3863_v0 = vmul.f32 1.442695, %v3626_v37  ;;  %v3647_v38 = vsub.f32 0.0, %v3503_v12 }
 0x512   :  { %v6692_v63 = vpop.eup %6691  ;;  %6717 = vrcp.f32 %v4497_v56  ;;  %v4498_v14 = vadd.f32 1.0, %v6690_v18  ;;  %v3861_v56 = vmul.f32 1.442695, %v3625_v48  ;;  %v3310_v18 = vadd.f32 %v8002_v36, %v8063_v9 }
 0x513   :  { %v6694_v47 = vpop.eup %6693  ;;  %6719 = vrcp.f32 %v4496_v22  ;;  %v4502_v33 = vadd.f32 1.0, %v6692_v63  ;;  %v3505_v22 = vpop.f32.mrf.mxu0  ;;  %v3638_v43 = vsub.f32 0.0, %v3308_v40  ;;  %v3875_v36 = vmul.f32 1.442695, %v3632_v32 }
 0x514   :  { %v6696_v54 = vpop.eup %6695  ;;  %6721 = vrcp.f32 %v4498_v14  ;;  %v4504_v24 = vadd.f32 1.0, %v6694_v47  ;;  %v8094_v63 = vpop.f32.mrf.mxu1  ;;  %v3639_v50 = vsub.f32 0.0, %v3310_v18  ;;  %v3905_v26 = vmul.f32 1.442695, %v3647_v38 }
 0x515   :  { %v6698_v62 = vpop.eup %6697  ;;  %6723 = vrcp.f32 %v4502_v33  ;;  %v4503_v21 = vadd.f32 1.0, %v6696_v54  ;;  %v3933_v33 = vmul.f32 1.442695, %v3661_v59  ;;  %v5869_v54 = vpop.f32.mrf.mxu0  ;;  %v3506_v60 = vadd.f32 %v3505_v22, %v8057_v8 }
 0x516   :  { %v6700_v27 = vpop.eup %6699  ;;  %4929 = vst [vmem:[#allocation11 + $0x620] sm:$0xff] %v6698_v62  ;;  %6725 = vrcp.f32 %v4504_v24  ;;  %v8097_v62 = vpop.f32.mrf.mxu1  ;;  %v3887_v25 = vmul.f32 1.442695, %v3638_v43  ;;  %v3889_v15 = vmul.f32 1.442695, %v3639_v50 }
 0x517   :  { %v6702_v41 = vpop.eup %6701  ;;  %4931 = vst [vmem:[#allocation11 + $0x630] sm:$0xff] %v6700_v27  ;;  %6727 = vrcp.f32 %v4503_v21  ;;  %v3654_v48 = vsub.f32 0.0, %v3506_v60  ;;  %v3318_v60 = vadd.f32 %v8009_v13, %v8054_v46  ;;  %v3320_v13 = vadd.f32 %v8014_v7, %v8063_v9 }
 0x518   :  { %v6704_v16 = vpop.eup %6703  ;;  %4930 = vst [vmem:[#allocation11 + $0x628] sm:$0xff] %v6702_v41  ;;  %6729 = vpow2.f32 %v3845_v6  ;;  %v3873_v6 = vmul.f32 1.442695, %v3631_v39  ;;  %v3518_v41 = vpop.f32.mrf.mxu0 }
 0x519   :  { %v6706_v34 = vpop.eup %6705  ;;  %4932 = vst [vmem:[#allocation11 + $0x638] sm:$0xff] %v6704_v16  ;;  %6731 = vpow2.f32 %v3877_v49  ;;  %v3668_v49 = vsub.f32 0.0, %v3514_v52  ;;  %v8099_v28 = vpop.f32.mrf.mxu1  ;;  %v3919_v40 = vmul.f32 1.442695, %v3654_v48  ;;  %v3314_v52 = vadd.f32 %v8005_v11, %v8054_v46 }
 0x51a   :  { %v6708_v42 = vpop.eup %6707  ;;  %v4505_v19 = vadd.f32 1.0, %v6706_v34  ;;  %6733 = vpow2.f32 %v3847_v30  ;;  %v5870_v34 = vpop.f32.mrf.mxu0  ;;  %v3519_v50 = vadd.f32 %v3518_v41, %v8057_v8 }
 0x51b   :  { %v6710_v4 = vpop.eup %6709  ;;  %4936 = vst [vmem:[#allocation11 + $0x658] sm:$0xff] %v6708_v42  ;;  %6735 = vpow2.f32 %v3849_v10  ;;  %v3947_v27 = vmul.f32 1.442695, %v3668_v49  ;;  %v8101_v42 = vpop.f32.mrf.mxu1  ;;  %v3645_v43 = vsub.f32 0.0, %v3314_v52  ;;  %v3316_v49 = vadd.f32 %v8007_v31, %v8063_v9 }
 0x51c   :  { %v6712_v1 = vpop.eup %6711  ;;  %4938 = vst [vmem:[#allocation11 + $0x668] sm:$0xff] %v6710_v4  ;;  %6737 = vrcp.f32 %v4505_v19  ;;  %v3521_v22 = vpop.f32.mrf.mxu0  ;;  %v3530_v31 = vadd.f32 %v5870_v34, %v8057_v8  ;;  %v3324_v52 = vadd.f32 %v8021_v58, %v8054_v46 }
 0x51d   :  { %v6714_v14 = vpop.eup %6713  ;;  %4937 = vst [vmem:[#allocation11 + $0x660] sm:$0xff] %v6712_v1  ;;  %6739 = vpow2.f32 %v3859_v45  ;;  %v8106_v38 = vpop.f32.mrf.mxu1  ;;  %v3646_v41 = vsub.f32 0.0, %v3316_v49 }
 0x51e   :  { %v6716_v47 = vpop.eup %6715  ;;  %4939 = vst [vmem:[#allocation11 + $0x670] sm:$0xff] %v6714_v14  ;;  %6741 = vpow2.f32 %v3891_v3  ;;  %v3659_v49 = vsub.f32 0.0, %v3324_v52 }
 0x51f   :  { %v6718_v61 = vpop.eup %6717  ;;  %4943 = vst [vmem:[#allocation11 + $0x690] sm:$0xff] %v6716_v47  ;;  %6743 = vpow2.f32 %v3861_v56  ;;  %v3527_v56 = vadd.f32 %v5869_v54, %v8057_v8  ;;  %v5873_v54 = vpop.f32.mrf.mxu0  ;;  %v3903_v7 = vmul.f32 1.442695, %v3646_v41 }
 0x520   :  { %v6720_v24 = vpop.eup %6719  ;;  %4945 = vst [vmem:[#allocation11 + $0x6a0] sm:$0xff] %v6718_v61  ;;  %6745 = vpow2.f32 %v3863_v0 }
 0x521   :  { %v6722_v21 = vpop.eup %6721  ;;  %4944 = vst [vmem:[#allocation11 + $0x698] sm:$0xff] %v6720_v24  ;;  %6747 = vpow2.f32 %v3873_v6 }
 0x522   :  { %v6724_v55 = vpop.eup %6723  ;;  %4946 = vst [vmem:[#allocation11 + $0x6a8] sm:$0xff] %v6722_v21  ;;  %6749 = vpow2.f32 %v3933_v33  ;;  %v3689_v33 = vsub.f32 0.0, %v3527_v56  ;;  %v8113_v21 = vpop.f32.mrf.mxu1  ;;  %v3543_v56 = vadd.f32 %v5873_v54, %v8057_v8 }
 0x523   :  { %v6726_v30 = vpop.eup %6725  ;;  %4950 = vst [vmem:[#allocation11 + $0x6c8] sm:$0xff] %v6724_v55  ;;  %6751 = vpow2.f32 %v3875_v36 }
 0x524   :  { %v6728_v10 = vpop.eup %6727  ;;  %4952 = vst [vmem:[#allocation11 + $0x6d8] sm:$0xff] %v6726_v30  ;;  %6753 = vpow2.f32 %v3905_v26  ;;  %v8119_v34 = vpop.f32.mrf.mxu1 }
 0x525   :  { %v6730_v35 = vpop.eup %6729  ;;  %4951 = vst [vmem:[#allocation11 + $0x6d0] sm:$0xff] %v6728_v10  ;;  %6755 = vpow2.f32 %v3887_v25  ;;  %v3989_v10 = vmul.f32 1.442695, %v3689_v33 }
 0x526   :  { %v6732_v16 = vpop.eup %6731  ;;  %v4289_v45 = vadd.f32 1.0, %v6730_v35  ;;  %6757 = vpow2.f32 %v3947_v27  ;;  %v3901_v27 = vmul.f32 1.442695, %v3645_v43 }
 0x527   :  { %v6734_v37 = vpop.eup %6733  ;;  %v4305_v12 = vadd.f32 1.0, %v6732_v16  ;;  %6759 = vpow2.f32 %v3889_v15  ;;  %v3675_v16 = vsub.f32 0.0, %v3519_v50  ;;  %v3717_v50 = vsub.f32 0.0, %v3543_v56 }
 0x528   :  { %v6736_v3 = vpop.eup %6735  ;;  %6761 = vrcp.f32 %v4289_v45  ;;  %v4290_v39 = vadd.f32 1.0, %v6734_v37  ;;  %v3534_v45 = vpop.f32.mrf.mxu0 }
 0x529   :  { %v6738_v19 = vpop.eup %6737  ;;  %6763 = vrcp.f32 %v4305_v12  ;;  %v4291_v59 = vadd.f32 1.0, %v6736_v3  ;;  %v3652_v3 = vsub.f32 0.0, %v3318_v60  ;;  %v3535_v43 = vadd.f32 %v3534_v45, %v8057_v8 }
 0x52a   :  { %v6740_v4 = vpop.eup %6739  ;;  %4953 = vst [vmem:[#allocation11 + $0x6e0] sm:$0xff] %v6738_v19  ;;  %6765 = vrcp.f32 %v4290_v39  ;;  %v3522_v39 = vadd.f32 %v3521_v22, %v8057_v8  ;;  %v3653_v22 = vsub.f32 0.0, %v3320_v13 }
 0x52b   :  { %v6742_v32 = vpop.eup %6741  ;;  %6767 = vrcp.f32 %v4291_v59  ;;  %v4296_v18 = vadd.f32 1.0, %v6740_v4  ;;  %v3696_v59 = vsub.f32 0.0, %v3530_v31 }
 0x52c   :  { %v6744_v1 = vpop.eup %6743  ;;  %v4312_v0 = vadd.f32 1.0, %v6742_v32  ;;  %6769 = vpow2.f32 %v3919_v40  ;;  %v3682_v58 = vsub.f32 0.0, %v3522_v39 }
 0x52d   :  { %v6746_v14 = vpop.eup %6745  ;;  %6771 = vrcp.f32 %v4296_v18  ;;  %v4297_v6 = vadd.f32 1.0, %v6744_v1  ;;  %v3961_v18 = vmul.f32 1.442695, %v3675_v16  ;;  %v3326_v1 = vadd.f32 %v8027_v5, %v8063_v9 }
 0x52e   :  { %v6748_v47 = vpop.eup %6747  ;;  %6773 = vrcp.f32 %v4312_v0  ;;  %v4298_v11 = vadd.f32 1.0, %v6746_v14  ;;  %v5874_v0 = vpop.f32.mrf.mxu0  ;;  %v4003_v33 = vmul.f32 1.442695, %v3696_v59  ;;  %v3975_v31 = vmul.f32 1.442695, %v3682_v58 }
 0x52f   :  { %v6750_v61 = vpop.eup %6749  ;;  %6775 = vrcp.f32 %v4297_v6  ;;  %v4303_v36 = vadd.f32 1.0, %v6748_v47  ;;  %v3915_v6 = vmul.f32 1.442695, %v3652_v3  ;;  %v8127_v47 = vpop.f32.mrf.mxu1  ;;  %v3546_v54 = vadd.f32 %v5874_v0, %v8057_v8 }
 0x530   :  { %v6752_v24 = vpop.eup %6751  ;;  %6777 = vrcp.f32 %v4298_v11  ;;  %v4333_v26 = vadd.f32 1.0, %v6750_v61  ;;  %v3328_v61 = vadd.f32 %v8035_v51, %v8054_v46  ;;  %v3660_v60 = vsub.f32 0.0, %v3326_v1 }
 0x531   :  { %v6754_v25 = vpop.eup %6753  ;;  %6779 = vrcp.f32 %v4303_v36  ;;  %v4304_v55 = vadd.f32 1.0, %v6752_v24  ;;  %v3703_v51 = vsub.f32 0.0, %v3535_v43  ;;  %v3724_v16 = vsub.f32 0.0, %v3546_v54 }
 0x532   :  { %v6756_v30 = vpop.eup %6755  ;;  %6781 = vrcp.f32 %v4333_v26  ;;  %v4319_v15 = vadd.f32 1.0, %v6754_v25  ;;  %v3917_v26 = vmul.f32 1.442695, %v3653_v22  ;;  %v3330_v25 = vadd.f32 %v8042_v17, %v8063_v9 }
 0x533   :  { %v6758_v48 = vpop.eup %6757  ;;  %6783 = vrcp.f32 %v4304_v55  ;;  %v4310_v35 = vadd.f32 1.0, %v6756_v30  ;;  %v3537_v55 = vpop.f32.mrf.mxu0  ;;  %v3666_v41 = vsub.f32 0.0, %v3328_v61  ;;  %v3931_v17 = vmul.f32 1.442695, %v3660_v60 }
 0x534   :  { %v6760_v37 = vpop.eup %6759  ;;  %6785 = vrcp.f32 %v4319_v15  ;;  %v4340_v12 = vadd.f32 1.0, %v6758_v48  ;;  %v8134_v30 = vpop.f32.mrf.mxu1  ;;  %v3667_v45 = vsub.f32 0.0, %v3330_v25  ;;  %v4017_v3 = vmul.f32 1.442695, %v3703_v51 }
 0x535   :  { %v6762_v40 = vpop.eup %6761  ;;  %6787 = vrcp.f32 %v4310_v35  ;;  %v4311_v19 = vadd.f32 1.0, %v6760_v37  ;;  %v4045_v35 = vmul.f32 1.442695, %v3717_v50  ;;  %v5877_v37 = vpop.f32.mrf.mxu0  ;;  %v3538_v39 = vadd.f32 %v3537_v55, %v8057_v8 }
 0x536   :  { %v6764_v4 = vpop.eup %6763  ;;  %4737 = vst [vmem:[#allocation11 + $0x20] sm:$0xff] %v6762_v40  ;;  %6789 = vrcp.f32 %v4340_v12  ;;  %v8137_v40 = vpop.f32.mrf.mxu1  ;;  %v3943_v59 = vmul.f32 1.442695, %v3666_v41  ;;  %v3945_v56 = vmul.f32 1.442695, %v3667_v45  ;;  %v3559_v25 = vadd.f32 %v5877_v37, %v8057_v8 }
 0x537   :  { %v6766_v32 = vpop.eup %6765  ;;  %4753 = vst [vmem:[#allocation11 + $0xa0] sm:$0xff] %v6764_v4  ;;  %6791 = vrcp.f32 %v4311_v19  ;;  %v4059_v4 = vmul.f32 1.442695, %v3724_v16  ;;  %v3710_v22 = vsub.f32 0.0, %v3538_v39  ;;  %v3336_v41 = vadd.f32 %v8049_v20, %v8063_v9 }
 0x538   :  { %v6768_v14 = vpop.eup %6767  ;;  %4738 = vst [vmem:[#allocation11 + $0x28] sm:$0xff] %v6766_v32  ;;  %6793 = vpow2.f32 %v3901_v27  ;;  %v3550_v32 = vpop.f32.mrf.mxu0  ;;  %v3745_v45 = vsub.f32 0.0, %v3559_v25  ;;  %v3338_v39 = vadd.f32 %v8059_v2, %v8054_v46  ;;  %v3340_v2 = vadd.f32 %v8066_v57, %v8063_v9 }
 0x539   :  { %v6770_v11 = vpop.eup %6769  ;;  %4739 = vst [vmem:[#allocation11 + $0x30] sm:$0xff] %v6768_v14  ;;  %6795 = vpow2.f32 %v3989_v10  ;;  %v3929_v10 = vmul.f32 1.442695, %v3659_v49  ;;  %v8139_v1 = vpop.f32.mrf.mxu1  ;;  %v4031_v61 = vmul.f32 1.442695, %v3710_v22  ;;  %v3551_v16 = vadd.f32 %v3550_v32, %v8057_v8 }
 0x53a   :  { %v6772_v36 = vpop.eup %6771  ;;  %v4326_v5 = vadd.f32 1.0, %v6770_v11  ;;  %6797 = vpow2.f32 %v3903_v7  ;;  %v5878_v11 = vpop.f32.mrf.mxu0 }
 0x53b   :  { %v6774_v24 = vpop.eup %6773  ;;  %4744 = vst [vmem:[#allocation11 + $0x58] sm:$0xff] %v6772_v36  ;;  %6799 = vpow2.f32 %v3961_v18  ;;  %v8141_v36 = vpop.f32.mrf.mxu1 }
 0x53c   :  { %v6776_v27 = vpop.eup %6775  ;;  %4760 = vst [vmem:[#allocation11 + $0xd8] sm:$0xff] %v6774_v24  ;;  %6801 = vrcp.f32 %v4326_v5  ;;  %v3334_v24 = vadd.f32 %v8045_v29, %v8054_v46  ;;  %v3553_v55 = vpop.f32.mrf.mxu0 }
 0x53d   :  { %v6778_v15 = vpop.eup %6777  ;;  %4745 = vst [vmem:[#allocation11 + $0x60] sm:$0xff] %v6776_v27  ;;  %6803 = vpow2.f32 %v3915_v6  ;;  %v8146_v51 = vpop.f32.mrf.mxu1 }
 0x53e   :  { %v6780_v48 = vpop.eup %6779  ;;  %4746 = vst [vmem:[#allocation11 + $0x68] sm:$0xff] %v6778_v15  ;;  %6805 = vpow2.f32 %v4003_v33  ;;  %v5881_v37 = vpop.f32.mrf.mxu0 }
 0x53f   :  { %v6782_v13 = vpop.eup %6781  ;;  %4751 = vst [vmem:[#allocation11 + $0x90] sm:$0xff] %v6780_v48  ;;  %6807 = vpow2.f32 %v3917_v26 }
 0x540   :  { %v6784_v12 = vpop.eup %6783  ;;  %4781 = vst [vmem:[#allocation11 + $0x180] sm:$0xff] %v6782_v13  ;;  %6809 = vpow2.f32 %v3975_v31 }
 0x541   :  { %v6786_v19 = vpop.eup %6785  ;;  %4752 = vst [vmem:[#allocation11 + $0x98] sm:$0xff] %v6784_v12  ;;  %6811 = vpow2.f32 %v3929_v10 }
 0x542   :  { %v6788_v52 = vpop.eup %6787  ;;  %4767 = vst [vmem:[#allocation11 + $0x110] sm:$0xff] %v6786_v19  ;;  %6813 = vpow2.f32 %v4045_v35  ;;  %v3673_v35 = vsub.f32 0.0, %v3334_v24  ;;  %v8153_v19 = vpop.f32.mrf.mxu1 }
 0x543   :  { %v6790_v7 = vpop.eup %6789  ;;  %4758 = vst [vmem:[#allocation11 + $0xc8] sm:$0xff] %v6788_v52  ;;  %6815 = vpow2.f32 %v3931_v17  ;;  %v3674_v52 = vsub.f32 0.0, %v3336_v41 }
 0x544   :  { %v6792_v18 = vpop.eup %6791  ;;  %4788 = vst [vmem:[#allocation11 + $0x1b8] sm:$0xff] %v6790_v7  ;;  %6817 = vpow2.f32 %v4017_v3  ;;  %v3957_v32 = vmul.f32 1.442695, %v3673_v35 }
 0x545   :  { %v6794_v0 = vpop.eup %6793  ;;  %4759 = vst [vmem:[#allocation11 + $0xd0] sm:$0xff] %v6792_v18  ;;  %6819 = vpow2.f32 %v3943_v59  ;;  %v3731_v18 = vsub.f32 0.0, %v3551_v16  ;;  %v3959_v57 = vmul.f32 1.442695, %v3674_v52 }
 0x546   :  { %v6796_v14 = vpop.eup %6795  ;;  %v4317_v6 = vadd.f32 1.0, %v6794_v0  ;;  %6821 = vpow2.f32 %v4059_v4  ;;  %v3562_v4 = vadd.f32 %v5878_v11, %v8057_v8  ;;  %v8159_v11 = vpop.f32.mrf.mxu1 }
 0x547   :  { %v6798_v58 = vpop.eup %6797  ;;  %v4361_v43 = vadd.f32 1.0, %v6796_v14  ;;  %6823 = vpow2.f32 %v3945_v56  ;;  %v4101_v14 = vmul.f32 1.442695, %v3745_v45  ;;  %v4073_v25 = vmul.f32 1.442695, %v3731_v18 }
 0x548   :  { %v6800_v33 = vpop.eup %6799  ;;  %6825 = vrcp.f32 %v4317_v6  ;;  %v4318_v49 = vadd.f32 1.0, %v6798_v58  ;;  %v3566_v6 = vpop.f32.mrf.mxu0 }
 0x549   :  { %v6802_v5 = vpop.eup %6801  ;;  %6827 = vrcp.f32 %v4361_v43  ;;  %v4347_v50 = vadd.f32 1.0, %v6800_v33  ;;  %v3680_v33 = vsub.f32 0.0, %v3338_v39  ;;  %v3567_v41 = vadd.f32 %v3566_v6, %v8057_v8 }
 0x54a   :  { %v6804_v54 = vpop.eup %6803  ;;  %4774 = vst [vmem:[#allocation11 + $0x148] sm:$0xff] %v6802_v5  ;;  %6829 = vrcp.f32 %v4318_v49  ;;  %v3554_v49 = vadd.f32 %v3553_v55, %v8057_v8  ;;  %v3681_v55 = vsub.f32 0.0, %v3340_v2 }
 0x54b   :  { %v6806_v26 = vpop.eup %6805  ;;  %6831 = vrcp.f32 %v4347_v50  ;;  %v4324_v60 = vadd.f32 1.0, %v6804_v54  ;;  %v3752_v50 = vsub.f32 0.0, %v3562_v4  ;;  %v3344_v54 = vadd.f32 %v8073_v53, %v8054_v46 }
 0x54c   :  { %v6808_v27 = vpop.eup %6807  ;;  %v4368_v31 = vadd.f32 1.0, %v6806_v26  ;;  %6833 = vpow2.f32 %v4031_v61  ;;  %v3575_v26 = vadd.f32 %v5881_v37, %v8057_v8  ;;  %v3738_v53 = vsub.f32 0.0, %v3554_v49 }
 0x54d   :  { %v6810_v15 = vpop.eup %6809  ;;  %6835 = vrcp.f32 %v4324_v60  ;;  %v4325_v10 = vadd.f32 1.0, %v6808_v27  ;;  %v3346_v27 = vadd.f32 %v8079_v44, %v8063_v9  ;;  %v4115_v35 = vmul.f32 1.442695, %v3752_v50 }
 0x54e   :  { %v6812_v48 = vpop.eup %6811  ;;  %6837 = vrcp.f32 %v4368_v31  ;;  %v4354_v29 = vadd.f32 1.0, %v6810_v15  ;;  %v5882_v31 = vpop.f32.mrf.mxu0  ;;  %v3687_v16 = vsub.f32 0.0, %v3344_v54  ;;  %v3773_v45 = vsub.f32 0.0, %v3575_v26 }
 0x54f   :  { %v6814_v13 = vpop.eup %6813  ;;  %6839 = vrcp.f32 %v4325_v10  ;;  %v4331_v17 = vadd.f32 1.0, %v6812_v48  ;;  %v3971_v10 = vmul.f32 1.442695, %v3680_v33  ;;  %v8167_v48 = vpop.f32.mrf.mxu1  ;;  %v3578_v37 = vadd.f32 %v5882_v31, %v8057_v8 }
 0x550   :  { %v6816_v12 = vpop.eup %6815  ;;  %6841 = vrcp.f32 %v4354_v29  ;;  %v4389_v3 = vadd.f32 1.0, %v6814_v13  ;;  %v3348_v13 = vadd.f32 %v8087_v23, %v8054_v46  ;;  %v3688_v39 = vsub.f32 0.0, %v3346_v27 }
 0x551   :  { %v6818_v20 = vpop.eup %6817  ;;  %6843 = vrcp.f32 %v4331_v17  ;;  %v4332_v59 = vadd.f32 1.0, %v6816_v12  ;;  %v4087_v4 = vmul.f32 1.442695, %v3738_v53  ;;  %v3759_v23 = vsub.f32 0.0, %v3567_v41 }
 0x552   :  { %v6820_v7 = vpop.eup %6819  ;;  %6845 = vrcp.f32 %v4389_v3  ;;  %v4375_v56 = vadd.f32 1.0, %v6818_v20  ;;  %v3973_v3 = vmul.f32 1.442695, %v3681_v55  ;;  %v3350_v20 = vadd.f32 %v8094_v63, %v8063_v9 }
 0x553   :  { %v6822_v22 = vpop.eup %6821  ;;  %6847 = vrcp.f32 %v4332_v59  ;;  %v4338_v0 = vadd.f32 1.0, %v6820_v7  ;;  %v3569_v59 = vpop.f32.mrf.mxu0  ;;  %v3694_v18 = vsub.f32 0.0, %v3348_v13  ;;  %v3987_v63 = vmul.f32 1.442695, %v3688_v39 }
 0x554   :  { %v6824_v58 = vpop.eup %6823  ;;  %6849 = vrcp.f32 %v4375_v56  ;;  %v4396_v43 = vadd.f32 1.0, %v6822_v22  ;;  %v8174_v7 = vpop.f32.mrf.mxu1  ;;  %v3695_v6 = vsub.f32 0.0, %v3350_v20  ;;  %v4129_v33 = vmul.f32 1.442695, %v3759_v23 }
 0x555   :  { %v6826_v61 = vpop.eup %6825  ;;  %6851 = vrcp.f32 %v4338_v0  ;;  %v4339_v5 = vadd.f32 1.0, %v6824_v58  ;;  %v4157_v0 = vmul.f32 1.442695, %v3773_v45  ;;  %v5885_v58 = vpop.f32.mrf.mxu0  ;;  %v3570_v49 = vadd.f32 %v3569_v59, %v8057_v8 }
 0x556   :  { %v6828_v24 = vpop.eup %6827  ;;  %4765 = vst [vmem:[#allocation11 + $0x100] sm:$0xff] %v6826_v61  ;;  %6853 = vrcp.f32 %v4396_v43  ;;  %v8177_v61 = vpop.f32.mrf.mxu1  ;;  %v3999_v50 = vmul.f32 1.442695, %v3694_v18  ;;  %v4001_v26 = vmul.f32 1.442695, %v3695_v6 }
 0x557   :  { %v6830_v60 = vpop.eup %6829  ;;  %4809 = vst [vmem:[#allocation11 + $0x260] sm:$0xff] %v6828_v24  ;;  %6855 = vrcp.f32 %v4339_v5  ;;  %v3766_v55 = vsub.f32 0.0, %v3570_v49 }
 0x558   :  { %v6832_v15 = vpop.eup %6831  ;;  %4766 = vst [vmem:[#allocation11 + $0x108] sm:$0xff] %v6830_v60  ;;  %6857 = vpow2.f32 %v3957_v32  ;;  %v3985_v32 = vmul.f32 1.442695, %v3687_v16  ;;  %v3582_v60 = vpop.f32.mrf.mxu0 }
 0x559   :  { %v6834_v29 = vpop.eup %6833  ;;  %4795 = vst [vmem:[#allocation11 + $0x1f0] sm:$0xff] %v6832_v15  ;;  %6859 = vpow2.f32 %v4101_v14  ;;  %v3780_v14 = vsub.f32 0.0, %v3578_v37  ;;  %v8179_v27 = vpop.f32.mrf.mxu1  ;;  %v4143_v13 = vmul.f32 1.442695, %v3766_v55  ;;  %v3354_v37 = vadd.f32 %v8097_v62, %v8054_v46 }
 0x55a   :  { %v6836_v17 = vpop.eup %6835  ;;  %v4382_v44 = vadd.f32 1.0, %v6834_v29  ;;  %6861 = vpow2.f32 %v3959_v57  ;;  %v5886_v29 = vpop.f32.mrf.mxu0  ;;  %v3583_v6 = vadd.f32 %v3582_v60, %v8057_v8 }
 0x55b   :  { %v6838_v12 = vpop.eup %6837  ;;  %4772 = vst [vmem:[#allocation11 + $0x138] sm:$0xff] %v6836_v17  ;;  %6863 = vpow2.f32 %v4073_v25  ;;  %v4171_v24 = vmul.f32 1.442695, %v3780_v14  ;;  %v8181_v17 = vpop.f32.mrf.mxu1  ;;  %v3701_v18 = vsub.f32 0.0, %v3354_v37  ;;  %v3356_v14 = vadd.f32 %v8099_v28, %v8063_v9 }
 0x55c   :  { %v6840_v52 = vpop.eup %6839  ;;  %4816 = vst [vmem:[#allocation11 + $0x298] sm:$0xff] %v6838_v12  ;;  %6865 = vrcp.f32 %v4382_v44  ;;  %v3585_v59 = vpop.f32.mrf.mxu0 }
 0x55d   :  { %v6842_v56 = vpop.eup %6841  ;;  %4773 = vst [vmem:[#allocation11 + $0x140] sm:$0xff] %v6840_v52  ;;  %6867 = vpow2.f32 %v3971_v10  ;;  %v8186_v23 = vpop.f32.mrf.mxu1 }
 0x55e   :  { %v6844_v22 = vpop.eup %6843  ;;  %4802 = vst [vmem:[#allocation11 + $0x228] sm:$0xff] %v6842_v56  ;;  %6869 = vpow2.f32 %v4115_v35 }
 0x55f   :  { %v6846_v2 = vpop.eup %6845  ;;  %4779 = vst [vmem:[#allocation11 + $0x170] sm:$0xff] %v6844_v22  ;;  %6871 = vpow2.f32 %v3973_v3  ;;  %v3591_v3 = vadd.f32 %v5885_v58, %v8057_v8  ;;  %v5889_v58 = vpop.f32.mrf.mxu0 }
 0x560   :  { %v6848_v43 = vpop.eup %6847  ;;  %4837 = vst [vmem:[#allocation11 + $0x340] sm:$0xff] %v6846_v2  ;;  %6873 = vpow2.f32 %v4087_v4 }
 0x561   :  { %v6850_v5 = vpop.eup %6849  ;;  %4780 = vst [vmem:[#allocation11 + $0x178] sm:$0xff] %v6848_v43  ;;  %6875 = vpow2.f32 %v3985_v32 }
 0x562   :  { %v6852_v54 = vpop.eup %6851  ;;  %4823 = vst [vmem:[#allocation11 + $0x2d0] sm:$0xff] %v6850_v5  ;;  %6877 = vpow2.f32 %v4157_v0  ;;  %v3801_v0 = vsub.f32 0.0, %v3591_v3 }
 0x563   :  { %v6854_v57 = vpop.eup %6853  ;;  %4786 = vst [vmem:[#allocation11 + $0x1a8] sm:$0xff] %v6852_v54  ;;  %6879 = vpow2.f32 %v3987_v63 }
 0x564   :  { %v6856_v25 = vpop.eup %6855  ;;  %4844 = vst [vmem:[#allocation11 + $0x378] sm:$0xff] %v6854_v57  ;;  %6881 = vpow2.f32 %v4129_v33 }
 0x565   :  { %v6858_v31 = vpop.eup %6857  ;;  %4787 = vst [vmem:[#allocation11 + $0x1b0] sm:$0xff] %v6856_v25  ;;  %6883 = vpow2.f32 %v3999_v50 }
 0x566   :  { %v6860_v15 = vpop.eup %6859  ;;  %v4345_v10 = vadd.f32 1.0, %v6858_v31  ;;  %6885 = vpow2.f32 %v4171_v24 }
 0x567   :  { %v6862_v53 = vpop.eup %6861  ;;  %v4417_v41 = vadd.f32 1.0, %v6860_v15  ;;  %6887 = vpow2.f32 %v4001_v26 }
 0x568   :  { %v6864_v35 = vpop.eup %6863  ;;  %6889 = vrcp.f32 %v4345_v10  ;;  %v4346_v16 = vadd.f32 1.0, %v6862_v53 }
 0x569   :  { %v6866_v44 = vpop.eup %6865  ;;  %6891 = vrcp.f32 %v4417_v41  ;;  %v4403_v45 = vadd.f32 1.0, %v6864_v35 }
 0x56a   :  { %v6868_v12 = vpop.eup %6867  ;;  %4830 = vst [vmem:[#allocation11 + $0x308] sm:$0xff] %v6866_v44  ;;  %6893 = vrcp.f32 %v4346_v16 }
 0x56b   :  { %v6870_v39 = vpop.eup %6869  ;;  %6895 = vrcp.f32 %v4403_v45  ;;  %v4352_v20 = vadd.f32 1.0, %v6868_v12 }
 0x56c   :  { %v6872_v52 = vpop.eup %6871  ;;  %v4424_v4 = vadd.f32 1.0, %v6870_v39  ;;  %6897 = vpow2.f32 %v4143_v13 }
 0x56d   :  { %v6874_v56 = vpop.eup %6873  ;;  %6899 = vrcp.f32 %v4352_v20  ;;  %v4353_v32 = vadd.f32 1.0, %v6872_v52 }
 0x56e   :  { %v6876_v62 = vpop.eup %6875  ;;  %6901 = vrcp.f32 %v4424_v4  ;;  %v4410_v22 = vadd.f32 1.0, %v6874_v56 }
 0x56f   :  { %v6878_v2 = vpop.eup %6877  ;;  %6903 = vrcp.f32 %v4353_v32  ;;  %v4359_v63 = vadd.f32 1.0, %v6876_v62 }
 0x570   :  { %7227 = shalt.err (!%p7224_p1)
}
 0x571   :  { %s7277_s26 = smov 128   ;;  %s7278_s1 = smov 8   ;;  %v6880_v28 = vpop.eup %6879  ;;  %6905 = vrcp.f32 %v4410_v22  ;;  %v4445_v43 = vadd.f32 1.0, %v6878_v2  ;;  %v3358_v33 = vadd.f32 %v8101_v42, %v8054_v46  ;;  %v8196_v49 = vpop.f32.mrf.mxu1  ;;  %v4013_v54 = vmul.f32 1.442695, %v3701_v18 }
 0x572   :  { %5012 = dma.vmem_to_hbm [thread:$0]  %s5007_s24, 4096, %s8314_s10, [#allocation13], %s7277_s26, %s7277_s26, %s7278_s1   ;;  %v6882_v5 = vpop.eup %6881  ;;  %6907 = vrcp.f32 %v4359_v63  ;;  %v4360_v50 = vadd.f32 1.0, %v6880_v28  ;;  %v3594_v24 = vadd.f32 %v5886_v29, %v8057_v8  ;;  %v4213_v60 = vmul.f32 1.442695, %v3801_v0  ;;  %v3598_v10 = vpop.f32.mrf.mxu0 }
 0x573   :  { %v6884_v57 = vpop.eup %6883  ;;  %6909 = vrcp.f32 %v4445_v43  ;;  %v4431_v26 = vadd.f32 1.0, %v6882_v5  ;;  %v3702_v25 = vsub.f32 0.0, %v3356_v14  ;;  %v3787_v15 = vsub.f32 0.0, %v3583_v6  ;;  %v8202_v29 = vpop.f32.mrf.mxu1  ;;  %s7279_s10 = smov [#allocation11]  }
 0x574   :  { %v6886_v55 = vpop.eup %6885  ;;  %6911 = vrcp.f32 %v4360_v50  ;;  %v4366_v31 = vadd.f32 1.0, %v6884_v57  ;;  %v3360_v42 = vadd.f32 %v8106_v38, %v8063_v9  ;;  %v3708_v35 = vsub.f32 0.0, %v3358_v33  ;;  %v5890_v4 = vpop.f32.mrf.mxu0  ;;  %s4994_s29 = sshll.u32 %s7279_s10, 4  ;;  %s4995_s29 = int_to_ptr.vmem [resolvable:$true] %s4994_s29 }
 0x575   :  { %v6888_v53 = vpop.eup %6887  ;;  %6913 = vrcp.f32 %v4431_v26  ;;  %v4452_v41 = vadd.f32 1.0, %v6886_v55  ;;  %v3586_v16 = vadd.f32 %v3585_v59, %v8057_v8  ;;  %v3808_v45 = vsub.f32 0.0, %v3594_v24  ;;  %v8210_v62 = vpop.f32.mrf.mxu1  ;;  %s7236_s30 = scalar_lea.vmem %s4995_s29, 28672  ;;  %p7241_p3 = scmp.lt.s32.totalorder %s4995_s29, %s4995_s29 }
 0x576   :  { %v6890_v13 = vpop.eup %6889  ;;  %6915 = vrcp.f32 %v4366_v31  ;;  %v4367_v44 = vadd.f32 1.0, %v6888_v53  ;;  %v3364_v37 = vadd.f32 %v8113_v21, %v8054_v46  ;;  %v4015_v38 = vmul.f32 1.442695, %v3702_v25  ;;  %v3601_v25 = vpop.f32.mrf.mxu0  ;;  %p7237_p2 = scmp.ne.s32.totalorder %s4995_s29, %s7236_s30  ;;  %p7242_p4 = scmp.lt.s32.totalorder %s7236_s30, %s7236_s30 }
 0x577   :  { %v6892_v12 = vpop.eup %6891  ;;  %4793 = vst [vmem:[#allocation11 + $0x1e0] sm:$0xff] %v6890_v13  ;;  %6917 = vrcp.f32 %v4452_v41  ;;  %v3607_v3 = vadd.f32 %v5889_v58, %v8057_v8  ;;  %v4185_v20 = vmul.f32 1.442695, %v3787_v15  ;;  %v3709_v59 = vsub.f32 0.0, %v3360_v42 }
 0x578   :  { %v6894_v39 = vpop.eup %6893  ;;  %4865 = vst [vmem:[#allocation11 + $0x420] sm:$0xff] %v6892_v12  ;;  %6919 = vrcp.f32 %v4367_v44  ;;  %v3366_v52 = vadd.f32 %v8119_v34, %v8063_v9  ;;  %v4027_v32 = vmul.f32 1.442695, %v3708_v35  ;;  %v3794_v21 = vsub.f32 0.0, %v3586_v16  ;;  %p7243_p5 = por %p7242_p4, %p7241_p3 }
 0x579   :  { %v6896_v56 = vpop.eup %6895  ;;  %4794 = vst [vmem:[#allocation11 + $0x1e8] sm:$0xff] %v6894_v39  ;;  %6921 = vpow2.f32 %v4013_v54  ;;  %v3599_v18 = vadd.f32 %v3598_v10, %v8057_v8  ;;  %v4227_v0 = vmul.f32 1.442695, %v3808_v45  ;;  %v3715_v14 = vsub.f32 0.0, %v3364_v37 }
 0x57a   :  { %v6898_v22 = vpop.eup %6897  ;;  %4851 = vst [vmem:[#allocation11 + $0x3b0] sm:$0xff] %v6896_v56  ;;  %6923 = vpow2.f32 %v4213_v60  ;;  %v3368_v2 = vadd.f32 %v8127_v47, %v8054_v46  ;;  %v3829_v6 = vsub.f32 0.0, %v3607_v3  ;;  %v3610_v58 = vadd.f32 %v5890_v4, %v8057_v8  ;;  %v8217_v47 = vpop.f32.mrf.mxu1  ;;  %p7244_p6 = pnand %p7243_p5, %p7237_p2 }
 0x57b   :  { %v6900_v63 = vpop.eup %6899  ;;  %v4438_v34 = vadd.f32 1.0, %v6898_v22  ;;  %6925 = vpow2.f32 %v4015_v38  ;;  %v4029_v43 = vmul.f32 1.442695, %v3709_v59  ;;  %v3716_v33 = vsub.f32 0.0, %v3366_v52 }
 0x57c   :  { %v6902_v28 = vpop.eup %6901  ;;  %4800 = vst [vmem:[#allocation11 + $0x218] sm:$0xff] %v6900_v63  ;;  %6927 = vpow2.f32 %v4185_v20  ;;  %v3370_v5 = vadd.f32 %v8134_v30, %v8063_v9  ;;  %v4199_v54 = vmul.f32 1.442695, %v3794_v21  ;;  %v3815_v24 = vsub.f32 0.0, %v3599_v18  ;;  %v8220_v16 = vpop.f32.mrf.mxu1 }
 0x57d   :  { %v6904_v50 = vpop.eup %6903  ;;  %4872 = vst [vmem:[#allocation11 + $0x458] sm:$0xff] %v6902_v28  ;;  %6929 = vrcp.f32 %v4438_v34  ;;  %v4041_v26 = vmul.f32 1.442695, %v3715_v14  ;;  %v3722_v60 = vsub.f32 0.0, %v3368_v2  ;;  %v4269_v31 = vmul.f32 1.442695, %v3829_v6 }
 0x57e   :  { %v6906_v57 = vpop.eup %6905  ;;  %4801 = vst [vmem:[#allocation11 + $0x220] sm:$0xff] %v6904_v50  ;;  %6931 = vpow2.f32 %v4027_v32  ;;  %v3836_v15 = vsub.f32 0.0, %v3610_v58  ;;  %v4043_v30 = vmul.f32 1.442695, %v3716_v33  ;;  %v3723_v10 = vsub.f32 0.0, %v3370_v5  ;;  %v8222_v20 = vpop.f32.mrf.mxu1 }
 0x57f   :  { %v6908_v55 = vpop.eup %6907  ;;  %4858 = vst [vmem:[#allocation11 + $0x3e8] sm:$0xff] %v6906_v57  ;;  %6933 = vpow2.f32 %v4227_v0  ;;  %v4241_v41 = vmul.f32 1.442695, %v3815_v24  ;;  %v3602_v35 = vadd.f32 %v3601_v25, %v8057_v8  ;;  %v4055_v44 = vmul.f32 1.442695, %v3722_v60 }
 0x580   :  { %v6910_v42 = vpop.eup %6909  ;;  %4807 = vst [vmem:[#allocation11 + $0x250] sm:$0xff] %v6908_v55  ;;  %6935 = vpow2.f32 %v4029_v43  ;;  %v4283_v37 = vmul.f32 1.442695, %v3836_v15  ;;  %v4057_v38 = vmul.f32 1.442695, %v3723_v10  ;;  %v8224_v22 = vpop.f32.mrf.mxu1  ;;  %v3374_v2 = vadd.f32 %v8137_v40, %v8054_v46 }
 0x581   :  { %v6912_v53 = vpop.eup %6911  ;;  %4893 = vst [vmem:[#allocation11 + $0x500] sm:$0xff] %v6910_v42  ;;  %6937 = vpow2.f32 %v4199_v54  ;;  %v3822_v39 = vsub.f32 0.0, %v3602_v35  ;;  %v3376_v34 = vadd.f32 %v8139_v1, %v8063_v9  ;;  %v3380_v25 = vadd.f32 %v8146_v51, %v8063_v9 }
 0x582   :  { %v6914_v13 = vpop.eup %6913  ;;  %4808 = vst [vmem:[#allocation11 + $0x258] sm:$0xff] %v6912_v53  ;;  %6939 = vpow2.f32 %v4041_v26  ;;  %v8230_v33 = vpop.f32.mrf.mxu1  ;;  %v3729_v54 = vsub.f32 0.0, %v3374_v2  ;;  %v3378_v26 = vadd.f32 %v8141_v36, %v8054_v46  ;;  %v3384_v15 = vadd.f32 %v8153_v19, %v8054_v46 }
 0x583   :  { %v6916_v45 = vpop.eup %6915  ;;  %4879 = vst [vmem:[#allocation11 + $0x490] sm:$0xff] %v6914_v13  ;;  %6941 = vpow2.f32 %v4269_v31  ;;  %v4255_v18 = vmul.f32 1.442695, %v3822_v39  ;;  %v3730_v57 = vsub.f32 0.0, %v3376_v34  ;;  %v3386_v36 = vadd.f32 %v8159_v11, %v8063_v9 }
 0x584   :  { %v6918_v12 = vpop.eup %6917  ;;  %4814 = vst [vmem:[#allocation11 + $0x288] sm:$0xff] %v6916_v45  ;;  %6943 = vpow2.f32 %v4043_v30  ;;  %v8238_v42 = vpop.f32.mrf.mxu1  ;;  %v4069_v53 = vmul.f32 1.442695, %v3729_v54  ;;  %v3736_v51 = vsub.f32 0.0, %v3378_v26  ;;  %v3388_v19 = vadd.f32 %v8167_v48, %v8054_v46 }
 0x585   :  { %v6920_v3 = vpop.eup %6919  ;;  %4900 = vst [vmem:[#allocation11 + $0x538] sm:$0xff] %v6918_v12  ;;  %6945 = vpow2.f32 %v4241_v41  ;;  %v4071_v13 = vmul.f32 1.442695, %v3730_v57  ;;  %v3390_v39 = vadd.f32 %v8174_v7, %v8063_v9 }
 0x586   :  { %v6922_v8 = vpop.eup %6921  ;;  %4815 = vst [vmem:[#allocation11 + $0x290] sm:$0xff] %v6920_v3  ;;  %6947 = vpow2.f32 %v4055_v44  ;;  %v3743_v3 = vsub.f32 0.0, %v3384_v15  ;;  %v8246_v11 = vpop.f32.mrf.mxu1  ;;  %v4083_v48 = vmul.f32 1.442695, %v3736_v51 }
 0x587   :  { %v6924_v59 = vpop.eup %6923  ;;  %v4373_v52 = vadd.f32 1.0, %v6922_v8  ;;  %6949 = vpow2.f32 %v4283_v37  ;;  %v3737_v37 = vsub.f32 0.0, %v3380_v25 }
 0x588   :  { %v6926_v4 = vpop.eup %6925  ;;  %v4473_v56 = vadd.f32 1.0, %v6924_v59  ;;  %6951 = vpow2.f32 %v4057_v38  ;;  %v4097_v2 = vmul.f32 1.442695, %v3743_v3  ;;  %v8256_v34 = vpop.f32.mrf.mxu1 }
 0x589   :  { %v6928_v32 = vpop.eup %6927  ;;  %6953 = vrcp.f32 %v4373_v52  ;;  %v4374_v21 = vadd.f32 1.0, %v6926_v4  ;;  %v3744_v52 = vsub.f32 0.0, %v3386_v36  ;;  %v3394_v4 = vadd.f32 %v8177_v61, %v8054_v46 }
 0x58a   :  { %v6930_v0 = vpop.eup %6929  ;;  %6955 = vrcp.f32 %v4473_v56  ;;  %v4459_v14 = vadd.f32 1.0, %v6928_v32  ;;  %v3396_v32 = vadd.f32 %v8179_v27, %v8063_v9  ;;  %v4085_v7 = vmul.f32 1.442695, %v3737_v37 }
 0x58b   :  { %v6932_v63 = vpop.eup %6931  ;;  %4886 = vst [vmem:[#allocation11 + $0x4c8] sm:$0xff] %v6930_v0  ;;  %6957 = vrcp.f32 %v4374_v21  ;;  %v3398_v0 = vadd.f32 %v8181_v17, %v8054_v46  ;;  %v3751_v61 = vsub.f32 0.0, %v3390_v39  ;;  %v4099_v27 = vmul.f32 1.442695, %v3744_v52 }
 0x58c   :  { %v6934_v6 = vpop.eup %6933  ;;  %6959 = vrcp.f32 %v4459_v14  ;;  %v4380_v58 = vadd.f32 1.0, %v6932_v63  ;;  %v3400_v63 = vadd.f32 %v8186_v23, %v8063_v9 }
 0x58d   :  { %v6936_v28 = vpop.eup %6935  ;;  %v4480_v43 = vadd.f32 1.0, %v6934_v6  ;;  %6961 = vpow2.f32 %v4255_v18  ;;  %v3750_v18 = vsub.f32 0.0, %v3388_v19  ;;  %v4113_v26 = vmul.f32 1.442695, %v3751_v61 }
 0x58e   :  { %v6938_v5 = vpop.eup %6937  ;;  %6963 = vrcp.f32 %v4380_v58  ;;  %v4381_v50 = vadd.f32 1.0, %v6936_v28  ;;  %v3757_v58 = vsub.f32 0.0, %v3394_v4  ;;  %v3404_v28 = vadd.f32 %v8196_v49, %v8054_v46 }
 0x58f   :  { %v6940_v24 = vpop.eup %6939  ;;  %6965 = vrcp.f32 %v4480_v43  ;;  %v4466_v40 = vadd.f32 1.0, %v6938_v5  ;;  %v3758_v5 = vsub.f32 0.0, %v3396_v32  ;;  %v4111_v23 = vmul.f32 1.442695, %v3750_v18 }
 0x590   :  { %v6942_v1 = vpop.eup %6941  ;;  %6967 = vrcp.f32 %v4381_v50  ;;  %v4387_v60 = vadd.f32 1.0, %v6940_v24  ;;  %v3406_v50 = vadd.f32 %v8202_v29, %v8063_v9  ;;  %v3764_v24 = vsub.f32 0.0, %v3398_v0 }
 0x591   :  { %v6944_v55 = vpop.eup %6943  ;;  %6969 = vrcp.f32 %v4466_v40  ;;  %v4501_v31 = vadd.f32 1.0, %v6942_v1  ;;  %v3408_v40 = vadd.f32 %v8210_v62, %v8054_v46  ;;  %v3765_v49 = vsub.f32 0.0, %v3400_v63  ;;  %v8264_v1 = vpop.f32.mrf.mxu1 }
 0x592   :  { %v6946_v30 = vpop.eup %6945  ;;  %6971 = vrcp.f32 %v4387_v60  ;;  %v4388_v10 = vadd.f32 1.0, %v6944_v55  ;;  %v4125_v25 = vmul.f32 1.442695, %v3757_v58  ;;  %v3771_v29 = vsub.f32 0.0, %v3404_v28 }
 0x593   :  { %v6948_v41 = vpop.eup %6947  ;;  %6973 = vrcp.f32 %v4501_v31  ;;  %v4487_v35 = vadd.f32 1.0, %v6946_v30  ;;  %v4127_v31 = vmul.f32 1.442695, %v3758_v5  ;;  %v3772_v15 = vsub.f32 0.0, %v3406_v50 }
 0x594   :  { %v6950_v44 = vpop.eup %6949  ;;  %6975 = vrcp.f32 %v4388_v10  ;;  %v4394_v45 = vadd.f32 1.0, %v6948_v41  ;;  %v4139_v62 = vmul.f32 1.442695, %v3764_v24  ;;  %v3778_v10 = vsub.f32 0.0, %v3408_v40 }
 0x595   :  { %v6952_v12 = vpop.eup %6951  ;;  %6977 = vrcp.f32 %v4487_v35  ;;  %v4508_v38 = vadd.f32 1.0, %v6950_v44  ;;  %v4141_v36 = vmul.f32 1.442695, %v3765_v49  ;;  %v3410_v41 = vadd.f32 %v8217_v47, %v8063_v9  ;;  %v8268_v35 = vpop.f32.mrf.mxu1 }
 0x596   :  { %v6954_v8 = vpop.eup %6953  ;;  %6979 = vrcp.f32 %v4394_v45  ;;  %v4395_v59 = vadd.f32 1.0, %v6952_v12  ;;  %v4153_v51 = vmul.f32 1.442695, %v3771_v29  ;;  %v4155_v45 = vmul.f32 1.442695, %v3772_v15 }
 0x597   :  { %v6956_v56 = vpop.eup %6955  ;;  %4821 = vst [vmem:[#allocation11 + $0x2c0] sm:$0xff] %v6954_v8  ;;  %6981 = vrcp.f32 %v4508_v38  ;;  %v4167_v19 = vmul.f32 1.442695, %v3778_v10  ;;  %v3779_v38 = vsub.f32 0.0, %v3410_v41  ;;  %v8270_v3 = vpop.f32.mrf.mxu1  ;;  %v3414_v18 = vadd.f32 %v8220_v16, %v8054_v46 }
 0x598   :  { %v6958_v21 = vpop.eup %6957  ;;  %4921 = vst [vmem:[#allocation11 + $0x5e0] sm:$0xff] %v6956_v56  ;;  %6983 = vrcp.f32 %v4395_v59  ;;  %v3418_v50 = vadd.f32 %v8224_v22, %v8054_v46  ;;  %v3426_v22 = vadd.f32 %v8246_v11, %v8063_v9  ;;  %v3430_v41 = vadd.f32 %v8264_v1, %v8063_v9 }
 0x599   :  { %v6960_v14 = vpop.eup %6959  ;;  %4822 = vst [vmem:[#allocation11 + $0x2c8] sm:$0xff] %v6958_v21  ;;  %6985 = vpow2.f32 %v4069_v53  ;;  %v8272_v32 = vpop.f32.mrf.mxu1 }
 0x59a   :  { %v6962_v6 = vpop.eup %6961  ;;  %4907 = vst [vmem:[#allocation11 + $0x570] sm:$0xff] %v6960_v14  ;;  %6987 = vpow2.f32 %v4071_v13  ;;  %v3416_v14 = vadd.f32 %v8222_v20, %v8063_v9  ;;  %v3792_v15 = vsub.f32 0.0, %v3418_v50 }
 0x59b   :  { %v6964_v43 = vpop.eup %6963  ;;  %v4494_v17 = vadd.f32 1.0, %v6962_v6  ;;  %6989 = vpow2.f32 %v4083_v48  ;;  %v4169_v48 = vmul.f32 1.442695, %v3779_v38 }
 0x59c   :  { %v6966_v54 = vpop.eup %6965  ;;  %4828 = vst [vmem:[#allocation11 + $0x2f8] sm:$0xff] %v6964_v43  ;;  %6991 = vpow2.f32 %v4085_v7  ;;  %v3785_v43 = vsub.f32 0.0, %v3414_v18  ;;  %v3786_v5 = vsub.f32 0.0, %v3416_v14 }
 0x59d   :  { %v6968_v57 = vpop.eup %6967  ;;  %4928 = vst [vmem:[#allocation11 + $0x618] sm:$0xff] %v6966_v54  ;;  %6993 = vrcp.f32 %v4494_v17 }
 0x59e   :  { %v6970_v60 = vpop.eup %6969  ;;  %4829 = vst [vmem:[#allocation11 + $0x300] sm:$0xff] %v6968_v57  ;;  %6995 = vpow2.f32 %v4097_v2  ;;  %v3424_v57 = vadd.f32 %v8238_v42, %v8054_v46  ;;  %v3428_v42 = vadd.f32 %v8256_v34, %v8054_v46  ;;  %v3436_v34 = vadd.f32 %v8270_v3, %v8063_v9 }
 0x59f   :  { %v6972_v55 = vpop.eup %6971  ;;  %4914 = vst [vmem:[#allocation11 + $0x5a8] sm:$0xff] %v6970_v60  ;;  %6997 = vpow2.f32 %v4099_v27  ;;  %v3439_v27 = vpop.f32.mrf.mxu1 }
 0x5a0   :  { %v6974_v30 = vpop.eup %6973  ;;  %4835 = vst [vmem:[#allocation11 + $0x330] sm:$0xff] %v6972_v55  ;;  %6999 = vpow2.f32 %v4111_v23  ;;  %v3420_v23 = vadd.f32 %v8230_v33, %v8063_v9  ;;  %v3806_v1 = vsub.f32 0.0, %v3428_v42  ;;  %v3814_v18 = vsub.f32 0.0, %v3436_v34 }
 0x5a1   :  { %v6976_v53 = vpop.eup %6975  ;;  %4949 = vst [vmem:[#allocation11 + $0x6c0] sm:$0xff] %v6974_v30  ;;  %7001 = vpow2.f32 %v4113_v26  ;;  %v3443_v26 = vpop.f32.mrf.mxu1 }
 0x5a2   :  { %v6978_v13 = vpop.eup %6977  ;;  %4836 = vst [vmem:[#allocation11 + $0x338] sm:$0xff] %v6976_v53  ;;  %7003 = vpow2.f32 %v4125_v25  ;;  %v4181_v25 = vmul.f32 1.442695, %v3785_v43  ;;  %v4223_v14 = vmul.f32 1.442695, %v3806_v1 }
 0x5a3   :  { %v6980_v44 = vpop.eup %6979  ;;  %4935 = vst [vmem:[#allocation11 + $0x650] sm:$0xff] %v6978_v13  ;;  %7005 = vpow2.f32 %v4127_v31  ;;  %v4183_v31 = vmul.f32 1.442695, %v3786_v5  ;;  %v3445_v11 = vpop.f32.mrf.mxu1  ;;  %v4239_v5 = vmul.f32 1.442695, %v3814_v18 }
 0x5a4   :  { %v6982_v37 = vpop.eup %6981  ;;  %4842 = vst [vmem:[#allocation11 + $0x368] sm:$0xff] %v6980_v44  ;;  %7007 = vpow2.f32 %v4139_v62  ;;  %v3793_v62 = vsub.f32 0.0, %v3420_v23  ;;  %v3800_v44 = vsub.f32 0.0, %v3426_v22 }
 0x5a5   :  { %v6984_v12 = vpop.eup %6983  ;;  %4956 = vst [vmem:[#allocation11 + $0x6f8] sm:$0xff] %v6982_v37  ;;  %7009 = vpow2.f32 %v4141_v36  ;;  %v3799_v36 = vsub.f32 0.0, %v3424_v57 }
 0x5a6   :  { %v6986_v47 = vpop.eup %6985  ;;  %4843 = vst [vmem:[#allocation11 + $0x370] sm:$0xff] %v6984_v12  ;;  %7011 = vpow2.f32 %v4153_v51  ;;  %v4197_v38 = vmul.f32 1.442695, %v3793_v62  ;;  %v4211_v3 = vmul.f32 1.442695, %v3800_v44 }
 0x5a7   :  { %v6988_v39 = vpop.eup %6987  ;;  %v4401_v8 = vadd.f32 1.0, %v6986_v47  ;;  %7013 = vpow2.f32 %v4155_v45  ;;  %v3434_v45 = vadd.f32 %v8268_v35, %v8054_v46  ;;  %v3438_v47 = vadd.f32 %v8272_v32, %v8054_v46 }
 0x5a8   :  { %v6990_v59 = vpop.eup %6989  ;;  %v4402_v52 = vadd.f32 1.0, %v6988_v39  ;;  %7015 = vpow2.f32 %v4167_v19  ;;  %v4195_v19 = vmul.f32 1.442695, %v3792_v15  ;;  %v3807_v35 = vsub.f32 0.0, %v3430_v41 }
 0x5a9   :  { %v6992_v4 = vpop.eup %6991  ;;  %7017 = vrcp.f32 %v4401_v8  ;;  %v4408_v56 = vadd.f32 1.0, %v6990_v59  ;;  %v4209_v8 = vmul.f32 1.442695, %v3799_v36  ;;  %v3440_v59 = vadd.f32 %v3439_v27, %v8063_v9 }
 0x5aa   :  { %v6994_v21 = vpop.eup %6993  ;;  %7019 = vrcp.f32 %v4402_v52  ;;  %v4409_v7 = vadd.f32 1.0, %v6992_v4  ;;  %v3447_v52 = vpop.f32.mrf.mxu1  ;;  %v3446_v32 = vadd.f32 %v3445_v11, %v8063_v9 }
 0x5ab   :  { %v6996_v0 = vpop.eup %6995  ;;  %4942 = vst [vmem:[#allocation11 + $0x688] sm:$0xff] %v6994_v21  ;;  %7021 = vrcp.f32 %v4408_v56  ;;  %v3813_v56 = vsub.f32 0.0, %v3434_v45  ;;  %v3821_v27 = vsub.f32 0.0, %v3440_v59 }
 0x5ac   :  { %v6998_v2 = vpop.eup %6997  ;;  %7023 = vrcp.f32 %v4409_v7  ;;  %v4415_v61 = vadd.f32 1.0, %v6996_v0  ;;  %v3828_v50 = vsub.f32 0.0, %v3446_v32 }
 0x5ad   :  { %v7000_v63 = vpop.eup %6999  ;;  %v4416_v6 = vadd.f32 1.0, %v6998_v2  ;;  %7025 = vpow2.f32 %v4169_v48  ;;  %v3444_v48 = vadd.f32 %v3443_v26, %v8054_v46  ;;  %v3820_v2 = vsub.f32 0.0, %v3438_v47 }
 0x5ae   :  { %v7002_v58 = vpop.eup %7001  ;;  %7027 = vrcp.f32 %v4415_v61  ;;  %v4422_v28 = vadd.f32 1.0, %v7000_v63  ;;  %v3448_v61 = vadd.f32 %v3447_v52, %v8054_v46 }
 0x5af   :  { %v7004_v17 = vpop.eup %7003  ;;  %7029 = vrcp.f32 %v4416_v6  ;;  %v4423_v16 = vadd.f32 1.0, %v7002_v58  ;;  %v4225_v6 = vmul.f32 1.442695, %v3807_v35  ;;  %v3827_v43 = vsub.f32 0.0, %v3444_v48 }
 0x5b0   :  { %v7006_v54 = vpop.eup %7005  ;;  %7031 = vrcp.f32 %v4422_v28  ;;  %v4429_v20 = vadd.f32 1.0, %v7004_v17  ;;  %v4237_v28 = vmul.f32 1.442695, %v3813_v56  ;;  %v3449_v17 = vpop.f32.mrf.mxu1  ;;  %v4251_v46 = vmul.f32 1.442695, %v3820_v2 }
 0x5b1   :  { %v7008_v24 = vpop.eup %7007  ;;  %7033 = vrcp.f32 %v4423_v16  ;;  %v4430_v40 = vadd.f32 1.0, %v7006_v54  ;;  %v4265_v26 = vmul.f32 1.442695, %v3827_v43 }
 0x5b2   :  { %v7010_v49 = vpop.eup %7009  ;;  %7035 = vrcp.f32 %v4429_v20  ;;  %v4436_v60 = vadd.f32 1.0, %v7008_v24  ;;  %v3834_v20 = vsub.f32 0.0, %v3448_v61  ;;  %v4253_v24 = vmul.f32 1.442695, %v3821_v27 }
 0x5b3   :  { %v7012_v29 = vpop.eup %7011  ;;  %7037 = vrcp.f32 %v4430_v40  ;;  %v4437_v55 = vadd.f32 1.0, %v7010_v49  ;;  %v3450_v40 = vadd.f32 %v3449_v17, %v8063_v9 }
 0x5b4   :  { %v7014_v33 = vpop.eup %7013  ;;  %7039 = vrcp.f32 %v4436_v60  ;;  %v4443_v30 = vadd.f32 1.0, %v7012_v29  ;;  %v4267_v60 = vmul.f32 1.442695, %v3828_v50  ;;  %v4279_v22 = vmul.f32 1.442695, %v3834_v20 }
 0x5b5   :  { %v7016_v10 = vpop.eup %7015  ;;  %7041 = vrcp.f32 %v4437_v55  ;;  %v4444_v53 = vadd.f32 1.0, %v7014_v33  ;;  %v3835_v55 = vsub.f32 0.0, %v3450_v40 }
 0x5b6   :  { %v7018_v13 = vpop.eup %7017  ;;  %7043 = vrcp.f32 %v4443_v30  ;;  %v4450_v51 = vadd.f32 1.0, %v7016_v10 }
 0x5b7   :  { %v7020_v37 = vpop.eup %7019  ;;  %4849 = vst [vmem:[#allocation11 + $0x3a0] sm:$0xff] %v7018_v13  ;;  %7045 = vrcp.f32 %v4444_v53  ;;  %v4281_v10 = vmul.f32 1.442695, %v3835_v55 }
 0x5b8   :  { %v7022_v12 = vpop.eup %7021  ;;  %4850 = vst [vmem:[#allocation11 + $0x3a8] sm:$0xff] %v7020_v37  ;;  %7047 = vrcp.f32 %v4450_v51 }
 0x5b9   :  { %v7024_v39 = vpop.eup %7023  ;;  %4856 = vst [vmem:[#allocation11 + $0x3d8] sm:$0xff] %v7022_v12  ;;  %7049 = vpow2.f32 %v4181_v25 }
 0x5ba   :  { %v7026_v4 = vpop.eup %7025  ;;  %4857 = vst [vmem:[#allocation11 + $0x3e0] sm:$0xff] %v7024_v39  ;;  %7051 = vpow2.f32 %v4183_v31 }
 0x5bb   :  { %v7028_v21 = vpop.eup %7027  ;;  %v4451_v7 = vadd.f32 1.0, %v7026_v4  ;;  %7053 = vpow2.f32 %v4195_v19 }
 0x5bc   :  { %v7030_v0 = vpop.eup %7029  ;;  %4863 = vst [vmem:[#allocation11 + $0x410] sm:$0xff] %v7028_v21  ;;  %7055 = vpow2.f32 %v4197_v38 }
 0x5bd   :  { %v7032_v63 = vpop.eup %7031  ;;  %4864 = vst [vmem:[#allocation11 + $0x418] sm:$0xff] %v7030_v0  ;;  %7057 = vrcp.f32 %v4451_v7 }
 0x5be   :  { %v7034_v58 = vpop.eup %7033  ;;  %4870 = vst [vmem:[#allocation11 + $0x448] sm:$0xff] %v7032_v63  ;;  %7059 = vpow2.f32 %v4209_v8 }
 0x5bf   :  { %v7036_v16 = vpop.eup %7035  ;;  %4871 = vst [vmem:[#allocation11 + $0x450] sm:$0xff] %v7034_v58  ;;  %7061 = vpow2.f32 %v4211_v3 }
 0x5c0   :  { %v7038_v54 = vpop.eup %7037  ;;  %4877 = vst [vmem:[#allocation11 + $0x480] sm:$0xff] %v7036_v16  ;;  %7063 = vpow2.f32 %v4223_v14 }
 0x5c1   :  { %v7040_v23 = vpop.eup %7039  ;;  %4878 = vst [vmem:[#allocation11 + $0x488] sm:$0xff] %v7038_v54  ;;  %7065 = vpow2.f32 %v4225_v6 }
 0x5c2   :  { %v7042_v57 = vpop.eup %7041  ;;  %4884 = vst [vmem:[#allocation11 + $0x4b8] sm:$0xff] %v7040_v23  ;;  %7067 = vpow2.f32 %v4237_v28 }
 0x5c3   :  { %v7044_v49 = vpop.eup %7043  ;;  %4885 = vst [vmem:[#allocation11 + $0x4c0] sm:$0xff] %v7042_v57  ;;  %7069 = vpow2.f32 %v4239_v5 }
 0x5c4   :  { %v7046_v25 = vpop.eup %7045  ;;  %4891 = vst [vmem:[#allocation11 + $0x4f0] sm:$0xff] %v7044_v49  ;;  %7071 = vpow2.f32 %v4251_v46 }
 0x5c5   :  { %v7048_v29 = vpop.eup %7047  ;;  %4892 = vst [vmem:[#allocation11 + $0x4f8] sm:$0xff] %v7046_v25  ;;  %7073 = vpow2.f32 %v4253_v24 }
 0x5c6   :  { %v7050_v31 = vpop.eup %7049  ;;  %4898 = vst [vmem:[#allocation11 + $0x528] sm:$0xff] %v7048_v29  ;;  %7075 = vpow2.f32 %v4265_v26 }
 0x5c7   :  { %v7052_v9 = vpop.eup %7051  ;;  %v4457_v15 = vadd.f32 1.0, %v7050_v31  ;;  %7077 = vpow2.f32 %v4267_v60 }
 0x5c8   :  { %v7054_v33 = vpop.eup %7053  ;;  %v4458_v30 = vadd.f32 1.0, %v7052_v9  ;;  %7079 = vpow2.f32 %v4279_v22 }
 0x5c9   :  { %v7056_v62 = vpop.eup %7055  ;;  %7081 = vrcp.f32 %v4457_v15  ;;  %v4464_v42 = vadd.f32 1.0, %v7054_v33 }
 0x5ca   :  { %v7058_v53 = vpop.eup %7057  ;;  %7083 = vrcp.f32 %v4458_v30  ;;  %v4465_v36 = vadd.f32 1.0, %v7056_v62 }
 0x5cb   :  { %v7060_v41 = vpop.eup %7059  ;;  %4899 = vst [vmem:[#allocation11 + $0x530] sm:$0xff] %v7058_v53  ;;  %7085 = vrcp.f32 %v4464_v42 }
 0x5cc   :  { %v7062_v11 = vpop.eup %7061  ;;  %7087 = vrcp.f32 %v4465_v36  ;;  %v4471_v13 = vadd.f32 1.0, %v7060_v41 }
 0x5cd   :  { %v7064_v51 = vpop.eup %7063  ;;  %v4472_v44 = vadd.f32 1.0, %v7062_v11  ;;  %7089 = vpow2.f32 %v4281_v10 }
 0x5ce   :  { %v7066_v45 = vpop.eup %7065  ;;  %7091 = vrcp.f32 %v4471_v13  ;;  %v4478_v37 = vadd.f32 1.0, %v7064_v51 }
 0x5cf   :  { %v7068_v19 = vpop.eup %7067  ;;  %7093 = vrcp.f32 %v4472_v44  ;;  %v4479_v34 = vadd.f32 1.0, %v7066_v45 }
 0x5d0   :  { %v7070_v12 = vpop.eup %7069  ;;  %7095 = vrcp.f32 %v4478_v37  ;;  %v4485_v38 = vadd.f32 1.0, %v7068_v19 }
 0x5d1   :  { %v7072_v1 = vpop.eup %7071  ;;  %7097 = vrcp.f32 %v4479_v34  ;;  %v4486_v47 = vadd.f32 1.0, %v7070_v12 }
 0x5d2   :  { %v7074_v39 = vpop.eup %7073  ;;  %7099 = vrcp.f32 %v4485_v38  ;;  %v4492_v8 = vadd.f32 1.0, %v7072_v1 }
 0x5d3   :  { %v7076_v35 = vpop.eup %7075  ;;  %7101 = vrcp.f32 %v4486_v47  ;;  %v4493_v59 = vadd.f32 1.0, %v7074_v39 }
 0x5d4   :  { %v7078_v52 = vpop.eup %7077  ;;  %7103 = vrcp.f32 %v4492_v8  ;;  %v4499_v4 = vadd.f32 1.0, %v7076_v35 }
 0x5d5   :  { %v7080_v3 = vpop.eup %7079  ;;  %7105 = vrcp.f32 %v4493_v59  ;;  %v4500_v56 = vadd.f32 1.0, %v7078_v52 }
 0x5d6   :  { %v7082_v48 = vpop.eup %7081  ;;  %7107 = vrcp.f32 %v4499_v4  ;;  %v4506_v21 = vadd.f32 1.0, %v7080_v3 }
 0x5d7   :  { %v7084_v7 = vpop.eup %7083  ;;  %4905 = vst [vmem:[#allocation11 + $0x560] sm:$0xff] %v7082_v48  ;;  %7109 = vrcp.f32 %v4500_v56 }
 0x5d8   :  { %v7086_v18 = vpop.eup %7085  ;;  %4906 = vst [vmem:[#allocation11 + $0x568] sm:$0xff] %v7084_v7  ;;  %7111 = vrcp.f32 %v4506_v21 }
 0x5d9   :  { %v7088_v32 = vpop.eup %7087  ;;  %4912 = vst [vmem:[#allocation11 + $0x598] sm:$0xff] %v7086_v18 }
 0x5da   :  { %v7090_v0 = vpop.eup %7089  ;;  %4913 = vst [vmem:[#allocation11 + $0x5a0] sm:$0xff] %v7088_v32 }
 0x5db   :  { %v7092_v14 = vpop.eup %7091  ;;  %v4507_v2 = vadd.f32 1.0, %v7090_v0 }
 0x5dc   :  { %v7094_v61 = vpop.eup %7093  ;;  %4919 = vst [vmem:[#allocation11 + $0x5d0] sm:$0xff] %v7092_v14 }
 0x5dd   :  { %v7096_v63 = vpop.eup %7095  ;;  %4920 = vst [vmem:[#allocation11 + $0x5d8] sm:$0xff] %v7094_v61  ;;  %7113 = vrcp.f32 %v4507_v2 }
 0x5de   :  { %v7098_v6 = vpop.eup %7097  ;;  %4926 = vst [vmem:[#allocation11 + $0x608] sm:$0xff] %v7096_v63 }
 0x5df   :  { %v7100_v27 = vpop.eup %7099  ;;  %4927 = vst [vmem:[#allocation11 + $0x610] sm:$0xff] %v7098_v6 }
 0x5e0   :  { %v7102_v58 = vpop.eup %7101  ;;  %4933 = vst [vmem:[#allocation11 + $0x640] sm:$0xff] %v7100_v27 }
 0x5e1   :  { %v7104_v28 = vpop.eup %7103  ;;  %4934 = vst [vmem:[#allocation11 + $0x648] sm:$0xff] %v7102_v58 }
 0x5e2   :  { %v7106_v43 = vpop.eup %7105  ;;  %4940 = vst [vmem:[#allocation11 + $0x678] sm:$0xff] %v7104_v28 }
 0x5e3   :  { %v7108_v17 = vpop.eup %7107  ;;  %4941 = vst [vmem:[#allocation11 + $0x680] sm:$0xff] %v7106_v43 }
 0x5e4   :  { %v7110_v16 = vpop.eup %7109  ;;  %4947 = vst [vmem:[#allocation11 + $0x6b0] sm:$0xff] %v7108_v17 }
 0x5e5   :  { %v7112_v5 = vpop.eup %7111  ;;  %4948 = vst [vmem:[#allocation11 + $0x6b8] sm:$0xff] %v7110_v16 }
 0x5e6   :  { %4954 = vst [vmem:[#allocation11 + $0x6e8] sm:$0xff] %v7112_v5 }
 0x5ea   :  { %v7114_v50 = vpop.eup %7113 }
 0x5eb   :  { %4955 = vst [vmem:[#allocation11 + $0x6f0] sm:$0xff] %v7114_v50 }
 0x5ec   :  { %7247 = shalt.err (!%p7244_p6)
}
 0x5ed   :  { %s7280_s11 = smov 896   ;;  %s7281_s12 = smov 56  }
 0x5ee   :  { %5000 = dma.vmem_to_hbm [thread:$0]  %s4995_s29, 28672, %s8313_s9, [#allocation4], %s7280_s11, %s7280_s11, %s7281_s12  }
 0x5ef   :  { %7262 = dma.done.wait [#allocation4], 28672  }
 0x5f0   :  { %7263 = vsyncadd [#allocation4], 4294938624 }
 0x5f1   :  { %7264 = dma.done.wait [#allocation13], 4096  }
 0x5f2   :  { %7265 = vsyncadd [#allocation13], 4294963200 }
 0x5f3   :  { %5019 = vsyncpa [#allocation3], 1 }
 0x5f4   :  { %5020 = vsyncpa [#allocation6], 1 }
 0x5f5   :  { %5021 = vsyncpa [#allocation9], 1 }
 0x5f6   :  { %5022 = vsyncpa [#allocation4], 1 }
 0x5f7   :  { %5023 = vsyncpa [#allocation13], 1 }

</bundles_post_ra>
